<compile_context>
chip_gen: v7x
topology: tpu7x:2x2x1
jax: 0.10.0
libtpu: 0.0.40
codegen_flags: <defaults>
</compile_context>

<pallas_src>
import jax
import jax.numpy as jnp
import numpy as np
from jax.experimental import pallas as pl
from jax.experimental.pallas import tpu as pltpu


# ----------------------------------------------------------------------------
# Padding helpers (gate order is PyTorch's i | f | g | o).
# ----------------------------------------------------------------------------
def _round_up(x, m):
    return ((x + m - 1) // m) * m


def _pad_gate_cols(w, h, hp):
    """Zero-pad the trailing (4*h,) gate axis to (4*hp,), per gate chunk."""
    if hp == h:
        return w
    lead = w.shape[:-1]
    w4 = w.reshape(lead + (4, h))
    pad = [(0, 0)] * (w4.ndim - 1) + [(0, hp - h)]
    return jnp.pad(w4, pad).reshape(lead + (4 * hp,))


def _pad_axis(w, axis, n, n_pad):
    """Zero-pad `axis` from n to n_pad."""
    if n_pad == n:
        return w
    pad = [(0, 0)] * w.ndim
    pad[axis] = (0, n_pad - n)
    return jnp.pad(w, pad)


# ----------------------------------------------------------------------------
# Fused Pallas kernel: all LSTM layers over the full sequence, single launch.
#   gx0_ref : (T, Bp, 4Hp)  precomputed layer-0 gates (x @ W_ih0 + b0)
#   wih_ref : (max(L-1,1), Hp, 4Hp)  W_ih for layers 1..L-1
#   whh_ref : (L, Hp, 4Hp)           W_hh for all layers
#   b_ref   : (max(L-1,1), 1, 4Hp)   biases for layers 1..L-1
#   h0/c0   : (L, Bp, Hp)
# Outputs: y (T, Bp, Hp) final-layer hidden states, hf/cf (L, Bp, Hp).
# ----------------------------------------------------------------------------
def _fused_lstm_kernel(gx0_ref, wih_ref, whh_ref, b_ref, h0_ref, c0_ref,
                       y_ref, hf_ref, cf_ref, gbuf, h_sc, c_sc):
    T, Bp, G = gx0_ref.shape
    L = whh_ref.shape[0]
    Hp = G // 4

    for layer in range(L):
        if layer == 0:
            g_src = gx0_ref                      # hoisted outside the kernel
        else:
            # Hoisted input projection for this layer: one batched MXU GEMM
            # over all T timesteps of the previous layer's outputs (in y_ref),
            # with the bias folded in once (loop-invariant).
            y_flat = y_ref[...].reshape(T * Bp, Hp)
            proj = (jnp.dot(y_flat, wih_ref[layer - 1],
                            preferred_element_type=jnp.float32)
                    + b_ref[layer - 1])
            gbuf[...] = proj.reshape(T, Bp, G)
            g_src = gbuf

        w_hh = whh_ref[layer]                    # (Hp, 4Hp), loop-invariant
        h_sc[...] = h0_ref[layer]
        c_sc[...] = c0_ref[layer]

        @pl.loop(0, T, unroll=True)
        def _step(t):
            # Only one MXU dot per step; gate slices are full 128-lane chunks.
            gates = g_src[t] + jnp.dot(h_sc[...], w_hh,
                                       preferred_element_type=jnp.float32)
            i_g = jax.nn.sigmoid(gates[:, 0 * Hp:1 * Hp])
            f_g = jax.nn.sigmoid(gates[:, 1 * Hp:2 * Hp])
            g_g = jnp.tanh(gates[:, 2 * Hp:3 * Hp])
            o_g = jax.nn.sigmoid(gates[:, 3 * Hp:4 * Hp])
            c_new = f_g * c_sc[...] + i_g * g_g
            h_new = o_g * jnp.tanh(c_new)
            c_sc[...] = c_new
            h_sc[...] = h_new
            y_ref[t] = h_new                     # lane-dense (Bp, Hp) store

        hf_ref[layer] = h_sc[...]
        cf_ref[layer] = c_sc[...]


# ----------------------------------------------------------------------------
# Wrapper: padding, hoisted layer-0 projection, single pallas_call.
# ----------------------------------------------------------------------------
@jax.jit
def _vrnn_lstm_apply(x_btd, w_ih0_p, b0_p, wih_rest, whh_all, b_rest, h0, c0):
    """x_btd: (B, T, Din) batch-first; h0/c0: (L, B, H).
    Returns (out (B, T, H), h_T (L, B, H), c_T (L, B, H))."""
    B, T, _ = x_btd.shape
    L, _, H = h0.shape
    Hp = whh_all.shape[1]
    G = 4 * Hp
    Bp = _round_up(B, 8)
    Lr = wih_rest.shape[0]

    # Hoisted layer-0 projection + bias as one big GEMM; output is produced
    # time-major, folding the batch-first -> time-major transpose into the GEMM.
    gx0 = jnp.einsum('btd,dg->tbg', x_btd, w_ih0_p) + b0_p[None, None, :]
    gx0 = _pad_axis(gx0, 1, B, Bp)

    h0p = _pad_axis(_pad_axis(h0, 1, B, Bp), 2, H, Hp)
    c0p = _pad_axis(_pad_axis(c0, 1, B, Bp), 2, H, Hp)

    y, hf, cf = pl.pallas_call(
        _fused_lstm_kernel,
        out_shape=(jax.ShapeDtypeStruct((T, Bp, Hp), jnp.float32),
                   jax.ShapeDtypeStruct((L, Bp, Hp), jnp.float32),
                   jax.ShapeDtypeStruct((L, Bp, Hp), jnp.float32)),
        grid=(1,),
        in_specs=[
            pl.BlockSpec((T, Bp, G), lambda i: (0, 0, 0)),    # gx0
            pl.BlockSpec((Lr, Hp, G), lambda i: (0, 0, 0)),   # W_ih (layers>=1)
            pl.BlockSpec((L, Hp, G), lambda i: (0, 0, 0)),    # W_hh (all layers)
            pl.BlockSpec((Lr, 1, G), lambda i: (0, 0, 0)),    # biases (layers>=1)
            pl.BlockSpec((L, Bp, Hp), lambda i: (0, 0, 0)),   # h0
            pl.BlockSpec((L, Bp, Hp), lambda i: (0, 0, 0)),   # c0
        ],
        out_specs=(
            pl.BlockSpec((T, Bp, Hp), lambda i: (0, 0, 0)),   # y (final layer)
            pl.BlockSpec((L, Bp, Hp), lambda i: (0, 0, 0)),   # h_T
            pl.BlockSpec((L, Bp, Hp), lambda i: (0, 0, 0)),   # c_T
        ),
        scratch_shapes=[
            pltpu.VMEM((T, Bp, G), jnp.float32),   # per-layer gate buffer
            pltpu.VMEM((Bp, Hp), jnp.float32),     # h carry
            pltpu.VMEM((Bp, Hp), jnp.float32),     # c carry
        ],
        compiler_params=pltpu.CompilerParams(
            dimension_semantics=("arbitrary",)),
    )(gx0, wih_rest, whh_all, b_rest, h0p, c0p)

    out = jnp.transpose(y[:, :B, :H], (1, 0, 2))              # (B, T, H)
    return out, hf[:, :B, :H], cf[:, :B, :H]


# ----------------------------------------------------------------------------
# Pure-JAX reference LSTM layer (correctness check only).
# ----------------------------------------------------------------------------
def _lstm_layer_ref(x_tbd, w_ih_t, w_hh_t, b, h0, c0):
    H = h0.shape[-1]

    def step(carry, x_t):
        h, c = carry
        gates = x_t @ w_ih_t + h @ w_hh_t + b
        i = jax.nn.sigmoid(gates[:, 0 * H:1 * H])
        f = jax.nn.sigmoid(gates[:, 1 * H:2 * H])
        g = jnp.tanh(gates[:, 2 * H:3 * H])
        o = jax.nn.sigmoid(gates[:, 3 * H:4 * H])
        c_new = f * c + i * g
        h_new = o * jnp.tanh(c_new)
        return (h_new, c_new), h_new

    (hT, cT), ys = jax.lax.scan(step, (h0, c0), x_tbd)
    return ys, hT, cT


# ----------------------------------------------------------------------------
# VRNNMemory: JAX port of the PyTorch helper (memory buffer + LSTM model).
# ----------------------------------------------------------------------------
class VRNNMemory:
    def __init__(self, h_dim, n_layers, bidirectional, config, input_dim, key):
        assert not bidirectional, "bidirectional not supported in this port"
        self.h_dim = h_dim
        self.n_layers = n_layers
        self.bidirectional = bidirectional
        self.config = config
        self.memory_buffer = []
        self.training = False

        # Deterministic parameter init (stands in for nn.LSTM weights), stored
        # pre-transposed: W_ih^T (Din, 4H), W_hh^T (H, 4H), bias = b_ih + b_hh.
        self.params = []
        for layer in range(n_layers):
            d_in = input_dim if layer == 0 else h_dim
            key, k1, k2, k3 = jax.random.split(key, 4)
            w_ih_t = 0.1 * jax.random.normal(k1, (d_in, 4 * h_dim), jnp.float32)
            w_hh_t = 0.1 * jax.random.normal(k2, (h_dim, 4 * h_dim), jnp.float32)
            bias = 0.1 * jax.random.normal(k3, (4 * h_dim,), jnp.float32)
            self.params.append((w_ih_t, w_hh_t, bias))
        self._build_padded_params()

    def _build_padded_params(self):
        """Pad hidden/gate dims to lane width (128) and stack per-layer weights
        so the whole recurrence runs in one fused Pallas kernel."""
        H = self.h_dim
        Hp = _round_up(H, 128)
        L = self.n_layers
        self.h_pad = Hp

        w_ih0, _, b0 = self.params[0]
        self.w_ih0_p = _pad_gate_cols(w_ih0, H, Hp)             # (Din, 4Hp)
        self.b0_p = _pad_gate_cols(b0, H, Hp)                   # (4Hp,)

        whh, wih_rest, b_rest = [], [], []
        for layer in range(L):
            w_ih, w_hh, b = self.params[layer]
            whh.append(_pad_axis(_pad_gate_cols(w_hh, H, Hp), 0, H, Hp))
            if layer >= 1:
                wih_rest.append(_pad_axis(_pad_gate_cols(w_ih, H, Hp), 0, H, Hp))
                b_rest.append(_pad_gate_cols(b, H, Hp).reshape(1, 4 * Hp))
        self.whh_all = jnp.stack(whh, 0)                        # (L, Hp, 4Hp)
        if L > 1:
            self.wih_rest = jnp.stack(wih_rest, 0)              # (L-1, Hp, 4Hp)
            self.b_rest = jnp.stack(b_rest, 0)                  # (L-1, 1, 4Hp)
        else:
            self.wih_rest = jnp.zeros((1, Hp, 4 * Hp), jnp.float32)
            self.b_rest = jnp.zeros((1, 1, 4 * Hp), jnp.float32)

    # --- memory helpers (mirror the PyTorch module) --------------------------
    @staticmethod
    def _state_from_tuple(tpl):
        _, state = tpl
        return state

    @staticmethod
    def _output_from_tuple(tpl):
        output, _ = tpl
        return output

    def _append_to_buffer(self, tpl):
        output_t, state_t = tpl
        self.memory_buffer.append([output_t, (state_t[0], state_t[1])])

    def clear(self):
        self.memory_buffer.clear()

    def init_state(self, batch_size, override_noisy_state=False):
        num_directions = 2 if self.bidirectional else 1
        shape = (num_directions * self.n_layers, batch_size, self.h_dim)
        if override_noisy_state or (self.training and
                                    self.config.get('use_noisy_rnn_state', False)):
            k = jax.random.PRNGKey(self.config.get('noisy_state_seed', 1))
            self.state = (0.01 * jax.random.normal(k, shape, jnp.float32),
                          0.01 * jax.random.normal(jax.random.fold_in(k, 1),
                                                   shape, jnp.float32))
        else:
            self.state = (jnp.zeros(shape, jnp.float32),
                          jnp.zeros(shape, jnp.float32))

    def update(self, tpl):
        self._append_to_buffer(tpl)
        self.outputs, self.state = tpl

    # --- forward --------------------------------------------------------------
    def forward(self, input_t, reset_state=False):
        """input_t: (B, T, D_in) batch-first (nn.LSTM(batch_first=True) layout)."""
        batch_size = input_t.shape[0]
        if reset_state or not hasattr(self, 'state'):
            self.init_state(batch_size)
        h_prev, c_prev = self.state
        outputs, h_t, c_t = _vrnn_lstm_apply(
            input_t, self.w_ih0_p, self.b0_p, self.wih_rest, self.whh_all,
            self.b_rest, h_prev, c_prev)
        self.update((outputs, (h_t, c_t)))
        return self.get_output()

    def get_state(self):
        assert hasattr(self, 'state'), 'do a forward pass first'
        return self.state

    def get_repackaged_state(self, h=None):
        if h is None:
            return self.get_repackaged_state(self.state)
        if isinstance(h, jnp.ndarray):
            return jax.lax.stop_gradient(h)
        return tuple(self.get_repackaged_state(v) for v in h)

    def get_output(self):
        assert hasattr(self, 'outputs'), 'do a forward pass first'
        return self.outputs

    def get_merged_memory(self):
        assert len(self.memory_buffer) > 0, 'do a forward pass first'
        mem_concat = jnp.concatenate(
            [self._state_from_tuple(mem)[0] for mem in self.memory_buffer], axis=0)
        return jnp.mean(mem_concat, axis=0)          # (B, H)

    def get_final_memory(self):
        assert len(self.memory_buffer) > 0, 'do a forward pass first'
        return self._state_from_tuple(self.memory_buffer[-1])[0]   # (L, B, H)


# ----------------------------------------------------------------------------
# Main
# ----------------------------------------------------------------------------
if __name__ == "__main__":
    B, T, D_IN, H_DIM, N_LAYERS = 2, 8, 16, 32, 2

    key = jax.random.PRNGKey(0)
    key, k_x, k_p = jax.random.split(key, 3)
    x = jax.random.normal(k_x, (B, T, D_IN), jnp.float32)

    config = {'use_noisy_rnn_state': False, 'half': False}
    mem = VRNNMemory(h_dim=H_DIM, n_layers=N_LAYERS, bidirectional=False,
                     config=config, input_dim=D_IN, key=k_p)

    # Two "time-chunk" forward passes (state carried across calls, as in VRNN).
    out1 = mem.forward(x, reset_state=True)
    out2 = mem.forward(x)
    h_state, c_state = mem.get_state()
    merged = mem.get_merged_memory()
    final = mem.get_final_memory()

    jax.block_until_ready((out1, out2, h_state, c_state, merged, final))

    # Correctness check vs. pure-JAX reference LSTM over the concatenated
    # sequence (equivalent to two chunks with carried state).
    h0 = jnp.zeros((N_LAYERS, B, H_DIM), jnp.float32)
    c0 = jnp.zeros((N_LAYERS, B, H_DIM), jnp.float32)
    x_ref = jnp.transpose(jnp.concatenate([x, x], axis=1), (1, 0, 2))  # (2T,B,Din)
    layer_in = x_ref
    h_refs, c_refs = [], []
    for layer in range(N_LAYERS):
        w_ih_t, w_hh_t, bias = mem.params[layer]
        ys, hT, cT = _lstm_layer_ref(layer_in, w_ih_t, w_hh_t, bias,
                                     h0[layer], c0[layer])
        layer_in = ys
        h_refs.append(hT)
        c_refs.append(cT)
    out_ref = jnp.transpose(layer_in, (1, 0, 2))[:, T:, :]   # second chunk outputs

    np.testing.assert_allclose(np.asarray(out2), np.asarray(out_ref),
                               rtol=1e-5, atol=1e-5)
    np.testing.assert_allclose(np.asarray(h_state), np.asarray(jnp.stack(h_refs)),
                               rtol=1e-5, atol=1e-5)
    np.testing.assert_allclose(np.asarray(c_state), np.asarray(jnp.stack(c_refs)),
                               rtol=1e-5, atol=1e-5)

    # Shape semantics match the PyTorch module:
    #   merged memory = mean over concatenated h states -> (B, H)
    #   final memory  = h state of the last buffer entry -> (n_layers, B, H)
    assert out1.shape == (B, T, H_DIM) and out2.shape == (B, T, H_DIM)
    assert merged.shape == (B, H_DIM)
    assert final.shape == (N_LAYERS, B, H_DIM)

    print("KERNEL_OK")
</pallas_src>

<mosaic_0001>
module attributes {stable_mosaic.version = 11 : i64} {
  func.func @_fused_lstm_kernel(%arg0: i32, %arg1: memref<8x8x512xf32, #tpu.memory_space<vmem>>, %arg2: memref<1x128x512xf32, #tpu.memory_space<vmem>>, %arg3: memref<2x128x512xf32, #tpu.memory_space<vmem>>, %arg4: memref<1x1x512xf32, #tpu.memory_space<vmem>>, %arg5: memref<2x8x128xf32, #tpu.memory_space<vmem>>, %arg6: memref<2x8x128xf32, #tpu.memory_space<vmem>>, %arg7: memref<8x8x128xf32, #tpu.memory_space<vmem>>, %arg8: memref<2x8x128xf32, #tpu.memory_space<vmem>>, %arg9: memref<2x8x128xf32, #tpu.memory_space<vmem>>, %arg10: memref<8x8x512xf32, #tpu.memory_space<vmem>>, %arg11: memref<8x128xf32, #tpu.memory_space<vmem>>, %arg12: memref<8x128xf32, #tpu.memory_space<vmem>>) attributes {dimension_semantics = [#tpu.dimension_semantics<arbitrary>], iteration_bounds = array<i64: 1>, scalar_prefetch = 0 : i64, scratch_operands = 3 : i64, tpu.core_type = #tpu.core_type<tc>, window_params = [{pipeline_mode = #tpu.pipeline_mode<synchronous>, transform_indices = @transform_0, window_bounds = array<i64: 8, 8, 512>}, {pipeline_mode = #tpu.pipeline_mode<synchronous>, transform_indices = @transform_1, window_bounds = array<i64: 1, 128, 512>}, {pipeline_mode = #tpu.pipeline_mode<synchronous>, transform_indices = @transform_2, window_bounds = array<i64: 2, 128, 512>}, {pipeline_mode = #tpu.pipeline_mode<synchronous>, transform_indices = @transform_3, window_bounds = array<i64: 1, 1, 512>}, {pipeline_mode = #tpu.pipeline_mode<synchronous>, transform_indices = @transform_4, window_bounds = array<i64: 2, 8, 128>}, {pipeline_mode = #tpu.pipeline_mode<synchronous>, transform_indices = @transform_5, window_bounds = array<i64: 2, 8, 128>}, {pipeline_mode = #tpu.pipeline_mode<synchronous>, transform_indices = @transform_6, window_bounds = array<i64: 8, 8, 128>}, {pipeline_mode = #tpu.pipeline_mode<synchronous>, transform_indices = @transform_7, window_bounds = array<i64: 2, 8, 128>}, {pipeline_mode = #tpu.pipeline_mode<synchronous>, transform_indices = @transform_8, window_bounds = array<i64: 2, 8, 128>}]} {
    %c0 = arith.constant 0 : index
    %c0_0 = arith.constant 0 : index
    %c0_1 = arith.constant 0 : index
    %0 = vector.load %arg3[%c0, %c0_0, %c0_1] : memref<2x128x512xf32, #tpu.memory_space<vmem>>, vector<1x128x512xf32>
    %1 = vector.shape_cast %0 : vector<1x128x512xf32> to vector<128x512xf32>
    %c0_2 = arith.constant 0 : index
    %c0_3 = arith.constant 0 : index
    %c0_4 = arith.constant 0 : index
    %2 = vector.load %arg5[%c0_2, %c0_3, %c0_4] : memref<2x8x128xf32, #tpu.memory_space<vmem>>, vector<1x8x128xf32>
    %3 = vector.shape_cast %2 : vector<1x8x128xf32> to vector<8x128xf32>
    %c0_5 = arith.constant 0 : index
    %c0_6 = arith.constant 0 : index
    %4 = vector.load %arg11[%c0_5, %c0_6] : memref<8x128xf32, #tpu.memory_space<vmem>>, vector<8x128xf32>
    tpu.vector_store %arg11[%c0_5, %c0_6], %3 {strides = array<i32>} : memref<8x128xf32, #tpu.memory_space<vmem>>, vector<8x128xf32>,
    %c0_7 = arith.constant 0 : index
    %c0_8 = arith.constant 0 : index
    %c0_9 = arith.constant 0 : index
    %5 = vector.load %arg6[%c0_7, %c0_8, %c0_9] : memref<2x8x128xf32, #tpu.memory_space<vmem>>, vector<1x8x128xf32>
    %6 = vector.shape_cast %5 : vector<1x8x128xf32> to vector<8x128xf32>
    %c0_10 = arith.constant 0 : index
    %c0_11 = arith.constant 0 : index
    %7 = vector.load %arg12[%c0_10, %c0_11] : memref<8x128xf32, #tpu.memory_space<vmem>>, vector<8x128xf32>
    tpu.vector_store %arg12[%c0_10, %c0_11], %6 {strides = array<i32>} : memref<8x128xf32, #tpu.memory_space<vmem>>, vector<8x128xf32>,
    %c0_i32 = arith.constant 0 : i32
    %c1_i32 = arith.constant 1 : i32
    %8 = arith.muli %c0_i32, %c1_i32 : i32
    %c0_i32_12 = arith.constant 0 : i32
    %9 = arith.addi %c0_i32_12, %8 : i32
    %10 = arith.index_cast %9 : i32 to index
    %c0_13 = arith.constant 0 : index
    %c0_14 = arith.constant 0 : index
    %11 = vector.load %arg1[%10, %c0_13, %c0_14] : memref<8x8x512xf32, #tpu.memory_space<vmem>>, vector<1x8x512xf32>
    %12 = vector.shape_cast %11 : vector<1x8x512xf32> to vector<8x512xf32>
    %c0_15 = arith.constant 0 : index
    %c0_16 = arith.constant 0 : index
    %13 = vector.load %arg11[%c0_15, %c0_16] : memref<8x128xf32, #tpu.memory_space<vmem>>, vector<8x128xf32>
    %cst = arith.constant dense<0.000000e+00> : vector<8x512xf32>
    %14 = tpu.matmul %13, %1, %cst {dimension_numbers = #tpu.dot_dimension_numbers<[1], [0], [0], [1], [0, 0, 1, 1], [], []>} : vector<8x128xf32>, vector<128x512xf32>, vector<8x512xf32> -> vector<8x512xf32>
    %15 = arith.addf %12, %14 : vector<8x512xf32>
    %16 = vector.extract_strided_slice %15 {offsets = [0, 0], sizes = [8, 128], strides = [1, 1]} : vector<8x512xf32> to vector<8x128xf32>
    %17 = arith.negf %16 : vector<8x128xf32>
    %18 = math.exp %17 : vector<8x128xf32>
    %cst_17 = arith.constant 1.000000e+00 : f32
    %19 = vector.broadcast %cst_17 : f32 to vector<8x128xf32>
    %20 = arith.addf %19, %18 : vector<8x128xf32>
    %21 = arith.divf %19, %20 : vector<8x128xf32>
    %22 = vector.extract_strided_slice %15 {offsets = [0, 128], sizes = [8, 128], strides = [1, 1]} : vector<8x512xf32> to vector<8x128xf32>
    %23 = arith.negf %22 : vector<8x128xf32>
    %24 = math.exp %23 : vector<8x128xf32>
    %cst_18 = arith.constant 1.000000e+00 : f32
    %25 = vector.broadcast %cst_18 : f32 to vector<8x128xf32>
    %26 = arith.addf %25, %24 : vector<8x128xf32>
    %27 = arith.divf %25, %26 : vector<8x128xf32>
    %28 = vector.extract_strided_slice %15 {offsets = [0, 256], sizes = [8, 128], strides = [1, 1]} : vector<8x512xf32> to vector<8x128xf32>
    %29 = math.tanh %28 : vector<8x128xf32>
    %30 = vector.extract_strided_slice %15 {offsets = [0, 384], sizes = [8, 128], strides = [1, 1]} : vector<8x512xf32> to vector<8x128xf32>
    %31 = arith.negf %30 : vector<8x128xf32>
    %32 = math.exp %31 : vector<8x128xf32>
    %cst_19 = arith.constant 1.000000e+00 : f32
    %33 = vector.broadcast %cst_19 : f32 to vector<8x128xf32>
    %34 = arith.addf %33, %32 : vector<8x128xf32>
    %35 = arith.divf %33, %34 : vector<8x128xf32>
    %c0_20 = arith.constant 0 : index
    %c0_21 = arith.constant 0 : index
    %36 = vector.load %arg12[%c0_20, %c0_21] : memref<8x128xf32, #tpu.memory_space<vmem>>, vector<8x128xf32>
    %37 = arith.mulf %27, %36 : vector<8x128xf32>
    %38 = arith.mulf %21, %29 : vector<8x128xf32>
    %39 = arith.addf %37, %38 : vector<8x128xf32>
    %40 = math.tanh %39 : vector<8x128xf32>
    %41 = arith.mulf %35, %40 : vector<8x128xf32>
    %c0_22 = arith.constant 0 : index
    %c0_23 = arith.constant 0 : index
    %42 = vector.load %arg12[%c0_22, %c0_23] : memref<8x128xf32, #tpu.memory_space<vmem>>, vector<8x128xf32>
    tpu.vector_store %arg12[%c0_22, %c0_23], %39 {strides = array<i32>} : memref<8x128xf32, #tpu.memory_space<vmem>>, vector<8x128xf32>,
    %c0_24 = arith.constant 0 : index
    %c0_25 = arith.constant 0 : index
    %43 = vector.load %arg11[%c0_24, %c0_25] : memref<8x128xf32, #tpu.memory_space<vmem>>, vector<8x128xf32>
    tpu.vector_store %arg11[%c0_24, %c0_25], %41 {strides = array<i32>} : memref<8x128xf32, #tpu.memory_space<vmem>>, vector<8x128xf32>,
    %44 = arith.index_cast %9 : i32 to index
    %c0_26 = arith.constant 0 : index
    %c0_27 = arith.constant 0 : index
    %45 = vector.load %arg7[%44, %c0_26, %c0_27] : memref<8x8x128xf32, #tpu.memory_space<vmem>>, vector<1x8x128xf32>
    %46 = vector.shape_cast %45 : vector<1x8x128xf32> to vector<8x128xf32>
    %47 = vector.shape_cast %41 : vector<8x128xf32> to vector<1x8x128xf32>
    tpu.vector_store %arg7[%44, %c0_26, %c0_27], %47 {strides = array<i32>} : memref<8x8x128xf32, #tpu.memory_space<vmem>>, vector<1x8x128xf32>,
    %c1_i32_28 = arith.constant 1 : i32
    %c1_i32_29 = arith.constant 1 : i32
    %48 = arith.muli %c1_i32_28, %c1_i32_29 : i32
    %c0_i32_30 = arith.constant 0 : i32
    %49 = arith.addi %c0_i32_30, %48 : i32
    %50 = arith.index_cast %49 : i32 to index
    %c0_31 = arith.constant 0 : index
    %c0_32 = arith.constant 0 : index
    %51 = vector.load %arg1[%50, %c0_31, %c0_32] : memref<8x8x512xf32, #tpu.memory_space<vmem>>, vector<1x8x512xf32>
    %52 = vector.shape_cast %51 : vector<1x8x512xf32> to vector<8x512xf32>
    %c0_33 = arith.constant 0 : index
    %c0_34 = arith.constant 0 : index
    %53 = vector.load %arg11[%c0_33, %c0_34] : memref<8x128xf32, #tpu.memory_space<vmem>>, vector<8x128xf32>
    %cst_35 = arith.constant dense<0.000000e+00> : vector<8x512xf32>
    %54 = tpu.matmul %53, %1, %cst_35 {dimension_numbers = #tpu.dot_dimension_numbers<[1], [0], [0], [1], [0, 0, 1, 1], [], []>} : vector<8x128xf32>, vector<128x512xf32>, vector<8x512xf32> -> vector<8x512xf32>
    %55 = arith.addf %52, %54 : vector<8x512xf32>
    %56 = vector.extract_strided_slice %55 {offsets = [0, 0], sizes = [8, 128], strides = [1, 1]} : vector<8x512xf32> to vector<8x128xf32>
    %57 = arith.negf %56 : vector<8x128xf32>
    %58 = math.exp %57 : vector<8x128xf32>
    %cst_36 = arith.constant 1.000000e+00 : f32
    %59 = vector.broadcast %cst_36 : f32 to vector<8x128xf32>
    %60 = arith.addf %59, %58 : vector<8x128xf32>
    %61 = arith.divf %59, %60 : vector<8x128xf32>
    %62 = vector.extract_strided_slice %55 {offsets = [0, 128], sizes = [8, 128], strides = [1, 1]} : vector<8x512xf32> to vector<8x128xf32>
    %63 = arith.negf %62 : vector<8x128xf32>
    %64 = math.exp %63 : vector<8x128xf32>
    %cst_37 = arith.constant 1.000000e+00 : f32
    %65 = vector.broadcast %cst_37 : f32 to vector<8x128xf32>
    %66 = arith.addf %65, %64 : vector<8x128xf32>
    %67 = arith.divf %65, %66 : vector<8x128xf32>
    %68 = vector.extract_strided_slice %55 {offsets = [0, 256], sizes = [8, 128], strides = [1, 1]} : vector<8x512xf32> to vector<8x128xf32>
    %69 = math.tanh %68 : vector<8x128xf32>
    %70 = vector.extract_strided_slice %55 {offsets = [0, 384], sizes = [8, 128], strides = [1, 1]} : vector<8x512xf32> to vector<8x128xf32>
    %71 = arith.negf %70 : vector<8x128xf32>
    %72 = math.exp %71 : vector<8x128xf32>
    %cst_38 = arith.constant 1.000000e+00 : f32
    %73 = vector.broadcast %cst_38 : f32 to vector<8x128xf32>
    %74 = arith.addf %73, %72 : vector<8x128xf32>
    %75 = arith.divf %73, %74 : vector<8x128xf32>
    %c0_39 = arith.constant 0 : index
    %c0_40 = arith.constant 0 : index
    %76 = vector.load %arg12[%c0_39, %c0_40] : memref<8x128xf32, #tpu.memory_space<vmem>>, vector<8x128xf32>
    %77 = arith.mulf %67, %76 : vector<8x128xf32>
    %78 = arith.mulf %61, %69 : vector<8x128xf32>
    %79 = arith.addf %77, %78 : vector<8x128xf32>
    %80 = math.tanh %79 : vector<8x128xf32>
    %81 = arith.mulf %75, %80 : vector<8x128xf32>
    %c0_41 = arith.constant 0 : index
    %c0_42 = arith.constant 0 : index
    %82 = vector.load %arg12[%c0_41, %c0_42] : memref<8x128xf32, #tpu.memory_space<vmem>>, vector<8x128xf32>
    tpu.vector_store %arg12[%c0_41, %c0_42], %79 {strides = array<i32>} : memref<8x128xf32, #tpu.memory_space<vmem>>, vector<8x128xf32>,
    %c0_43 = arith.constant 0 : index
    %c0_44 = arith.constant 0 : index
    %83 = vector.load %arg11[%c0_43, %c0_44] : memref<8x128xf32, #tpu.memory_space<vmem>>, vector<8x128xf32>
    tpu.vector_store %arg11[%c0_43, %c0_44], %81 {strides = array<i32>} : memref<8x128xf32, #tpu.memory_space<vmem>>, vector<8x128xf32>,
    %84 = arith.index_cast %49 : i32 to index
    %c0_45 = arith.constant 0 : index
    %c0_46 = arith.constant 0 : index
    %85 = vector.load %arg7[%84, %c0_45, %c0_46] : memref<8x8x128xf32, #tpu.memory_space<vmem>>, vector<1x8x128xf32>
    %86 = vector.shape_cast %85 : vector<1x8x128xf32> to vector<8x128xf32>
    %87 = vector.shape_cast %81 : vector<8x128xf32> to vector<1x8x128xf32>
    tpu.vector_store %arg7[%84, %c0_45, %c0_46], %87 {strides = array<i32>} : memref<8x8x128xf32, #tpu.memory_space<vmem>>, vector<1x8x128xf32>,
    %c2_i32 = arith.constant 2 : i32
    %c1_i32_47 = arith.constant 1 : i32
    %88 = arith.muli %c2_i32, %c1_i32_47 : i32
    %c0_i32_48 = arith.constant 0 : i32
    %89 = arith.addi %c0_i32_48, %88 : i32
    %90 = arith.index_cast %89 : i32 to index
    %c0_49 = arith.constant 0 : index
    %c0_50 = arith.constant 0 : index
    %91 = vector.load %arg1[%90, %c0_49, %c0_50] : memref<8x8x512xf32, #tpu.memory_space<vmem>>, vector<1x8x512xf32>
    %92 = vector.shape_cast %91 : vector<1x8x512xf32> to vector<8x512xf32>
    %c0_51 = arith.constant 0 : index
    %c0_52 = arith.constant 0 : index
    %93 = vector.load %arg11[%c0_51, %c0_52] : memref<8x128xf32, #tpu.memory_space<vmem>>, vector<8x128xf32>
    %cst_53 = arith.constant dense<0.000000e+00> : vector<8x512xf32>
    %94 = tpu.matmul %93, %1, %cst_53 {dimension_numbers = #tpu.dot_dimension_numbers<[1], [0], [0], [1], [0, 0, 1, 1], [], []>} : vector<8x128xf32>, vector<128x512xf32>, vector<8x512xf32> -> vector<8x512xf32>
    %95 = arith.addf %92, %94 : vector<8x512xf32>
    %96 = vector.extract_strided_slice %95 {offsets = [0, 0], sizes = [8, 128], strides = [1, 1]} : vector<8x512xf32> to vector<8x128xf32>
    %97 = arith.negf %96 : vector<8x128xf32>
    %98 = math.exp %97 : vector<8x128xf32>
    %cst_54 = arith.constant 1.000000e+00 : f32
    %99 = vector.broadcast %cst_54 : f32 to vector<8x128xf32>
    %100 = arith.addf %99, %98 : vector<8x128xf32>
    %101 = arith.divf %99, %100 : vector<8x128xf32>
    %102 = vector.extract_strided_slice %95 {offsets = [0, 128], sizes = [8, 128], strides = [1, 1]} : vector<8x512xf32> to vector<8x128xf32>
    %103 = arith.negf %102 : vector<8x128xf32>
    %104 = math.exp %103 : vector<8x128xf32>
    %cst_55 = arith.constant 1.000000e+00 : f32
    %105 = vector.broadcast %cst_55 : f32 to vector<8x128xf32>
    %106 = arith.addf %105, %104 : vector<8x128xf32>
    %107 = arith.divf %105, %106 : vector<8x128xf32>
    %108 = vector.extract_strided_slice %95 {offsets = [0, 256], sizes = [8, 128], strides = [1, 1]} : vector<8x512xf32> to vector<8x128xf32>
    %109 = math.tanh %108 : vector<8x128xf32>
    %110 = vector.extract_strided_slice %95 {offsets = [0, 384], sizes = [8, 128], strides = [1, 1]} : vector<8x512xf32> to vector<8x128xf32>
    %111 = arith.negf %110 : vector<8x128xf32>
    %112 = math.exp %111 : vector<8x128xf32>
    %cst_56 = arith.constant 1.000000e+00 : f32
    %113 = vector.broadcast %cst_56 : f32 to vector<8x128xf32>
    %114 = arith.addf %113, %112 : vector<8x128xf32>
    %115 = arith.divf %113, %114 : vector<8x128xf32>
    %c0_57 = arith.constant 0 : index
    %c0_58 = arith.constant 0 : index
    %116 = vector.load %arg12[%c0_57, %c0_58] : memref<8x128xf32, #tpu.memory_space<vmem>>, vector<8x128xf32>
    %117 = arith.mulf %107, %116 : vector<8x128xf32>
    %118 = arith.mulf %101, %109 : vector<8x128xf32>
    %119 = arith.addf %117, %118 : vector<8x128xf32>
    %120 = math.tanh %119 : vector<8x128xf32>
    %121 = arith.mulf %115, %120 : vector<8x128xf32>
    %c0_59 = arith.constant 0 : index
    %c0_60 = arith.constant 0 : index
    %122 = vector.load %arg12[%c0_59, %c0_60] : memref<8x128xf32, #tpu.memory_space<vmem>>, vector<8x128xf32>
    tpu.vector_store %arg12[%c0_59, %c0_60], %119 {strides = array<i32>} : memref<8x128xf32, #tpu.memory_space<vmem>>, vector<8x128xf32>,
    %c0_61 = arith.constant 0 : index
    %c0_62 = arith.constant 0 : index
    %123 = vector.load %arg11[%c0_61, %c0_62] : memref<8x128xf32, #tpu.memory_space<vmem>>, vector<8x128xf32>
    tpu.vector_store %arg11[%c0_61, %c0_62], %121 {strides = array<i32>} : memref<8x128xf32, #tpu.memory_space<vmem>>, vector<8x128xf32>,
    %124 = arith.index_cast %89 : i32 to index
    %c0_63 = arith.constant 0 : index
    %c0_64 = arith.constant 0 : index
    %125 = vector.load %arg7[%124, %c0_63, %c0_64] : memref<8x8x128xf32, #tpu.memory_space<vmem>>, vector<1x8x128xf32>
    %126 = vector.shape_cast %125 : vector<1x8x128xf32> to vector<8x128xf32>
    %127 = vector.shape_cast %121 : vector<8x128xf32> to vector<1x8x128xf32>
    tpu.vector_store %arg7[%124, %c0_63, %c0_64], %127 {strides = array<i32>} : memref<8x8x128xf32, #tpu.memory_space<vmem>>, vector<1x8x128xf32>,
    %c3_i32 = arith.constant 3 : i32
    %c1_i32_65 = arith.constant 1 : i32
    %128 = arith.muli %c3_i32, %c1_i32_65 : i32
    %c0_i32_66 = arith.constant 0 : i32
    %129 = arith.addi %c0_i32_66, %128 : i32
    %130 = arith.index_cast %129 : i32 to index
    %c0_67 = arith.constant 0 : index
    %c0_68 = arith.constant 0 : index
    %131 = vector.load %arg1[%130, %c0_67, %c0_68] : memref<8x8x512xf32, #tpu.memory_space<vmem>>, vector<1x8x512xf32>
    %132 = vector.shape_cast %131 : vector<1x8x512xf32> to vector<8x512xf32>
    %c0_69 = arith.constant 0 : index
    %c0_70 = arith.constant 0 : index
    %133 = vector.load %arg11[%c0_69, %c0_70] : memref<8x128xf32, #tpu.memory_space<vmem>>, vector<8x128xf32>
    %cst_71 = arith.constant dense<0.000000e+00> : vector<8x512xf32>
    %134 = tpu.matmul %133, %1, %cst_71 {dimension_numbers = #tpu.dot_dimension_numbers<[1], [0], [0], [1], [0, 0, 1, 1], [], []>} : vector<8x128xf32>, vector<128x512xf32>, vector<8x512xf32> -> vector<8x512xf32>
    %135 = arith.addf %132, %134 : vector<8x512xf32>
    %136 = vector.extract_strided_slice %135 {offsets = [0, 0], sizes = [8, 128], strides = [1, 1]} : vector<8x512xf32> to vector<8x128xf32>
    %137 = arith.negf %136 : vector<8x128xf32>
    %138 = math.exp %137 : vector<8x128xf32>
    %cst_72 = arith.constant 1.000000e+00 : f32
    %139 = vector.broadcast %cst_72 : f32 to vector<8x128xf32>
    %140 = arith.addf %139, %138 : vector<8x128xf32>
    %141 = arith.divf %139, %140 : vector<8x128xf32>
    %142 = vector.extract_strided_slice %135 {offsets = [0, 128], sizes = [8, 128], strides = [1, 1]} : vector<8x512xf32> to vector<8x128xf32>
    %143 = arith.negf %142 : vector<8x128xf32>
    %144 = math.exp %143 : vector<8x128xf32>
    %cst_73 = arith.constant 1.000000e+00 : f32
    %145 = vector.broadcast %cst_73 : f32 to vector<8x128xf32>
    %146 = arith.addf %145, %144 : vector<8x128xf32>
    %147 = arith.divf %145, %146 : vector<8x128xf32>
    %148 = vector.extract_strided_slice %135 {offsets = [0, 256], sizes = [8, 128], strides = [1, 1]} : vector<8x512xf32> to vector<8x128xf32>
    %149 = math.tanh %148 : vector<8x128xf32>
    %150 = vector.extract_strided_slice %135 {offsets = [0, 384], sizes = [8, 128], strides = [1, 1]} : vector<8x512xf32> to vector<8x128xf32>
    %151 = arith.negf %150 : vector<8x128xf32>
    %152 = math.exp %151 : vector<8x128xf32>
    %cst_74 = arith.constant 1.000000e+00 : f32
    %153 = vector.broadcast %cst_74 : f32 to vector<8x128xf32>
    %154 = arith.addf %153, %152 : vector<8x128xf32>
    %155 = arith.divf %153, %154 : vector<8x128xf32>
    %c0_75 = arith.constant 0 : index
    %c0_76 = arith.constant 0 : index
    %156 = vector.load %arg12[%c0_75, %c0_76] : memref<8x128xf32, #tpu.memory_space<vmem>>, vector<8x128xf32>
    %157 = arith.mulf %147, %156 : vector<8x128xf32>
    %158 = arith.mulf %141, %149 : vector<8x128xf32>
    %159 = arith.addf %157, %158 : vector<8x128xf32>
    %160 = math.tanh %159 : vector<8x128xf32>
    %161 = arith.mulf %155, %160 : vector<8x128xf32>
    %c0_77 = arith.constant 0 : index
    %c0_78 = arith.constant 0 : index
    %162 = vector.load %arg12[%c0_77, %c0_78] : memref<8x128xf32, #tpu.memory_space<vmem>>, vector<8x128xf32>
    tpu.vector_store %arg12[%c0_77, %c0_78], %159 {strides = array<i32>} : memref<8x128xf32, #tpu.memory_space<vmem>>, vector<8x128xf32>,
    %c0_79 = arith.constant 0 : index
    %c0_80 = arith.constant 0 : index
    %163 = vector.load %arg11[%c0_79, %c0_80] : memref<8x128xf32, #tpu.memory_space<vmem>>, vector<8x128xf32>
    tpu.vector_store %arg11[%c0_79, %c0_80], %161 {strides = array<i32>} : memref<8x128xf32, #tpu.memory_space<vmem>>, vector<8x128xf32>,
    %164 = arith.index_cast %129 : i32 to index
    %c0_81 = arith.constant 0 : index
    %c0_82 = arith.constant 0 : index
    %165 = vector.load %arg7[%164, %c0_81, %c0_82] : memref<8x8x128xf32, #tpu.memory_space<vmem>>, vector<1x8x128xf32>
    %166 = vector.shape_cast %165 : vector<1x8x128xf32> to vector<8x128xf32>
    %167 = vector.shape_cast %161 : vector<8x128xf32> to vector<1x8x128xf32>
    tpu.vector_store %arg7[%164, %c0_81, %c0_82], %167 {strides = array<i32>} : memref<8x8x128xf32, #tpu.memory_space<vmem>>, vector<1x8x128xf32>,
    %c4_i32 = arith.constant 4 : i32
    %c1_i32_83 = arith.constant 1 : i32
    %168 = arith.muli %c4_i32, %c1_i32_83 : i32
    %c0_i32_84 = arith.constant 0 : i32
    %169 = arith.addi %c0_i32_84, %168 : i32
    %170 = arith.index_cast %169 : i32 to index
    %c0_85 = arith.constant 0 : index
    %c0_86 = arith.constant 0 : index
    %171 = vector.load %arg1[%170, %c0_85, %c0_86] : memref<8x8x512xf32, #tpu.memory_space<vmem>>, vector<1x8x512xf32>
    %172 = vector.shape_cast %171 : vector<1x8x512xf32> to vector<8x512xf32>
    %c0_87 = arith.constant 0 : index
    %c0_88 = arith.constant 0 : index
    %173 = vector.load %arg11[%c0_87, %c0_88] : memref<8x128xf32, #tpu.memory_space<vmem>>, vector<8x128xf32>
    %cst_89 = arith.constant dense<0.000000e+00> : vector<8x512xf32>
    %174 = tpu.matmul %173, %1, %cst_89 {dimension_numbers = #tpu.dot_dimension_numbers<[1], [0], [0], [1], [0, 0, 1, 1], [], []>} : vector<8x128xf32>, vector<128x512xf32>, vector<8x512xf32> -> vector<8x512xf32>
    %175 = arith.addf %172, %174 : vector<8x512xf32>
    %176 = vector.extract_strided_slice %175 {offsets = [0, 0], sizes = [8, 128], strides = [1, 1]} : vector<8x512xf32> to vector<8x128xf32>
    %177 = arith.negf %176 : vector<8x128xf32>
    %178 = math.exp %177 : vector<8x128xf32>
    %cst_90 = arith.constant 1.000000e+00 : f32
    %179 = vector.broadcast %cst_90 : f32 to vector<8x128xf32>
    %180 = arith.addf %179, %178 : vector<8x128xf32>
    %181 = arith.divf %179, %180 : vector<8x128xf32>
    %182 = vector.extract_strided_slice %175 {offsets = [0, 128], sizes = [8, 128], strides = [1, 1]} : vector<8x512xf32> to vector<8x128xf32>
    %183 = arith.negf %182 : vector<8x128xf32>
    %184 = math.exp %183 : vector<8x128xf32>
    %cst_91 = arith.constant 1.000000e+00 : f32
    %185 = vector.broadcast %cst_91 : f32 to vector<8x128xf32>
    %186 = arith.addf %185, %184 : vector<8x128xf32>
    %187 = arith.divf %185, %186 : vector<8x128xf32>
    %188 = vector.extract_strided_slice %175 {offsets = [0, 256], sizes = [8, 128], strides = [1, 1]} : vector<8x512xf32> to vector<8x128xf32>
    %189 = math.tanh %188 : vector<8x128xf32>
    %190 = vector.extract_strided_slice %175 {offsets = [0, 384], sizes = [8, 128], strides = [1, 1]} : vector<8x512xf32> to vector<8x128xf32>
    %191 = arith.negf %190 : vector<8x128xf32>
    %192 = math.exp %191 : vector<8x128xf32>
    %cst_92 = arith.constant 1.000000e+00 : f32
    %193 = vector.broadcast %cst_92 : f32 to vector<8x128xf32>
    %194 = arith.addf %193, %192 : vector<8x128xf32>
    %195 = arith.divf %193, %194 : vector<8x128xf32>
    %c0_93 = arith.constant 0 : index
    %c0_94 = arith.constant 0 : index
    %196 = vector.load %arg12[%c0_93, %c0_94] : memref<8x128xf32, #tpu.memory_space<vmem>>, vector<8x128xf32>
    %197 = arith.mulf %187, %196 : vector<8x128xf32>
    %198 = arith.mulf %181, %189 : vector<8x128xf32>
    %199 = arith.addf %197, %198 : vector<8x128xf32>
    %200 = math.tanh %199 : vector<8x128xf32>
    %201 = arith.mulf %195, %200 : vector<8x128xf32>
    %c0_95 = arith.constant 0 : index
    %c0_96 = arith.constant 0 : index
    %202 = vector.load %arg12[%c0_95, %c0_96] : memref<8x128xf32, #tpu.memory_space<vmem>>, vector<8x128xf32>
    tpu.vector_store %arg12[%c0_95, %c0_96], %199 {strides = array<i32>} : memref<8x128xf32, #tpu.memory_space<vmem>>, vector<8x128xf32>,
    %c0_97 = arith.constant 0 : index
    %c0_98 = arith.constant 0 : index
    %203 = vector.load %arg11[%c0_97, %c0_98] : memref<8x128xf32, #tpu.memory_space<vmem>>, vector<8x128xf32>
    tpu.vector_store %arg11[%c0_97, %c0_98], %201 {strides = array<i32>} : memref<8x128xf32, #tpu.memory_space<vmem>>, vector<8x128xf32>,
    %204 = arith.index_cast %169 : i32 to index
    %c0_99 = arith.constant 0 : index
    %c0_100 = arith.constant 0 : index
    %205 = vector.load %arg7[%204, %c0_99, %c0_100] : memref<8x8x128xf32, #tpu.memory_space<vmem>>, vector<1x8x128xf32>
    %206 = vector.shape_cast %205 : vector<1x8x128xf32> to vector<8x128xf32>
    %207 = vector.shape_cast %201 : vector<8x128xf32> to vector<1x8x128xf32>
    tpu.vector_store %arg7[%204, %c0_99, %c0_100], %207 {strides = array<i32>} : memref<8x8x128xf32, #tpu.memory_space<vmem>>, vector<1x8x128xf32>,
    %c5_i32 = arith.constant 5 : i32
    %c1_i32_101 = arith.constant 1 : i32
    %208 = arith.muli %c5_i32, %c1_i32_101 : i32
    %c0_i32_102 = arith.constant 0 : i32
    %209 = arith.addi %c0_i32_102, %208 : i32
    %210 = arith.index_cast %209 : i32 to index
    %c0_103 = arith.constant 0 : index
    %c0_104 = arith.constant 0 : index
    %211 = vector.load %arg1[%210, %c0_103, %c0_104] : memref<8x8x512xf32, #tpu.memory_space<vmem>>, vector<1x8x512xf32>
    %212 = vector.shape_cast %211 : vector<1x8x512xf32> to vector<8x512xf32>
    %c0_105 = arith.constant 0 : index
    %c0_106 = arith.constant 0 : index
    %213 = vector.load %arg11[%c0_105, %c0_106] : memref<8x128xf32, #tpu.memory_space<vmem>>, vector<8x128xf32>
    %cst_107 = arith.constant dense<0.000000e+00> : vector<8x512xf32>
    %214 = tpu.matmul %213, %1, %cst_107 {dimension_numbers = #tpu.dot_dimension_numbers<[1], [0], [0], [1], [0, 0, 1, 1], [], []>} : vector<8x128xf32>, vector<128x512xf32>, vector<8x512xf32> -> vector<8x512xf32>
    %215 = arith.addf %212, %214 : vector<8x512xf32>
    %216 = vector.extract_strided_slice %215 {offsets = [0, 0], sizes = [8, 128], strides = [1, 1]} : vector<8x512xf32> to vector<8x128xf32>
    %217 = arith.negf %216 : vector<8x128xf32>
    %218 = math.exp %217 : vector<8x128xf32>
    %cst_108 = arith.constant 1.000000e+00 : f32
    %219 = vector.broadcast %cst_108 : f32 to vector<8x128xf32>
    %220 = arith.addf %219, %218 : vector<8x128xf32>
    %221 = arith.divf %219, %220 : vector<8x128xf32>
    %222 = vector.extract_strided_slice %215 {offsets = [0, 128], sizes = [8, 128], strides = [1, 1]} : vector<8x512xf32> to vector<8x128xf32>
    %223 = arith.negf %222 : vector<8x128xf32>
    %224 = math.exp %223 : vector<8x128xf32>
    %cst_109 = arith.constant 1.000000e+00 : f32
    %225 = vector.broadcast %cst_109 : f32 to vector<8x128xf32>
    %226 = arith.addf %225, %224 : vector<8x128xf32>
    %227 = arith.divf %225, %226 : vector<8x128xf32>
    %228 = vector.extract_strided_slice %215 {offsets = [0, 256], sizes = [8, 128], strides = [1, 1]} : vector<8x512xf32> to vector<8x128xf32>
    %229 = math.tanh %228 : vector<8x128xf32>
    %230 = vector.extract_strided_slice %215 {offsets = [0, 384], sizes = [8, 128], strides = [1, 1]} : vector<8x512xf32> to vector<8x128xf32>
    %231 = arith.negf %230 : vector<8x128xf32>
    %232 = math.exp %231 : vector<8x128xf32>
    %cst_110 = arith.constant 1.000000e+00 : f32
    %233 = vector.broadcast %cst_110 : f32 to vector<8x128xf32>
    %234 = arith.addf %233, %232 : vector<8x128xf32>
    %235 = arith.divf %233, %234 : vector<8x128xf32>
    %c0_111 = arith.constant 0 : index
    %c0_112 = arith.constant 0 : index
    %236 = vector.load %arg12[%c0_111, %c0_112] : memref<8x128xf32, #tpu.memory_space<vmem>>, vector<8x128xf32>
    %237 = arith.mulf %227, %236 : vector<8x128xf32>
    %238 = arith.mulf %221, %229 : vector<8x128xf32>
    %239 = arith.addf %237, %238 : vector<8x128xf32>
    %240 = math.tanh %239 : vector<8x128xf32>
    %241 = arith.mulf %235, %240 : vector<8x128xf32>
    %c0_113 = arith.constant 0 : index
    %c0_114 = arith.constant 0 : index
    %242 = vector.load %arg12[%c0_113, %c0_114] : memref<8x128xf32, #tpu.memory_space<vmem>>, vector<8x128xf32>
    tpu.vector_store %arg12[%c0_113, %c0_114], %239 {strides = array<i32>} : memref<8x128xf32, #tpu.memory_space<vmem>>, vector<8x128xf32>,
    %c0_115 = arith.constant 0 : index
    %c0_116 = arith.constant 0 : index
    %243 = vector.load %arg11[%c0_115, %c0_116] : memref<8x128xf32, #tpu.memory_space<vmem>>, vector<8x128xf32>
    tpu.vector_store %arg11[%c0_115, %c0_116], %241 {strides = array<i32>} : memref<8x128xf32, #tpu.memory_space<vmem>>, vector<8x128xf32>,
    %244 = arith.index_cast %209 : i32 to index
    %c0_117 = arith.constant 0 : index
    %c0_118 = arith.constant 0 : index
    %245 = vector.load %arg7[%244, %c0_117, %c0_118] : memref<8x8x128xf32, #tpu.memory_space<vmem>>, vector<1x8x128xf32>
    %246 = vector.shape_cast %245 : vector<1x8x128xf32> to vector<8x128xf32>
    %247 = vector.shape_cast %241 : vector<8x128xf32> to vector<1x8x128xf32>
    tpu.vector_store %arg7[%244, %c0_117, %c0_118], %247 {strides = array<i32>} : memref<8x8x128xf32, #tpu.memory_space<vmem>>, vector<1x8x128xf32>,
    %c6_i32 = arith.constant 6 : i32
    %c1_i32_119 = arith.constant 1 : i32
    %248 = arith.muli %c6_i32, %c1_i32_119 : i32
    %c0_i32_120 = arith.constant 0 : i32
    %249 = arith.addi %c0_i32_120, %248 : i32
    %250 = arith.index_cast %249 : i32 to index
    %c0_121 = arith.constant 0 : index
    %c0_122 = arith.constant 0 : index
    %251 = vector.load %arg1[%250, %c0_121, %c0_122] : memref<8x8x512xf32, #tpu.memory_space<vmem>>, vector<1x8x512xf32>
    %252 = vector.shape_cast %251 : vector<1x8x512xf32> to vector<8x512xf32>
    %c0_123 = arith.constant 0 : index
    %c0_124 = arith.constant 0 : index
    %253 = vector.load %arg11[%c0_123, %c0_124] : memref<8x128xf32, #tpu.memory_space<vmem>>, vector<8x128xf32>
    %cst_125 = arith.constant dense<0.000000e+00> : vector<8x512xf32>
    %254 = tpu.matmul %253, %1, %cst_125 {dimension_numbers = #tpu.dot_dimension_numbers<[1], [0], [0], [1], [0, 0, 1, 1], [], []>} : vector<8x128xf32>, vector<128x512xf32>, vector<8x512xf32> -> vector<8x512xf32>
    %255 = arith.addf %252, %254 : vector<8x512xf32>
    %256 = vector.extract_strided_slice %255 {offsets = [0, 0], sizes = [8, 128], strides = [1, 1]} : vector<8x512xf32> to vector<8x128xf32>
    %257 = arith.negf %256 : vector<8x128xf32>
    %258 = math.exp %257 : vector<8x128xf32>
    %cst_126 = arith.constant 1.000000e+00 : f32
    %259 = vector.broadcast %cst_126 : f32 to vector<8x128xf32>
    %260 = arith.addf %259, %258 : vector<8x128xf32>
    %261 = arith.divf %259, %260 : vector<8x128xf32>
    %262 = vector.extract_strided_slice %255 {offsets = [0, 128], sizes = [8, 128], strides = [1, 1]} : vector<8x512xf32> to vector<8x128xf32>
    %263 = arith.negf %262 : vector<8x128xf32>
    %264 = math.exp %263 : vector<8x128xf32>
    %cst_127 = arith.constant 1.000000e+00 : f32
    %265 = vector.broadcast %cst_127 : f32 to vector<8x128xf32>
    %266 = arith.addf %265, %264 : vector<8x128xf32>
    %267 = arith.divf %265, %266 : vector<8x128xf32>
    %268 = vector.extract_strided_slice %255 {offsets = [0, 256], sizes = [8, 128], strides = [1, 1]} : vector<8x512xf32> to vector<8x128xf32>
    %269 = math.tanh %268 : vector<8x128xf32>
    %270 = vector.extract_strided_slice %255 {offsets = [0, 384], sizes = [8, 128], strides = [1, 1]} : vector<8x512xf32> to vector<8x128xf32>
    %271 = arith.negf %270 : vector<8x128xf32>
    %272 = math.exp %271 : vector<8x128xf32>
    %cst_128 = arith.constant 1.000000e+00 : f32
    %273 = vector.broadcast %cst_128 : f32 to vector<8x128xf32>
    %274 = arith.addf %273, %272 : vector<8x128xf32>
    %275 = arith.divf %273, %274 : vector<8x128xf32>
    %c0_129 = arith.constant 0 : index
    %c0_130 = arith.constant 0 : index
    %276 = vector.load %arg12[%c0_129, %c0_130] : memref<8x128xf32, #tpu.memory_space<vmem>>, vector<8x128xf32>
    %277 = arith.mulf %267, %276 : vector<8x128xf32>
    %278 = arith.mulf %261, %269 : vector<8x128xf32>
    %279 = arith.addf %277, %278 : vector<8x128xf32>
    %280 = math.tanh %279 : vector<8x128xf32>
    %281 = arith.mulf %275, %280 : vector<8x128xf32>
    %c0_131 = arith.constant 0 : index
    %c0_132 = arith.constant 0 : index
    %282 = vector.load %arg12[%c0_131, %c0_132] : memref<8x128xf32, #tpu.memory_space<vmem>>, vector<8x128xf32>
    tpu.vector_store %arg12[%c0_131, %c0_132], %279 {strides = array<i32>} : memref<8x128xf32, #tpu.memory_space<vmem>>, vector<8x128xf32>,
    %c0_133 = arith.constant 0 : index
    %c0_134 = arith.constant 0 : index
    %283 = vector.load %arg11[%c0_133, %c0_134] : memref<8x128xf32, #tpu.memory_space<vmem>>, vector<8x128xf32>
    tpu.vector_store %arg11[%c0_133, %c0_134], %281 {strides = array<i32>} : memref<8x128xf32, #tpu.memory_space<vmem>>, vector<8x128xf32>,
    %284 = arith.index_cast %249 : i32 to index
    %c0_135 = arith.constant 0 : index
    %c0_136 = arith.constant 0 : index
    %285 = vector.load %arg7[%284, %c0_135, %c0_136] : memref<8x8x128xf32, #tpu.memory_space<vmem>>, vector<1x8x128xf32>
    %286 = vector.shape_cast %285 : vector<1x8x128xf32> to vector<8x128xf32>
    %287 = vector.shape_cast %281 : vector<8x128xf32> to vector<1x8x128xf32>
    tpu.vector_store %arg7[%284, %c0_135, %c0_136], %287 {strides = array<i32>} : memref<8x8x128xf32, #tpu.memory_space<vmem>>, vector<1x8x128xf32>,
    %c7_i32 = arith.constant 7 : i32
    %c1_i32_137 = arith.constant 1 : i32
    %288 = arith.muli %c7_i32, %c1_i32_137 : i32
    %c0_i32_138 = arith.constant 0 : i32
    %289 = arith.addi %c0_i32_138, %288 : i32
    %290 = arith.index_cast %289 : i32 to index
    %c0_139 = arith.constant 0 : index
    %c0_140 = arith.constant 0 : index
    %291 = vector.load %arg1[%290, %c0_139, %c0_140] : memref<8x8x512xf32, #tpu.memory_space<vmem>>, vector<1x8x512xf32>
    %292 = vector.shape_cast %291 : vector<1x8x512xf32> to vector<8x512xf32>
    %c0_141 = arith.constant 0 : index
    %c0_142 = arith.constant 0 : index
    %293 = vector.load %arg11[%c0_141, %c0_142] : memref<8x128xf32, #tpu.memory_space<vmem>>, vector<8x128xf32>
    %cst_143 = arith.constant dense<0.000000e+00> : vector<8x512xf32>
    %294 = tpu.matmul %293, %1, %cst_143 {dimension_numbers = #tpu.dot_dimension_numbers<[1], [0], [0], [1], [0, 0, 1, 1], [], []>} : vector<8x128xf32>, vector<128x512xf32>, vector<8x512xf32> -> vector<8x512xf32>
    %295 = arith.addf %292, %294 : vector<8x512xf32>
    %296 = vector.extract_strided_slice %295 {offsets = [0, 0], sizes = [8, 128], strides = [1, 1]} : vector<8x512xf32> to vector<8x128xf32>
    %297 = arith.negf %296 : vector<8x128xf32>
    %298 = math.exp %297 : vector<8x128xf32>
    %cst_144 = arith.constant 1.000000e+00 : f32
    %299 = vector.broadcast %cst_144 : f32 to vector<8x128xf32>
    %300 = arith.addf %299, %298 : vector<8x128xf32>
    %301 = arith.divf %299, %300 : vector<8x128xf32>
    %302 = vector.extract_strided_slice %295 {offsets = [0, 128], sizes = [8, 128], strides = [1, 1]} : vector<8x512xf32> to vector<8x128xf32>
    %303 = arith.negf %302 : vector<8x128xf32>
    %304 = math.exp %303 : vector<8x128xf32>
    %cst_145 = arith.constant 1.000000e+00 : f32
    %305 = vector.broadcast %cst_145 : f32 to vector<8x128xf32>
    %306 = arith.addf %305, %304 : vector<8x128xf32>
    %307 = arith.divf %305, %306 : vector<8x128xf32>
    %308 = vector.extract_strided_slice %295 {offsets = [0, 256], sizes = [8, 128], strides = [1, 1]} : vector<8x512xf32> to vector<8x128xf32>
    %309 = math.tanh %308 : vector<8x128xf32>
    %310 = vector.extract_strided_slice %295 {offsets = [0, 384], sizes = [8, 128], strides = [1, 1]} : vector<8x512xf32> to vector<8x128xf32>
    %311 = arith.negf %310 : vector<8x128xf32>
    %312 = math.exp %311 : vector<8x128xf32>
    %cst_146 = arith.constant 1.000000e+00 : f32
    %313 = vector.broadcast %cst_146 : f32 to vector<8x128xf32>
    %314 = arith.addf %313, %312 : vector<8x128xf32>
    %315 = arith.divf %313, %314 : vector<8x128xf32>
    %c0_147 = arith.constant 0 : index
    %c0_148 = arith.constant 0 : index
    %316 = vector.load %arg12[%c0_147, %c0_148] : memref<8x128xf32, #tpu.memory_space<vmem>>, vector<8x128xf32>
    %317 = arith.mulf %307, %316 : vector<8x128xf32>
    %318 = arith.mulf %301, %309 : vector<8x128xf32>
    %319 = arith.addf %317, %318 : vector<8x128xf32>
    %320 = math.tanh %319 : vector<8x128xf32>
    %321 = arith.mulf %315, %320 : vector<8x128xf32>
    %c0_149 = arith.constant 0 : index
    %c0_150 = arith.constant 0 : index
    %322 = vector.load %arg12[%c0_149, %c0_150] : memref<8x128xf32, #tpu.memory_space<vmem>>, vector<8x128xf32>
    tpu.vector_store %arg12[%c0_149, %c0_150], %319 {strides = array<i32>} : memref<8x128xf32, #tpu.memory_space<vmem>>, vector<8x128xf32>,
    %c0_151 = arith.constant 0 : index
    %c0_152 = arith.constant 0 : index
    %323 = vector.load %arg11[%c0_151, %c0_152] : memref<8x128xf32, #tpu.memory_space<vmem>>, vector<8x128xf32>
    tpu.vector_store %arg11[%c0_151, %c0_152], %321 {strides = array<i32>} : memref<8x128xf32, #tpu.memory_space<vmem>>, vector<8x128xf32>,
    %324 = arith.index_cast %289 : i32 to index
    %c0_153 = arith.constant 0 : index
    %c0_154 = arith.constant 0 : index
    %325 = vector.load %arg7[%324, %c0_153, %c0_154] : memref<8x8x128xf32, #tpu.memory_space<vmem>>, vector<1x8x128xf32>
    %326 = vector.shape_cast %325 : vector<1x8x128xf32> to vector<8x128xf32>
    %327 = vector.shape_cast %321 : vector<8x128xf32> to vector<1x8x128xf32>
    tpu.vector_store %arg7[%324, %c0_153, %c0_154], %327 {strides = array<i32>} : memref<8x8x128xf32, #tpu.memory_space<vmem>>, vector<1x8x128xf32>,
    %c8_i32 = arith.constant 8 : i32
    %c0_155 = arith.constant 0 : index
    %c0_156 = arith.constant 0 : index
    %328 = vector.load %arg11[%c0_155, %c0_156] : memref<8x128xf32, #tpu.memory_space<vmem>>, vector<8x128xf32>
    %c0_157 = arith.constant 0 : index
    %c0_158 = arith.constant 0 : index
    %c0_159 = arith.constant 0 : index
    %329 = vector.load %arg8[%c0_157, %c0_158, %c0_159] : memref<2x8x128xf32, #tpu.memory_space<vmem>>, vector<1x8x128xf32>
    %330 = vector.shape_cast %329 : vector<1x8x128xf32> to vector<8x128xf32>
    %331 = vector.shape_cast %328 : vector<8x128xf32> to vector<1x8x128xf32>
    tpu.vector_store %arg8[%c0_157, %c0_158, %c0_159], %331 {strides = array<i32>} : memref<2x8x128xf32, #tpu.memory_space<vmem>>, vector<1x8x128xf32>,
    %c0_160 = arith.constant 0 : index
    %c0_161 = arith.constant 0 : index
    %332 = vector.load %arg12[%c0_160, %c0_161] : memref<8x128xf32, #tpu.memory_space<vmem>>, vector<8x128xf32>
    %c0_162 = arith.constant 0 : index
    %c0_163 = arith.constant 0 : index
    %c0_164 = arith.constant 0 : index
    %333 = vector.load %arg9[%c0_162, %c0_163, %c0_164] : memref<2x8x128xf32, #tpu.memory_space<vmem>>, vector<1x8x128xf32>
    %334 = vector.shape_cast %333 : vector<1x8x128xf32> to vector<8x128xf32>
    %335 = vector.shape_cast %332 : vector<8x128xf32> to vector<1x8x128xf32>
    tpu.vector_store %arg9[%c0_162, %c0_163, %c0_164], %335 {strides = array<i32>} : memref<2x8x128xf32, #tpu.memory_space<vmem>>, vector<1x8x128xf32>,
    %c0_165 = arith.constant 0 : index
    %c0_166 = arith.constant 0 : index
    %c0_167 = arith.constant 0 : index
    %336 = vector.load %arg7[%c0_165, %c0_166, %c0_167] : memref<8x8x128xf32, #tpu.memory_space<vmem>>, vector<8x8x128xf32>
    %337 = vector.shape_cast %336 : vector<8x8x128xf32> to vector<64x128xf32>
    %c0_168 = arith.constant 0 : index
    %c0_169 = arith.constant 0 : index
    %c0_170 = arith.constant 0 : index
    %338 = vector.load %arg2[%c0_168, %c0_169, %c0_170] : memref<1x128x512xf32, #tpu.memory_space<vmem>>, vector<1x128x512xf32>
    %339 = vector.shape_cast %338 : vector<1x128x512xf32> to vector<128x512xf32>
    %cst_171 = arith.constant dense<0.000000e+00> : vector<64x512xf32>
    %340 = tpu.matmul %337, %339, %cst_171 {dimension_numbers = #tpu.dot_dimension_numbers<[1], [0], [0], [1], [0, 0, 1, 1], [], []>} : vector<64x128xf32>, vector<128x512xf32>, vector<64x512xf32> -> vector<64x512xf32>
    %c0_172 = arith.constant 0 : index
    %c0_173 = arith.constant 0 : index
    %c0_174 = arith.constant 0 : index
    %341 = vector.load %arg4[%c0_172, %c0_173, %c0_174] : memref<1x1x512xf32, #tpu.memory_space<vmem>>, vector<1x1x512xf32>
    %342 = vector.shape_cast %341 : vector<1x1x512xf32> to vector<1x512xf32>
    %343 = vector.broadcast %342 : vector<1x512xf32> to vector<64x512xf32>
    %344 = arith.addf %340, %343 : vector<64x512xf32>
    %345 = vector.shape_cast %344 : vector<64x512xf32> to vector<8x8x512xf32>
    %c0_175 = arith.constant 0 : index
    %c0_176 = arith.constant 0 : index
    %c0_177 = arith.constant 0 : index
    %346 = vector.load %arg10[%c0_175, %c0_176, %c0_177] : memref<8x8x512xf32, #tpu.memory_space<vmem>>, vector<8x8x512xf32>
    tpu.vector_store %arg10[%c0_175, %c0_176, %c0_177], %345 {strides = array<i32>} : memref<8x8x512xf32, #tpu.memory_space<vmem>>, vector<8x8x512xf32>,
    %c1 = arith.constant 1 : index
    %c0_178 = arith.constant 0 : index
    %c0_179 = arith.constant 0 : index
    %347 = vector.load %arg3[%c1, %c0_178, %c0_179] : memref<2x128x512xf32, #tpu.memory_space<vmem>>, vector<1x128x512xf32>
    %348 = vector.shape_cast %347 : vector<1x128x512xf32> to vector<128x512xf32>
    %c1_180 = arith.constant 1 : index
    %c0_181 = arith.constant 0 : index
    %c0_182 = arith.constant 0 : index
    %349 = vector.load %arg5[%c1_180, %c0_181, %c0_182] : memref<2x8x128xf32, #tpu.memory_space<vmem>>, vector<1x8x128xf32>
    %350 = vector.shape_cast %349 : vector<1x8x128xf32> to vector<8x128xf32>
    %c0_183 = arith.constant 0 : index
    %c0_184 = arith.constant 0 : index
    %351 = vector.load %arg11[%c0_183, %c0_184] : memref<8x128xf32, #tpu.memory_space<vmem>>, vector<8x128xf32>
    tpu.vector_store %arg11[%c0_183, %c0_184], %350 {strides = array<i32>} : memref<8x128xf32, #tpu.memory_space<vmem>>, vector<8x128xf32>,
    %c1_185 = arith.constant 1 : index
    %c0_186 = arith.constant 0 : index
    %c0_187 = arith.constant 0 : index
    %352 = vector.load %arg6[%c1_185, %c0_186, %c0_187] : memref<2x8x128xf32, #tpu.memory_space<vmem>>, vector<1x8x128xf32>
    %353 = vector.shape_cast %352 : vector<1x8x128xf32> to vector<8x128xf32>
    %c0_188 = arith.constant 0 : index
    %c0_189 = arith.constant 0 : index
    %354 = vector.load %arg12[%c0_188, %c0_189] : memref<8x128xf32, #tpu.memory_space<vmem>>, vector<8x128xf32>
    tpu.vector_store %arg12[%c0_188, %c0_189], %353 {strides = array<i32>} : memref<8x128xf32, #tpu.memory_space<vmem>>, vector<8x128xf32>,
    %c0_i32_190 = arith.constant 0 : i32
    %c1_i32_191 = arith.constant 1 : i32
    %355 = arith.muli %c0_i32_190, %c1_i32_191 : i32
    %c0_i32_192 = arith.constant 0 : i32
    %356 = arith.addi %c0_i32_192, %355 : i32
    %357 = arith.index_cast %356 : i32 to index
    %c0_193 = arith.constant 0 : index
    %c0_194 = arith.constant 0 : index
    %358 = vector.load %arg10[%357, %c0_193, %c0_194] : memref<8x8x512xf32, #tpu.memory_space<vmem>>, vector<1x8x512xf32>
    %359 = vector.shape_cast %358 : vector<1x8x512xf32> to vector<8x512xf32>
    %c0_195 = arith.constant 0 : index
    %c0_196 = arith.constant 0 : index
    %360 = vector.load %arg11[%c0_195, %c0_196] : memref<8x128xf32, #tpu.memory_space<vmem>>, vector<8x128xf32>
    %cst_197 = arith.constant dense<0.000000e+00> : vector<8x512xf32>
    %361 = tpu.matmul %360, %348, %cst_197 {dimension_numbers = #tpu.dot_dimension_numbers<[1], [0], [0], [1], [0, 0, 1, 1], [], []>} : vector<8x128xf32>, vector<128x512xf32>, vector<8x512xf32> -> vector<8x512xf32>
    %362 = arith.addf %359, %361 : vector<8x512xf32>
    %363 = vector.extract_strided_slice %362 {offsets = [0, 0], sizes = [8, 128], strides = [1, 1]} : vector<8x512xf32> to vector<8x128xf32>
    %364 = arith.negf %363 : vector<8x128xf32>
    %365 = math.exp %364 : vector<8x128xf32>
    %cst_198 = arith.constant 1.000000e+00 : f32
    %366 = vector.broadcast %cst_198 : f32 to vector<8x128xf32>
    %367 = arith.addf %366, %365 : vector<8x128xf32>
    %368 = arith.divf %366, %367 : vector<8x128xf32>
    %369 = vector.extract_strided_slice %362 {offsets = [0, 128], sizes = [8, 128], strides = [1, 1]} : vector<8x512xf32> to vector<8x128xf32>
    %370 = arith.negf %369 : vector<8x128xf32>
    %371 = math.exp %370 : vector<8x128xf32>
    %cst_199 = arith.constant 1.000000e+00 : f32
    %372 = vector.broadcast %cst_199 : f32 to vector<8x128xf32>
    %373 = arith.addf %372, %371 : vector<8x128xf32>
    %374 = arith.divf %372, %373 : vector<8x128xf32>
    %375 = vector.extract_strided_slice %362 {offsets = [0, 256], sizes = [8, 128], strides = [1, 1]} : vector<8x512xf32> to vector<8x128xf32>
    %376 = math.tanh %375 : vector<8x128xf32>
    %377 = vector.extract_strided_slice %362 {offsets = [0, 384], sizes = [8, 128], strides = [1, 1]} : vector<8x512xf32> to vector<8x128xf32>
    %378 = arith.negf %377 : vector<8x128xf32>
    %379 = math.exp %378 : vector<8x128xf32>
    %cst_200 = arith.constant 1.000000e+00 : f32
    %380 = vector.broadcast %cst_200 : f32 to vector<8x128xf32>
    %381 = arith.addf %380, %379 : vector<8x128xf32>
    %382 = arith.divf %380, %381 : vector<8x128xf32>
    %c0_201 = arith.constant 0 : index
    %c0_202 = arith.constant 0 : index
    %383 = vector.load %arg12[%c0_201, %c0_202] : memref<8x128xf32, #tpu.memory_space<vmem>>, vector<8x128xf32>
    %384 = arith.mulf %374, %383 : vector<8x128xf32>
    %385 = arith.mulf %368, %376 : vector<8x128xf32>
    %386 = arith.addf %384, %385 : vector<8x128xf32>
    %387 = math.tanh %386 : vector<8x128xf32>
    %388 = arith.mulf %382, %387 : vector<8x128xf32>
    %c0_203 = arith.constant 0 : index
    %c0_204 = arith.constant 0 : index
    %389 = vector.load %arg12[%c0_203, %c0_204] : memref<8x128xf32, #tpu.memory_space<vmem>>, vector<8x128xf32>
    tpu.vector_store %arg12[%c0_203, %c0_204], %386 {strides = array<i32>} : memref<8x128xf32, #tpu.memory_space<vmem>>, vector<8x128xf32>,
    %c0_205 = arith.constant 0 : index
    %c0_206 = arith.constant 0 : index
    %390 = vector.load %arg11[%c0_205, %c0_206] : memref<8x128xf32, #tpu.memory_space<vmem>>, vector<8x128xf32>
    tpu.vector_store %arg11[%c0_205, %c0_206], %388 {strides = array<i32>} : memref<8x128xf32, #tpu.memory_space<vmem>>, vector<8x128xf32>,
    %391 = arith.index_cast %356 : i32 to index
    %c0_207 = arith.constant 0 : index
    %c0_208 = arith.constant 0 : index
    %392 = vector.load %arg7[%391, %c0_207, %c0_208] : memref<8x8x128xf32, #tpu.memory_space<vmem>>, vector<1x8x128xf32>
    %393 = vector.shape_cast %392 : vector<1x8x128xf32> to vector<8x128xf32>
    %394 = vector.shape_cast %388 : vector<8x128xf32> to vector<1x8x128xf32>
    tpu.vector_store %arg7[%391, %c0_207, %c0_208], %394 {strides = array<i32>} : memref<8x8x128xf32, #tpu.memory_space<vmem>>, vector<1x8x128xf32>,
    %c1_i32_209 = arith.constant 1 : i32
    %c1_i32_210 = arith.constant 1 : i32
    %395 = arith.muli %c1_i32_209, %c1_i32_210 : i32
    %c0_i32_211 = arith.constant 0 : i32
    %396 = arith.addi %c0_i32_211, %395 : i32
    %397 = arith.index_cast %396 : i32 to index
    %c0_212 = arith.constant 0 : index
    %c0_213 = arith.constant 0 : index
    %398 = vector.load %arg10[%397, %c0_212, %c0_213] : memref<8x8x512xf32, #tpu.memory_space<vmem>>, vector<1x8x512xf32>
    %399 = vector.shape_cast %398 : vector<1x8x512xf32> to vector<8x512xf32>
    %c0_214 = arith.constant 0 : index
    %c0_215 = arith.constant 0 : index
    %400 = vector.load %arg11[%c0_214, %c0_215] : memref<8x128xf32, #tpu.memory_space<vmem>>, vector<8x128xf32>
    %cst_216 = arith.constant dense<0.000000e+00> : vector<8x512xf32>
    %401 = tpu.matmul %400, %348, %cst_216 {dimension_numbers = #tpu.dot_dimension_numbers<[1], [0], [0], [1], [0, 0, 1, 1], [], []>} : vector<8x128xf32>, vector<128x512xf32>, vector<8x512xf32> -> vector<8x512xf32>
    %402 = arith.addf %399, %401 : vector<8x512xf32>
    %403 = vector.extract_strided_slice %402 {offsets = [0, 0], sizes = [8, 128], strides = [1, 1]} : vector<8x512xf32> to vector<8x128xf32>
    %404 = arith.negf %403 : vector<8x128xf32>
    %405 = math.exp %404 : vector<8x128xf32>
    %cst_217 = arith.constant 1.000000e+00 : f32
    %406 = vector.broadcast %cst_217 : f32 to vector<8x128xf32>
    %407 = arith.addf %406, %405 : vector<8x128xf32>
    %408 = arith.divf %406, %407 : vector<8x128xf32>
    %409 = vector.extract_strided_slice %402 {offsets = [0, 128], sizes = [8, 128], strides = [1, 1]} : vector<8x512xf32> to vector<8x128xf32>
    %410 = arith.negf %409 : vector<8x128xf32>
    %411 = math.exp %410 : vector<8x128xf32>
    %cst_218 = arith.constant 1.000000e+00 : f32
    %412 = vector.broadcast %cst_218 : f32 to vector<8x128xf32>
    %413 = arith.addf %412, %411 : vector<8x128xf32>
    %414 = arith.divf %412, %413 : vector<8x128xf32>
    %415 = vector.extract_strided_slice %402 {offsets = [0, 256], sizes = [8, 128], strides = [1, 1]} : vector<8x512xf32> to vector<8x128xf32>
    %416 = math.tanh %415 : vector<8x128xf32>
    %417 = vector.extract_strided_slice %402 {offsets = [0, 384], sizes = [8, 128], strides = [1, 1]} : vector<8x512xf32> to vector<8x128xf32>
    %418 = arith.negf %417 : vector<8x128xf32>
    %419 = math.exp %418 : vector<8x128xf32>
    %cst_219 = arith.constant 1.000000e+00 : f32
    %420 = vector.broadcast %cst_219 : f32 to vector<8x128xf32>
    %421 = arith.addf %420, %419 : vector<8x128xf32>
    %422 = arith.divf %420, %421 : vector<8x128xf32>
    %c0_220 = arith.constant 0 : index
    %c0_221 = arith.constant 0 : index
    %423 = vector.load %arg12[%c0_220, %c0_221] : memref<8x128xf32, #tpu.memory_space<vmem>>, vector<8x128xf32>
    %424 = arith.mulf %414, %423 : vector<8x128xf32>
    %425 = arith.mulf %408, %416 : vector<8x128xf32>
    %426 = arith.addf %424, %425 : vector<8x128xf32>
    %427 = math.tanh %426 : vector<8x128xf32>
    %428 = arith.mulf %422, %427 : vector<8x128xf32>
    %c0_222 = arith.constant 0 : index
    %c0_223 = arith.constant 0 : index
    %429 = vector.load %arg12[%c0_222, %c0_223] : memref<8x128xf32, #tpu.memory_space<vmem>>, vector<8x128xf32>
    tpu.vector_store %arg12[%c0_222, %c0_223], %426 {strides = array<i32>} : memref<8x128xf32, #tpu.memory_space<vmem>>, vector<8x128xf32>,
    %c0_224 = arith.constant 0 : index
    %c0_225 = arith.constant 0 : index
    %430 = vector.load %arg11[%c0_224, %c0_225] : memref<8x128xf32, #tpu.memory_space<vmem>>, vector<8x128xf32>
    tpu.vector_store %arg11[%c0_224, %c0_225], %428 {strides = array<i32>} : memref<8x128xf32, #tpu.memory_space<vmem>>, vector<8x128xf32>,
    %431 = arith.index_cast %396 : i32 to index
    %c0_226 = arith.constant 0 : index
    %c0_227 = arith.constant 0 : index
    %432 = vector.load %arg7[%431, %c0_226, %c0_227] : memref<8x8x128xf32, #tpu.memory_space<vmem>>, vector<1x8x128xf32>
    %433 = vector.shape_cast %432 : vector<1x8x128xf32> to vector<8x128xf32>
    %434 = vector.shape_cast %428 : vector<8x128xf32> to vector<1x8x128xf32>
    tpu.vector_store %arg7[%431, %c0_226, %c0_227], %434 {strides = array<i32>} : memref<8x8x128xf32, #tpu.memory_space<vmem>>, vector<1x8x128xf32>,
    %c2_i32_228 = arith.constant 2 : i32
    %c1_i32_229 = arith.constant 1 : i32
    %435 = arith.muli %c2_i32_228, %c1_i32_229 : i32
    %c0_i32_230 = arith.constant 0 : i32
    %436 = arith.addi %c0_i32_230, %435 : i32
    %437 = arith.index_cast %436 : i32 to index
    %c0_231 = arith.constant 0 : index
    %c0_232 = arith.constant 0 : index
    %438 = vector.load %arg10[%437, %c0_231, %c0_232] : memref<8x8x512xf32, #tpu.memory_space<vmem>>, vector<1x8x512xf32>
    %439 = vector.shape_cast %438 : vector<1x8x512xf32> to vector<8x512xf32>
    %c0_233 = arith.constant 0 : index
    %c0_234 = arith.constant 0 : index
    %440 = vector.load %arg11[%c0_233, %c0_234] : memref<8x128xf32, #tpu.memory_space<vmem>>, vector<8x128xf32>
    %cst_235 = arith.constant dense<0.000000e+00> : vector<8x512xf32>
    %441 = tpu.matmul %440, %348, %cst_235 {dimension_numbers = #tpu.dot_dimension_numbers<[1], [0], [0], [1], [0, 0, 1, 1], [], []>} : vector<8x128xf32>, vector<128x512xf32>, vector<8x512xf32> -> vector<8x512xf32>
    %442 = arith.addf %439, %441 : vector<8x512xf32>
    %443 = vector.extract_strided_slice %442 {offsets = [0, 0], sizes = [8, 128], strides = [1, 1]} : vector<8x512xf32> to vector<8x128xf32>
    %444 = arith.negf %443 : vector<8x128xf32>
    %445 = math.exp %444 : vector<8x128xf32>
    %cst_236 = arith.constant 1.000000e+00 : f32
    %446 = vector.broadcast %cst_236 : f32 to vector<8x128xf32>
    %447 = arith.addf %446, %445 : vector<8x128xf32>
    %448 = arith.divf %446, %447 : vector<8x128xf32>
    %449 = vector.extract_strided_slice %442 {offsets = [0, 128], sizes = [8, 128], strides = [1, 1]} : vector<8x512xf32> to vector<8x128xf32>
    %450 = arith.negf %449 : vector<8x128xf32>
    %451 = math.exp %450 : vector<8x128xf32>
    %cst_237 = arith.constant 1.000000e+00 : f32
    %452 = vector.broadcast %cst_237 : f32 to vector<8x128xf32>
    %453 = arith.addf %452, %451 : vector<8x128xf32>
    %454 = arith.divf %452, %453 : vector<8x128xf32>
    %455 = vector.extract_strided_slice %442 {offsets = [0, 256], sizes = [8, 128], strides = [1, 1]} : vector<8x512xf32> to vector<8x128xf32>
    %456 = math.tanh %455 : vector<8x128xf32>
    %457 = vector.extract_strided_slice %442 {offsets = [0, 384], sizes = [8, 128], strides = [1, 1]} : vector<8x512xf32> to vector<8x128xf32>
    %458 = arith.negf %457 : vector<8x128xf32>
    %459 = math.exp %458 : vector<8x128xf32>
    %cst_238 = arith.constant 1.000000e+00 : f32
    %460 = vector.broadcast %cst_238 : f32 to vector<8x128xf32>
    %461 = arith.addf %460, %459 : vector<8x128xf32>
    %462 = arith.divf %460, %461 : vector<8x128xf32>
    %c0_239 = arith.constant 0 : index
    %c0_240 = arith.constant 0 : index
    %463 = vector.load %arg12[%c0_239, %c0_240] : memref<8x128xf32, #tpu.memory_space<vmem>>, vector<8x128xf32>
    %464 = arith.mulf %454, %463 : vector<8x128xf32>
    %465 = arith.mulf %448, %456 : vector<8x128xf32>
    %466 = arith.addf %464, %465 : vector<8x128xf32>
    %467 = math.tanh %466 : vector<8x128xf32>
    %468 = arith.mulf %462, %467 : vector<8x128xf32>
    %c0_241 = arith.constant 0 : index
    %c0_242 = arith.constant 0 : index
    %469 = vector.load %arg12[%c0_241, %c0_242] : memref<8x128xf32, #tpu.memory_space<vmem>>, vector<8x128xf32>
    tpu.vector_store %arg12[%c0_241, %c0_242], %466 {strides = array<i32>} : memref<8x128xf32, #tpu.memory_space<vmem>>, vector<8x128xf32>,
    %c0_243 = arith.constant 0 : index
    %c0_244 = arith.constant 0 : index
    %470 = vector.load %arg11[%c0_243, %c0_244] : memref<8x128xf32, #tpu.memory_space<vmem>>, vector<8x128xf32>
    tpu.vector_store %arg11[%c0_243, %c0_244], %468 {strides = array<i32>} : memref<8x128xf32, #tpu.memory_space<vmem>>, vector<8x128xf32>,
    %471 = arith.index_cast %436 : i32 to index
    %c0_245 = arith.constant 0 : index
    %c0_246 = arith.constant 0 : index
    %472 = vector.load %arg7[%471, %c0_245, %c0_246] : memref<8x8x128xf32, #tpu.memory_space<vmem>>, vector<1x8x128xf32>
    %473 = vector.shape_cast %472 : vector<1x8x128xf32> to vector<8x128xf32>
    %474 = vector.shape_cast %468 : vector<8x128xf32> to vector<1x8x128xf32>
    tpu.vector_store %arg7[%471, %c0_245, %c0_246], %474 {strides = array<i32>} : memref<8x8x128xf32, #tpu.memory_space<vmem>>, vector<1x8x128xf32>,
    %c3_i32_247 = arith.constant 3 : i32
    %c1_i32_248 = arith.constant 1 : i32
    %475 = arith.muli %c3_i32_247, %c1_i32_248 : i32
    %c0_i32_249 = arith.constant 0 : i32
    %476 = arith.addi %c0_i32_249, %475 : i32
    %477 = arith.index_cast %476 : i32 to index
    %c0_250 = arith.constant 0 : index
    %c0_251 = arith.constant 0 : index
    %478 = vector.load %arg10[%477, %c0_250, %c0_251] : memref<8x8x512xf32, #tpu.memory_space<vmem>>, vector<1x8x512xf32>
    %479 = vector.shape_cast %478 : vector<1x8x512xf32> to vector<8x512xf32>
    %c0_252 = arith.constant 0 : index
    %c0_253 = arith.constant 0 : index
    %480 = vector.load %arg11[%c0_252, %c0_253] : memref<8x128xf32, #tpu.memory_space<vmem>>, vector<8x128xf32>
    %cst_254 = arith.constant dense<0.000000e+00> : vector<8x512xf32>
    %481 = tpu.matmul %480, %348, %cst_254 {dimension_numbers = #tpu.dot_dimension_numbers<[1], [0], [0], [1], [0, 0, 1, 1], [], []>} : vector<8x128xf32>, vector<128x512xf32>, vector<8x512xf32> -> vector<8x512xf32>
    %482 = arith.addf %479, %481 : vector<8x512xf32>
    %483 = vector.extract_strided_slice %482 {offsets = [0, 0], sizes = [8, 128], strides = [1, 1]} : vector<8x512xf32> to vector<8x128xf32>
    %484 = arith.negf %483 : vector<8x128xf32>
    %485 = math.exp %484 : vector<8x128xf32>
    %cst_255 = arith.constant 1.000000e+00 : f32
    %486 = vector.broadcast %cst_255 : f32 to vector<8x128xf32>
    %487 = arith.addf %486, %485 : vector<8x128xf32>
    %488 = arith.divf %486, %487 : vector<8x128xf32>
    %489 = vector.extract_strided_slice %482 {offsets = [0, 128], sizes = [8, 128], strides = [1, 1]} : vector<8x512xf32> to vector<8x128xf32>
    %490 = arith.negf %489 : vector<8x128xf32>
    %491 = math.exp %490 : vector<8x128xf32>
    %cst_256 = arith.constant 1.000000e+00 : f32
    %492 = vector.broadcast %cst_256 : f32 to vector<8x128xf32>
    %493 = arith.addf %492, %491 : vector<8x128xf32>
    %494 = arith.divf %492, %493 : vector<8x128xf32>
    %495 = vector.extract_strided_slice %482 {offsets = [0, 256], sizes = [8, 128], strides = [1, 1]} : vector<8x512xf32> to vector<8x128xf32>
    %496 = math.tanh %495 : vector<8x128xf32>
    %497 = vector.extract_strided_slice %482 {offsets = [0, 384], sizes = [8, 128], strides = [1, 1]} : vector<8x512xf32> to vector<8x128xf32>
    %498 = arith.negf %497 : vector<8x128xf32>
    %499 = math.exp %498 : vector<8x128xf32>
    %cst_257 = arith.constant 1.000000e+00 : f32
    %500 = vector.broadcast %cst_257 : f32 to vector<8x128xf32>
    %501 = arith.addf %500, %499 : vector<8x128xf32>
    %502 = arith.divf %500, %501 : vector<8x128xf32>
    %c0_258 = arith.constant 0 : index
    %c0_259 = arith.constant 0 : index
    %503 = vector.load %arg12[%c0_258, %c0_259] : memref<8x128xf32, #tpu.memory_space<vmem>>, vector<8x128xf32>
    %504 = arith.mulf %494, %503 : vector<8x128xf32>
    %505 = arith.mulf %488, %496 : vector<8x128xf32>
    %506 = arith.addf %504, %505 : vector<8x128xf32>
    %507 = math.tanh %506 : vector<8x128xf32>
    %508 = arith.mulf %502, %507 : vector<8x128xf32>
    %c0_260 = arith.constant 0 : index
    %c0_261 = arith.constant 0 : index
    %509 = vector.load %arg12[%c0_260, %c0_261] : memref<8x128xf32, #tpu.memory_space<vmem>>, vector<8x128xf32>
    tpu.vector_store %arg12[%c0_260, %c0_261], %506 {strides = array<i32>} : memref<8x128xf32, #tpu.memory_space<vmem>>, vector<8x128xf32>,
    %c0_262 = arith.constant 0 : index
    %c0_263 = arith.constant 0 : index
    %510 = vector.load %arg11[%c0_262, %c0_263] : memref<8x128xf32, #tpu.memory_space<vmem>>, vector<8x128xf32>
    tpu.vector_store %arg11[%c0_262, %c0_263], %508 {strides = array<i32>} : memref<8x128xf32, #tpu.memory_space<vmem>>, vector<8x128xf32>,
    %511 = arith.index_cast %476 : i32 to index
    %c0_264 = arith.constant 0 : index
    %c0_265 = arith.constant 0 : index
    %512 = vector.load %arg7[%511, %c0_264, %c0_265] : memref<8x8x128xf32, #tpu.memory_space<vmem>>, vector<1x8x128xf32>
    %513 = vector.shape_cast %512 : vector<1x8x128xf32> to vector<8x128xf32>
    %514 = vector.shape_cast %508 : vector<8x128xf32> to vector<1x8x128xf32>
    tpu.vector_store %arg7[%511, %c0_264, %c0_265], %514 {strides = array<i32>} : memref<8x8x128xf32, #tpu.memory_space<vmem>>, vector<1x8x128xf32>,
    %c4_i32_266 = arith.constant 4 : i32
    %c1_i32_267 = arith.constant 1 : i32
    %515 = arith.muli %c4_i32_266, %c1_i32_267 : i32
    %c0_i32_268 = arith.constant 0 : i32
    %516 = arith.addi %c0_i32_268, %515 : i32
    %517 = arith.index_cast %516 : i32 to index
    %c0_269 = arith.constant 0 : index
    %c0_270 = arith.constant 0 : index
    %518 = vector.load %arg10[%517, %c0_269, %c0_270] : memref<8x8x512xf32, #tpu.memory_space<vmem>>, vector<1x8x512xf32>
    %519 = vector.shape_cast %518 : vector<1x8x512xf32> to vector<8x512xf32>
    %c0_271 = arith.constant 0 : index
    %c0_272 = arith.constant 0 : index
    %520 = vector.load %arg11[%c0_271, %c0_272] : memref<8x128xf32, #tpu.memory_space<vmem>>, vector<8x128xf32>
    %cst_273 = arith.constant dense<0.000000e+00> : vector<8x512xf32>
    %521 = tpu.matmul %520, %348, %cst_273 {dimension_numbers = #tpu.dot_dimension_numbers<[1], [0], [0], [1], [0, 0, 1, 1], [], []>} : vector<8x128xf32>, vector<128x512xf32>, vector<8x512xf32> -> vector<8x512xf32>
    %522 = arith.addf %519, %521 : vector<8x512xf32>
    %523 = vector.extract_strided_slice %522 {offsets = [0, 0], sizes = [8, 128], strides = [1, 1]} : vector<8x512xf32> to vector<8x128xf32>
    %524 = arith.negf %523 : vector<8x128xf32>
    %525 = math.exp %524 : vector<8x128xf32>
    %cst_274 = arith.constant 1.000000e+00 : f32
    %526 = vector.broadcast %cst_274 : f32 to vector<8x128xf32>
    %527 = arith.addf %526, %525 : vector<8x128xf32>
    %528 = arith.divf %526, %527 : vector<8x128xf32>
    %529 = vector.extract_strided_slice %522 {offsets = [0, 128], sizes = [8, 128], strides = [1, 1]} : vector<8x512xf32> to vector<8x128xf32>
    %530 = arith.negf %529 : vector<8x128xf32>
    %531 = math.exp %530 : vector<8x128xf32>
    %cst_275 = arith.constant 1.000000e+00 : f32
    %532 = vector.broadcast %cst_275 : f32 to vector<8x128xf32>
    %533 = arith.addf %532, %531 : vector<8x128xf32>
    %534 = arith.divf %532, %533 : vector<8x128xf32>
    %535 = vector.extract_strided_slice %522 {offsets = [0, 256], sizes = [8, 128], strides = [1, 1]} : vector<8x512xf32> to vector<8x128xf32>
    %536 = math.tanh %535 : vector<8x128xf32>
    %537 = vector.extract_strided_slice %522 {offsets = [0, 384], sizes = [8, 128], strides = [1, 1]} : vector<8x512xf32> to vector<8x128xf32>
    %538 = arith.negf %537 : vector<8x128xf32>
    %539 = math.exp %538 : vector<8x128xf32>
    %cst_276 = arith.constant 1.000000e+00 : f32
    %540 = vector.broadcast %cst_276 : f32 to vector<8x128xf32>
    %541 = arith.addf %540, %539 : vector<8x128xf32>
    %542 = arith.divf %540, %541 : vector<8x128xf32>
    %c0_277 = arith.constant 0 : index
    %c0_278 = arith.constant 0 : index
    %543 = vector.load %arg12[%c0_277, %c0_278] : memref<8x128xf32, #tpu.memory_space<vmem>>, vector<8x128xf32>
    %544 = arith.mulf %534, %543 : vector<8x128xf32>
    %545 = arith.mulf %528, %536 : vector<8x128xf32>
    %546 = arith.addf %544, %545 : vector<8x128xf32>
    %547 = math.tanh %546 : vector<8x128xf32>
    %548 = arith.mulf %542, %547 : vector<8x128xf32>
    %c0_279 = arith.constant 0 : index
    %c0_280 = arith.constant 0 : index
    %549 = vector.load %arg12[%c0_279, %c0_280] : memref<8x128xf32, #tpu.memory_space<vmem>>, vector<8x128xf32>
    tpu.vector_store %arg12[%c0_279, %c0_280], %546 {strides = array<i32>} : memref<8x128xf32, #tpu.memory_space<vmem>>, vector<8x128xf32>,
    %c0_281 = arith.constant 0 : index
    %c0_282 = arith.constant 0 : index
    %550 = vector.load %arg11[%c0_281, %c0_282] : memref<8x128xf32, #tpu.memory_space<vmem>>, vector<8x128xf32>
    tpu.vector_store %arg11[%c0_281, %c0_282], %548 {strides = array<i32>} : memref<8x128xf32, #tpu.memory_space<vmem>>, vector<8x128xf32>,
    %551 = arith.index_cast %516 : i32 to index
    %c0_283 = arith.constant 0 : index
    %c0_284 = arith.constant 0 : index
    %552 = vector.load %arg7[%551, %c0_283, %c0_284] : memref<8x8x128xf32, #tpu.memory_space<vmem>>, vector<1x8x128xf32>
    %553 = vector.shape_cast %552 : vector<1x8x128xf32> to vector<8x128xf32>
    %554 = vector.shape_cast %548 : vector<8x128xf32> to vector<1x8x128xf32>
    tpu.vector_store %arg7[%551, %c0_283, %c0_284], %554 {strides = array<i32>} : memref<8x8x128xf32, #tpu.memory_space<vmem>>, vector<1x8x128xf32>,
    %c5_i32_285 = arith.constant 5 : i32
    %c1_i32_286 = arith.constant 1 : i32
    %555 = arith.muli %c5_i32_285, %c1_i32_286 : i32
    %c0_i32_287 = arith.constant 0 : i32
    %556 = arith.addi %c0_i32_287, %555 : i32
    %557 = arith.index_cast %556 : i32 to index
    %c0_288 = arith.constant 0 : index
    %c0_289 = arith.constant 0 : index
    %558 = vector.load %arg10[%557, %c0_288, %c0_289] : memref<8x8x512xf32, #tpu.memory_space<vmem>>, vector<1x8x512xf32>
    %559 = vector.shape_cast %558 : vector<1x8x512xf32> to vector<8x512xf32>
    %c0_290 = arith.constant 0 : index
    %c0_291 = arith.constant 0 : index
    %560 = vector.load %arg11[%c0_290, %c0_291] : memref<8x128xf32, #tpu.memory_space<vmem>>, vector<8x128xf32>
    %cst_292 = arith.constant dense<0.000000e+00> : vector<8x512xf32>
    %561 = tpu.matmul %560, %348, %cst_292 {dimension_numbers = #tpu.dot_dimension_numbers<[1], [0], [0], [1], [0, 0, 1, 1], [], []>} : vector<8x128xf32>, vector<128x512xf32>, vector<8x512xf32> -> vector<8x512xf32>
    %562 = arith.addf %559, %561 : vector<8x512xf32>
    %563 = vector.extract_strided_slice %562 {offsets = [0, 0], sizes = [8, 128], strides = [1, 1]} : vector<8x512xf32> to vector<8x128xf32>
    %564 = arith.negf %563 : vector<8x128xf32>
    %565 = math.exp %564 : vector<8x128xf32>
    %cst_293 = arith.constant 1.000000e+00 : f32
    %566 = vector.broadcast %cst_293 : f32 to vector<8x128xf32>
    %567 = arith.addf %566, %565 : vector<8x128xf32>
    %568 = arith.divf %566, %567 : vector<8x128xf32>
    %569 = vector.extract_strided_slice %562 {offsets = [0, 128], sizes = [8, 128], strides = [1, 1]} : vector<8x512xf32> to vector<8x128xf32>
    %570 = arith.negf %569 : vector<8x128xf32>
    %571 = math.exp %570 : vector<8x128xf32>
    %cst_294 = arith.constant 1.000000e+00 : f32
    %572 = vector.broadcast %cst_294 : f32 to vector<8x128xf32>
    %573 = arith.addf %572, %571 : vector<8x128xf32>
    %574 = arith.divf %572, %573 : vector<8x128xf32>
    %575 = vector.extract_strided_slice %562 {offsets = [0, 256], sizes = [8, 128], strides = [1, 1]} : vector<8x512xf32> to vector<8x128xf32>
    %576 = math.tanh %575 : vector<8x128xf32>
    %577 = vector.extract_strided_slice %562 {offsets = [0, 384], sizes = [8, 128], strides = [1, 1]} : vector<8x512xf32> to vector<8x128xf32>
    %578 = arith.negf %577 : vector<8x128xf32>
    %579 = math.exp %578 : vector<8x128xf32>
    %cst_295 = arith.constant 1.000000e+00 : f32
    %580 = vector.broadcast %cst_295 : f32 to vector<8x128xf32>
    %581 = arith.addf %580, %579 : vector<8x128xf32>
    %582 = arith.divf %580, %581 : vector<8x128xf32>
    %c0_296 = arith.constant 0 : index
    %c0_297 = arith.constant 0 : index
    %583 = vector.load %arg12[%c0_296, %c0_297] : memref<8x128xf32, #tpu.memory_space<vmem>>, vector<8x128xf32>
    %584 = arith.mulf %574, %583 : vector<8x128xf32>
    %585 = arith.mulf %568, %576 : vector<8x128xf32>
    %586 = arith.addf %584, %585 : vector<8x128xf32>
    %587 = math.tanh %586 : vector<8x128xf32>
    %588 = arith.mulf %582, %587 : vector<8x128xf32>
    %c0_298 = arith.constant 0 : index
    %c0_299 = arith.constant 0 : index
    %589 = vector.load %arg12[%c0_298, %c0_299] : memref<8x128xf32, #tpu.memory_space<vmem>>, vector<8x128xf32>
    tpu.vector_store %arg12[%c0_298, %c0_299], %586 {strides = array<i32>} : memref<8x128xf32, #tpu.memory_space<vmem>>, vector<8x128xf32>,
    %c0_300 = arith.constant 0 : index
    %c0_301 = arith.constant 0 : index
    %590 = vector.load %arg11[%c0_300, %c0_301] : memref<8x128xf32, #tpu.memory_space<vmem>>, vector<8x128xf32>
    tpu.vector_store %arg11[%c0_300, %c0_301], %588 {strides = array<i32>} : memref<8x128xf32, #tpu.memory_space<vmem>>, vector<8x128xf32>,
    %591 = arith.index_cast %556 : i32 to index
    %c0_302 = arith.constant 0 : index
    %c0_303 = arith.constant 0 : index
    %592 = vector.load %arg7[%591, %c0_302, %c0_303] : memref<8x8x128xf32, #tpu.memory_space<vmem>>, vector<1x8x128xf32>
    %593 = vector.shape_cast %592 : vector<1x8x128xf32> to vector<8x128xf32>
    %594 = vector.shape_cast %588 : vector<8x128xf32> to vector<1x8x128xf32>
    tpu.vector_store %arg7[%591, %c0_302, %c0_303], %594 {strides = array<i32>} : memref<8x8x128xf32, #tpu.memory_space<vmem>>, vector<1x8x128xf32>,
    %c6_i32_304 = arith.constant 6 : i32
    %c1_i32_305 = arith.constant 1 : i32
    %595 = arith.muli %c6_i32_304, %c1_i32_305 : i32
    %c0_i32_306 = arith.constant 0 : i32
    %596 = arith.addi %c0_i32_306, %595 : i32
    %597 = arith.index_cast %596 : i32 to index
    %c0_307 = arith.constant 0 : index
    %c0_308 = arith.constant 0 : index
    %598 = vector.load %arg10[%597, %c0_307, %c0_308] : memref<8x8x512xf32, #tpu.memory_space<vmem>>, vector<1x8x512xf32>
    %599 = vector.shape_cast %598 : vector<1x8x512xf32> to vector<8x512xf32>
    %c0_309 = arith.constant 0 : index
    %c0_310 = arith.constant 0 : index
    %600 = vector.load %arg11[%c0_309, %c0_310] : memref<8x128xf32, #tpu.memory_space<vmem>>, vector<8x128xf32>
    %cst_311 = arith.constant dense<0.000000e+00> : vector<8x512xf32>
    %601 = tpu.matmul %600, %348, %cst_311 {dimension_numbers = #tpu.dot_dimension_numbers<[1], [0], [0], [1], [0, 0, 1, 1], [], []>} : vector<8x128xf32>, vector<128x512xf32>, vector<8x512xf32> -> vector<8x512xf32>
    %602 = arith.addf %599, %601 : vector<8x512xf32>
    %603 = vector.extract_strided_slice %602 {offsets = [0, 0], sizes = [8, 128], strides = [1, 1]} : vector<8x512xf32> to vector<8x128xf32>
    %604 = arith.negf %603 : vector<8x128xf32>
    %605 = math.exp %604 : vector<8x128xf32>
    %cst_312 = arith.constant 1.000000e+00 : f32
    %606 = vector.broadcast %cst_312 : f32 to vector<8x128xf32>
    %607 = arith.addf %606, %605 : vector<8x128xf32>
    %608 = arith.divf %606, %607 : vector<8x128xf32>
    %609 = vector.extract_strided_slice %602 {offsets = [0, 128], sizes = [8, 128], strides = [1, 1]} : vector<8x512xf32> to vector<8x128xf32>
    %610 = arith.negf %609 : vector<8x128xf32>
    %611 = math.exp %610 : vector<8x128xf32>
    %cst_313 = arith.constant 1.000000e+00 : f32
    %612 = vector.broadcast %cst_313 : f32 to vector<8x128xf32>
    %613 = arith.addf %612, %611 : vector<8x128xf32>
    %614 = arith.divf %612, %613 : vector<8x128xf32>
    %615 = vector.extract_strided_slice %602 {offsets = [0, 256], sizes = [8, 128], strides = [1, 1]} : vector<8x512xf32> to vector<8x128xf32>
    %616 = math.tanh %615 : vector<8x128xf32>
    %617 = vector.extract_strided_slice %602 {offsets = [0, 384], sizes = [8, 128], strides = [1, 1]} : vector<8x512xf32> to vector<8x128xf32>
    %618 = arith.negf %617 : vector<8x128xf32>
    %619 = math.exp %618 : vector<8x128xf32>
    %cst_314 = arith.constant 1.000000e+00 : f32
    %620 = vector.broadcast %cst_314 : f32 to vector<8x128xf32>
    %621 = arith.addf %620, %619 : vector<8x128xf32>
    %622 = arith.divf %620, %621 : vector<8x128xf32>
    %c0_315 = arith.constant 0 : index
    %c0_316 = arith.constant 0 : index
    %623 = vector.load %arg12[%c0_315, %c0_316] : memref<8x128xf32, #tpu.memory_space<vmem>>, vector<8x128xf32>
    %624 = arith.mulf %614, %623 : vector<8x128xf32>
    %625 = arith.mulf %608, %616 : vector<8x128xf32>
    %626 = arith.addf %624, %625 : vector<8x128xf32>
    %627 = math.tanh %626 : vector<8x128xf32>
    %628 = arith.mulf %622, %627 : vector<8x128xf32>
    %c0_317 = arith.constant 0 : index
    %c0_318 = arith.constant 0 : index
    %629 = vector.load %arg12[%c0_317, %c0_318] : memref<8x128xf32, #tpu.memory_space<vmem>>, vector<8x128xf32>
    tpu.vector_store %arg12[%c0_317, %c0_318], %626 {strides = array<i32>} : memref<8x128xf32, #tpu.memory_space<vmem>>, vector<8x128xf32>,
    %c0_319 = arith.constant 0 : index
    %c0_320 = arith.constant 0 : index
    %630 = vector.load %arg11[%c0_319, %c0_320] : memref<8x128xf32, #tpu.memory_space<vmem>>, vector<8x128xf32>
    tpu.vector_store %arg11[%c0_319, %c0_320], %628 {strides = array<i32>} : memref<8x128xf32, #tpu.memory_space<vmem>>, vector<8x128xf32>,
    %631 = arith.index_cast %596 : i32 to index
    %c0_321 = arith.constant 0 : index
    %c0_322 = arith.constant 0 : index
    %632 = vector.load %arg7[%631, %c0_321, %c0_322] : memref<8x8x128xf32, #tpu.memory_space<vmem>>, vector<1x8x128xf32>
    %633 = vector.shape_cast %632 : vector<1x8x128xf32> to vector<8x128xf32>
    %634 = vector.shape_cast %628 : vector<8x128xf32> to vector<1x8x128xf32>
    tpu.vector_store %arg7[%631, %c0_321, %c0_322], %634 {strides = array<i32>} : memref<8x8x128xf32, #tpu.memory_space<vmem>>, vector<1x8x128xf32>,
    %c7_i32_323 = arith.constant 7 : i32
    %c1_i32_324 = arith.constant 1 : i32
    %635 = arith.muli %c7_i32_323, %c1_i32_324 : i32
    %c0_i32_325 = arith.constant 0 : i32
    %636 = arith.addi %c0_i32_325, %635 : i32
    %637 = arith.index_cast %636 : i32 to index
    %c0_326 = arith.constant 0 : index
    %c0_327 = arith.constant 0 : index
    %638 = vector.load %arg10[%637, %c0_326, %c0_327] : memref<8x8x512xf32, #tpu.memory_space<vmem>>, vector<1x8x512xf32>
    %639 = vector.shape_cast %638 : vector<1x8x512xf32> to vector<8x512xf32>
    %c0_328 = arith.constant 0 : index
    %c0_329 = arith.constant 0 : index
    %640 = vector.load %arg11[%c0_328, %c0_329] : memref<8x128xf32, #tpu.memory_space<vmem>>, vector<8x128xf32>
    %cst_330 = arith.constant dense<0.000000e+00> : vector<8x512xf32>
    %641 = tpu.matmul %640, %348, %cst_330 {dimension_numbers = #tpu.dot_dimension_numbers<[1], [0], [0], [1], [0, 0, 1, 1], [], []>} : vector<8x128xf32>, vector<128x512xf32>, vector<8x512xf32> -> vector<8x512xf32>
    %642 = arith.addf %639, %641 : vector<8x512xf32>
    %643 = vector.extract_strided_slice %642 {offsets = [0, 0], sizes = [8, 128], strides = [1, 1]} : vector<8x512xf32> to vector<8x128xf32>
    %644 = arith.negf %643 : vector<8x128xf32>
    %645 = math.exp %644 : vector<8x128xf32>
    %cst_331 = arith.constant 1.000000e+00 : f32
    %646 = vector.broadcast %cst_331 : f32 to vector<8x128xf32>
    %647 = arith.addf %646, %645 : vector<8x128xf32>
    %648 = arith.divf %646, %647 : vector<8x128xf32>
    %649 = vector.extract_strided_slice %642 {offsets = [0, 128], sizes = [8, 128], strides = [1, 1]} : vector<8x512xf32> to vector<8x128xf32>
    %650 = arith.negf %649 : vector<8x128xf32>
    %651 = math.exp %650 : vector<8x128xf32>
    %cst_332 = arith.constant 1.000000e+00 : f32
    %652 = vector.broadcast %cst_332 : f32 to vector<8x128xf32>
    %653 = arith.addf %652, %651 : vector<8x128xf32>
    %654 = arith.divf %652, %653 : vector<8x128xf32>
    %655 = vector.extract_strided_slice %642 {offsets = [0, 256], sizes = [8, 128], strides = [1, 1]} : vector<8x512xf32> to vector<8x128xf32>
    %656 = math.tanh %655 : vector<8x128xf32>
    %657 = vector.extract_strided_slice %642 {offsets = [0, 384], sizes = [8, 128], strides = [1, 1]} : vector<8x512xf32> to vector<8x128xf32>
    %658 = arith.negf %657 : vector<8x128xf32>
    %659 = math.exp %658 : vector<8x128xf32>
    %cst_333 = arith.constant 1.000000e+00 : f32
    %660 = vector.broadcast %cst_333 : f32 to vector<8x128xf32>
    %661 = arith.addf %660, %659 : vector<8x128xf32>
    %662 = arith.divf %660, %661 : vector<8x128xf32>
    %c0_334 = arith.constant 0 : index
    %c0_335 = arith.constant 0 : index
    %663 = vector.load %arg12[%c0_334, %c0_335] : memref<8x128xf32, #tpu.memory_space<vmem>>, vector<8x128xf32>
    %664 = arith.mulf %654, %663 : vector<8x128xf32>
    %665 = arith.mulf %648, %656 : vector<8x128xf32>
    %666 = arith.addf %664, %665 : vector<8x128xf32>
    %667 = math.tanh %666 : vector<8x128xf32>
    %668 = arith.mulf %662, %667 : vector<8x128xf32>
    %c0_336 = arith.constant 0 : index
    %c0_337 = arith.constant 0 : index
    %669 = vector.load %arg12[%c0_336, %c0_337] : memref<8x128xf32, #tpu.memory_space<vmem>>, vector<8x128xf32>
    tpu.vector_store %arg12[%c0_336, %c0_337], %666 {strides = array<i32>} : memref<8x128xf32, #tpu.memory_space<vmem>>, vector<8x128xf32>,
    %c0_338 = arith.constant 0 : index
    %c0_339 = arith.constant 0 : index
    %670 = vector.load %arg11[%c0_338, %c0_339] : memref<8x128xf32, #tpu.memory_space<vmem>>, vector<8x128xf32>
    tpu.vector_store %arg11[%c0_338, %c0_339], %668 {strides = array<i32>} : memref<8x128xf32, #tpu.memory_space<vmem>>, vector<8x128xf32>,
    %671 = arith.index_cast %636 : i32 to index
    %c0_340 = arith.constant 0 : index
    %c0_341 = arith.constant 0 : index
    %672 = vector.load %arg7[%671, %c0_340, %c0_341] : memref<8x8x128xf32, #tpu.memory_space<vmem>>, vector<1x8x128xf32>
    %673 = vector.shape_cast %672 : vector<1x8x128xf32> to vector<8x128xf32>
    %674 = vector.shape_cast %668 : vector<8x128xf32> to vector<1x8x128xf32>
    tpu.vector_store %arg7[%671, %c0_340, %c0_341], %674 {strides = array<i32>} : memref<8x8x128xf32, #tpu.memory_space<vmem>>, vector<1x8x128xf32>,
    %c8_i32_342 = arith.constant 8 : i32
    %c0_343 = arith.constant 0 : index
    %c0_344 = arith.constant 0 : index
    %675 = vector.load %arg11[%c0_343, %c0_344] : memref<8x128xf32, #tpu.memory_space<vmem>>, vector<8x128xf32>
    %c1_345 = arith.constant 1 : index
    %c0_346 = arith.constant 0 : index
    %c0_347 = arith.constant 0 : index
    %676 = vector.load %arg8[%c1_345, %c0_346, %c0_347] : memref<2x8x128xf32, #tpu.memory_space<vmem>>, vector<1x8x128xf32>
    %677 = vector.shape_cast %676 : vector<1x8x128xf32> to vector<8x128xf32>
    %678 = vector.shape_cast %675 : vector<8x128xf32> to vector<1x8x128xf32>
    tpu.vector_store %arg8[%c1_345, %c0_346, %c0_347], %678 {strides = array<i32>} : memref<2x8x128xf32, #tpu.memory_space<vmem>>, vector<1x8x128xf32>,
    %c0_348 = arith.constant 0 : index
    %c0_349 = arith.constant 0 : index
    %679 = vector.load %arg12[%c0_348, %c0_349] : memref<8x128xf32, #tpu.memory_space<vmem>>, vector<8x128xf32>
    %c1_350 = arith.constant 1 : index
    %c0_351 = arith.constant 0 : index
    %c0_352 = arith.constant 0 : index
    %680 = vector.load %arg9[%c1_350, %c0_351, %c0_352] : memref<2x8x128xf32, #tpu.memory_space<vmem>>, vector<1x8x128xf32>
    %681 = vector.shape_cast %680 : vector<1x8x128xf32> to vector<8x128xf32>
    %682 = vector.shape_cast %679 : vector<8x128xf32> to vector<1x8x128xf32>
    tpu.vector_store %arg9[%c1_350, %c0_351, %c0_352], %682 {strides = array<i32>} : memref<2x8x128xf32, #tpu.memory_space<vmem>>, vector<1x8x128xf32>,
    return
  }
  func.func @transform_0(%arg0: i32) -> (i32, i32, i32) {
    %c0_i32 = arith.constant 0 : i32
    %c0_i32_0 = arith.constant 0 : i32
    %c0_i32_1 = arith.constant 0 : i32
    %c0_i32_2 = arith.constant 0 : i32
    return %c0_i32, %c0_i32_0, %c0_i32_1 : i32, i32, i32
  }
  func.func @transform_1(%arg0: i32) -> (i32, i32, i32) {
    %c0_i32 = arith.constant 0 : i32
    %c0_i32_0 = arith.constant 0 : i32
    %c0_i32_1 = arith.constant 0 : i32
    %c0_i32_2 = arith.constant 0 : i32
    return %c0_i32, %c0_i32_0, %c0_i32_1 : i32, i32, i32
  }
  func.func @transform_2(%arg0: i32) -> (i32, i32, i32) {
    %c0_i32 = arith.constant 0 : i32
    %c0_i32_0 = arith.constant 0 : i32
    %c0_i32_1 = arith.constant 0 : i32
    %c0_i32_2 = arith.constant 0 : i32
    return %c0_i32, %c0_i32_0, %c0_i32_1 : i32, i32, i32
  }
  func.func @transform_3(%arg0: i32) -> (i32, i32, i32) {
    %c0_i32 = arith.constant 0 : i32
    %c0_i32_0 = arith.constant 0 : i32
    %c0_i32_1 = arith.constant 0 : i32
    %c0_i32_2 = arith.constant 0 : i32
    return %c0_i32, %c0_i32_0, %c0_i32_1 : i32, i32, i32
  }
  func.func @transform_4(%arg0: i32) -> (i32, i32, i32) {
    %c0_i32 = arith.constant 0 : i32
    %c0_i32_0 = arith.constant 0 : i32
    %c0_i32_1 = arith.constant 0 : i32
    %c0_i32_2 = arith.constant 0 : i32
    return %c0_i32, %c0_i32_0, %c0_i32_1 : i32, i32, i32
  }
  func.func @transform_5(%arg0: i32) -> (i32, i32, i32) {
    %c0_i32 = arith.constant 0 : i32
    %c0_i32_0 = arith.constant 0 : i32
    %c0_i32_1 = arith.constant 0 : i32
    %c0_i32_2 = arith.constant 0 : i32
    return %c0_i32, %c0_i32_0, %c0_i32_1 : i32, i32, i32
  }
  func.func @transform_6(%arg0: i32) -> (i32, i32, i32) {
    %c0_i32 = arith.constant 0 : i32
    %c0_i32_0 = arith.constant 0 : i32
    %c0_i32_1 = arith.constant 0 : i32
    %c0_i32_2 = arith.constant 0 : i32
    return %c0_i32, %c0_i32_0, %c0_i32_1 : i32, i32, i32
  }
  func.func @transform_7(%arg0: i32) -> (i32, i32, i32) {
    %c0_i32 = arith.constant 0 : i32
    %c0_i32_0 = arith.constant 0 : i32
    %c0_i32_1 = arith.constant 0 : i32
    %c0_i32_2 = arith.constant 0 : i32
    return %c0_i32, %c0_i32_0, %c0_i32_1 : i32, i32, i32
  }
  func.func @transform_8(%arg0: i32) -> (i32, i32, i32) {
    %c0_i32 = arith.constant 0 : i32
    %c0_i32_0 = arith.constant 0 : i32
    %c0_i32_1 = arith.constant 0 : i32
    %c0_i32_2 = arith.constant 0 : i32
    return %c0_i32, %c0_i32_0, %c0_i32_1 : i32, i32, i32
  }
}

</mosaic_0001>

<bundles_post_ra>
// kernel: _vrnn_lstm_apply.1
= control target key start
LH: loop header
LB: loop body
LE: loop exit
PB: predicated region body
PF: predicated region fallthrough
CT: control target
= control target key end

     0   :  { %14 = vsyncpa [#allocation6], 0  ;;  %s4969_s27 = smov [#allocation5]   ;;  %s6191_s0 = inlined_call_operand.vmem [shape: f32[8,8,512], index: 0, kind: input, shape index: {}]   ;;  %s6192_s1 = inlined_call_operand.vmem [shape: f32[1,128,512], index: 1, kind: input, shape index: {}]   ;;  %s6193_s2 = inlined_call_operand.hbm [shape: f32[2,128,512], index: 2, kind: input, shape index: {}]   ;;  %s6194_s3 = inlined_call_operand.vmem [shape: f32[1,1,512], index: 3, kind: input, shape index: {}]   ;;  %s6195_s4 = inlined_call_operand.vmem [shape: f32[2,8,128], index: 4, kind: input, shape index: {}]   ;;  %s6196_s5 = inlined_call_operand.vmem [shape: f32[2,8,128], index: 5, kind: input, shape index: {}]   ;;  %s6197_s6 = inlined_call_operand.vmem [shape: f32[8,8,128], index: 6, kind: output, shape index: {0}]   ;;  %s6198_s7 = inlined_call_operand.vmem [shape: f32[2,8,128], index: 7, kind: output, shape index: {1}]   ;;  %s6199_s8 = inlined_call_operand.vmem [shape: f32[2,8,128], index: 8, kind: output, shape index: {2}]  }
   0x1   :  { %s24_s28 = sshll.u32 %s4969_s27, 4  ;;  %s4945_s9 = scalar_lea.hbm %s6193_s2, 16384  ;;  %s25_s28 = int_to_ptr.vmem [resolvable:$true] %s24_s28 }
   0x2   :  { %p4946_p0 = scmp.ne.s32.totalorder %s6193_s2, %s4945_s9  ;;  %p4949_p1 = scmp.lt.u32.totalorder %s4945_s9, %s6193_s2 }
   0x4   :  { %p4951_p2 = pnand %p4949_p1, %p4946_p0 }
   0x6   :  { %4954 = shalt.err (!%p4951_p2)
}
   0x7   :  { %s4955_s14 = scalar_lea.vmem %s25_s28, 16384  ;;  %p4960_p4 = scmp.lt.s32.totalorder %s25_s28, %s25_s28 }
   0x8   :  { %p4956_p3 = scmp.ne.s32.totalorder %s25_s28, %s4955_s14  ;;  %p4961_p5 = scmp.lt.s32.totalorder %s4955_s14, %s4955_s14 }
   0xa   :  { %p4962_p6 = por %p4961_p5, %p4960_p4 }
   0xc   :  { %p4963_p7 = pnand %p4962_p6, %p4956_p3 }
   0xe   :  { %4966 = shalt.err (!%p4963_p7)
}
   0xf   :  { %s4970_s15 = smov 512   ;;  %s4971_s16 = smov 32  }
  0x10   :  { %30 = dma.hbm_to_vmem [thread:$0]  %s6193_s2, 16384, %s25_s28, [#allocation6], %s4970_s15, %s4970_s15, %s4971_s16  }
  0x11   :  { %4967 = dma.done.wait [#allocation6], 16384  }
  0x12   :  { %4968 = vsyncadd [#allocation6], 4294950912  ;;  %v4972_v0 = vmov 0.0   ;;  %v41_v1 = vld [vmem:[#allocation5 + $0x8] sm:$0xff]  ;;  %v40_v3 = vld [vmem:[#allocation5] sm:$0xff] }
  0x13   :  { %177 = vmatprep.mubr.f32.mxu0 %v4972_v0  ;;  %248 = vmatprep.mubr.f32.mxu1 %v4972_v0  ;;  %v45_v2 = vld [vmem:[#allocation5 + $0x28] sm:$0xff]  ;;  %v44_v5 = vld [vmem:[#allocation5 + $0x20] sm:$0xff]  ;;  %v43_v19 = vld [vmem:[#allocation5 + $0x18] sm:$0xff] }
  0x14   :  { %v5032_v4 = vpack.c.bf16 %v45_v2, %v41_v1  ;;  %v49_v6 = vld [vmem:[#allocation5 + $0x48] sm:$0xff]  ;;  %v5034_v8 = vpack.c.bf16 %v44_v5, %v40_v3  ;;  %v48_v10 = vld [vmem:[#allocation5 + $0x40] sm:$0xff]  ;;  %v47_v20 = vld [vmem:[#allocation5 + $0x38] sm:$0xff] }
  0x15   :  { %v53_v7 = vld [vmem:[#allocation5 + $0x68] sm:$0xff]  ;;  %v52_v11 = vld [vmem:[#allocation5 + $0x60] sm:$0xff]  ;;  %v5045_v22 = vpack.c.bf16 %v47_v20, %v43_v19  ;;  %v42_v23 = vld [vmem:[#allocation5 + $0x10] sm:$0xff] }
  0x16   :  { %v5036_v9 = vpack.c.bf16 %v53_v7, %v49_v6  ;;  %v57_v12 = vld [vmem:[#allocation5 + $0x88] sm:$0xff]  ;;  %3534 = vmatprep.subr.bf16.mxu0 %v5032_v4  ;;  %v5040_v14 = vpack.c.bf16 %v52_v11, %v48_v10  ;;  %v56_v15 = vld [vmem:[#allocation5 + $0x80] sm:$0xff]  ;;  %v46_v24 = vld [vmem:[#allocation5 + $0x30] sm:$0xff] }
  0x17   :  { %v61_v13 = vld [vmem:[#allocation5 + $0xa8] sm:$0xff]  ;;  %3536 = vmatpush1.bf16.msra.mxu0 %v5034_v8  ;;  %v60_v16 = vld [vmem:[#allocation5 + $0xa0] sm:$0xff]  ;;  %v5047_v25 = vpack.c.bf16 %v46_v24, %v42_v23  ;;  %3566 = vmatprep.subr.bf16.mxu1 %v5045_v22  ;;  %v51_v27 = vld [vmem:[#allocation5 + $0x58] sm:$0xff] }
  0x18   :  { %3538 = vmatprep.subr.bf16.mxu0 %v5036_v9  ;;  %v5043_v17 = vpack.c.bf16 %v61_v13, %v57_v12  ;;  %v65_v18 = vld [vmem:[#allocation5 + $0xc8] sm:$0xff]  ;;  %v5050_v26 = vpack.c.bf16 %v60_v16, %v56_v15  ;;  %v55_v28 = vld [vmem:[#allocation5 + $0x78] sm:$0xff]  ;;  %v50_v29 = vld [vmem:[#allocation5 + $0x50] sm:$0xff] }
  0x19   :  { %v69_v21 = vld [vmem:[#allocation5 + $0xe8] sm:$0xff]  ;;  %v64_v31 = vld [vmem:[#allocation5 + $0xc0] sm:$0xff]  ;;  %3568 = vmatpush1.bf16.msra.mxu1 %v5047_v25  ;;  %v5057_v33 = vpack.c.bf16 %v55_v28, %v51_v27  ;;  %v54_v34 = vld [vmem:[#allocation5 + $0x70] sm:$0xff] }
  0x1a   :  { %v5054_v30 = vpack.c.bf16 %v69_v21, %v65_v18  ;;  %v68_v32 = vld [vmem:[#allocation5 + $0xe0] sm:$0xff]  ;;  %v73_v35 = vld [vmem:[#allocation5 + $0x108] sm:$0xff]  ;;  %v5059_v37 = vpack.c.bf16 %v54_v34, %v50_v29  ;;  %v59_v38 = vld [vmem:[#allocation5 + $0x98] sm:$0xff] }
  0x1b   :  { %3540 = vmatpush1.bf16.msra.mxu0 %v5040_v14  ;;  %v77_v36 = vld [vmem:[#allocation5 + $0x128] sm:$0xff]  ;;  %3570 = vmatprep.subr.bf16.mxu1 %v5057_v33  ;;  %v63_v39 = vld [vmem:[#allocation5 + $0xb8] sm:$0xff]  ;;  %v58_v40 = vld [vmem:[#allocation5 + $0x90] sm:$0xff]  ;;  %v5063_v42 = vpack.c.bf16 %v68_v32, %v64_v31 }
  0x1c   :  { %3542 = vmatprep.subr.bf16.mxu0 %v5043_v17  ;;  %v62_v41 = vld [vmem:[#allocation5 + $0xb0] sm:$0xff]  ;;  %v72_v43 = vld [vmem:[#allocation5 + $0x100] sm:$0xff]  ;;  %v5065_v45 = vpack.c.bf16 %v63_v39, %v59_v38  ;;  %v5068_v46 = vpack.c.bf16 %v77_v36, %v73_v35  ;;  %v81_v47 = vld [vmem:[#allocation5 + $0x148] sm:$0xff] }
  0x1d   :  { %v76_v44 = vld [vmem:[#allocation5 + $0x120] sm:$0xff]  ;;  %3572 = vmatpush1.bf16.msra.mxu1 %v5059_v37  ;;  %v5071_v48 = vpack.c.bf16 %v62_v41, %v58_v40  ;;  %v67_v49 = vld [vmem:[#allocation5 + $0xd8] sm:$0xff]  ;;  %v85_v51 = vld [vmem:[#allocation5 + $0x168] sm:$0xff] }
  0x1e   :  { %v71_v50 = vld [vmem:[#allocation5 + $0xf8] sm:$0xff]  ;;  %3574 = vmatprep.subr.bf16.mxu1 %v5065_v45  ;;  %v66_v53 = vld [vmem:[#allocation5 + $0xd0] sm:$0xff]  ;;  %v5077_v55 = vpack.c.bf16 %v76_v44, %v72_v43  ;;  %v5080_v58 = vpack.c.bf16 %v85_v51, %v81_v47  ;;  %v80_v59 = vld [vmem:[#allocation5 + $0x140] sm:$0xff] }
  0x1f   :  { %3544 = vmatpush1.bf16.msra.mxu0 %v5050_v26  ;;  %v5074_v52 = vpack.c.bf16 %v71_v50, %v67_v49  ;;  %v70_v54 = vld [vmem:[#allocation5 + $0xf0] sm:$0xff]  ;;  %v75_v56 = vld [vmem:[#allocation5 + $0x118] sm:$0xff]  ;;  %v84_v60 = vld [vmem:[#allocation5 + $0x160] sm:$0xff] }
  0x20   :  { %3546 = vmatprep.subr.bf16.mxu0 %v5054_v30  ;;  %v79_v57 = vld [vmem:[#allocation5 + $0x138] sm:$0xff]  ;;  %v89_v61 = vld [vmem:[#allocation5 + $0x188] sm:$0xff]  ;;  %v5083_v62 = vpack.c.bf16 %v70_v54, %v66_v53  ;;  %v74_v2 = vld [vmem:[#allocation5 + $0x110] sm:$0xff]  ;;  %v5089_v7 = vpack.c.bf16 %v84_v60, %v80_v59 }
  0x21   :  { %3576 = vmatpush1.bf16.msra.mxu1 %v5071_v48  ;;  %v93_v63 = vld [vmem:[#allocation5 + $0x1a8] sm:$0xff]  ;;  %v5086_v1 = vpack.c.bf16 %v79_v57, %v75_v56  ;;  %v78_v3 = vld [vmem:[#allocation5 + $0x130] sm:$0xff]  ;;  %v83_v5 = vld [vmem:[#allocation5 + $0x158] sm:$0xff] }
  0x22   :  { %3578 = vmatprep.subr.bf16.mxu1 %v5074_v52  ;;  %v87_v6 = vld [vmem:[#allocation5 + $0x178] sm:$0xff]  ;;  %v5092_v10 = vpack.c.bf16 %v93_v63, %v89_v61  ;;  %v88_v11 = vld [vmem:[#allocation5 + $0x180] sm:$0xff]  ;;  %v97_v13 = vld [vmem:[#allocation5 + $0x1c8] sm:$0xff]  ;;  %v5095_v15 = vpack.c.bf16 %v78_v3, %v74_v2 }
  0x23   :  { %3548 = vmatpush1.bf16.msra.mxu0 %v5063_v42  ;;  %v92_v12 = vld [vmem:[#allocation5 + $0x1a0] sm:$0xff]  ;;  %v101_v16 = vld [vmem:[#allocation5 + $0x1e8] sm:$0xff]  ;;  %v5098_v18 = vpack.c.bf16 %v87_v6, %v83_v5  ;;  %v82_v19 = vld [vmem:[#allocation5 + $0x150] sm:$0xff] }
  0x24   :  { %3550 = vmatprep.subr.bf16.mxu0 %v5068_v46  ;;  %v86_v20 = vld [vmem:[#allocation5 + $0x170] sm:$0xff]  ;;  %v91_v21 = vld [vmem:[#allocation5 + $0x198] sm:$0xff]  ;;  %v5101_v24 = vpack.c.bf16 %v92_v12, %v88_v11  ;;  %v5104_v27 = vpack.c.bf16 %v101_v16, %v97_v13  ;;  %v96_v28 = vld [vmem:[#allocation5 + $0x1c0] sm:$0xff] }
  0x25   :  { %3580 = vmatpush1.bf16.msra.mxu1 %v5083_v62  ;;  %v95_v23 = vld [vmem:[#allocation5 + $0x1b8] sm:$0xff]  ;;  %v100_v29 = vld [vmem:[#allocation5 + $0x1e0] sm:$0xff]  ;;  %v5107_v31 = vpack.c.bf16 %v86_v20, %v82_v19  ;;  %v90_v34 = vld [vmem:[#allocation5 + $0x190] sm:$0xff] }
  0x26   :  { %3582 = vmatprep.subr.bf16.mxu1 %v5086_v1  ;;  %v5110_v32 = vpack.c.bf16 %v95_v23, %v91_v21  ;;  %v94_v35 = vld [vmem:[#allocation5 + $0x1b0] sm:$0xff]  ;;  %v99_v36 = vld [vmem:[#allocation5 + $0x1d8] sm:$0xff]  ;;  %v5113_v39 = vpack.c.bf16 %v100_v29, %v96_v28  ;;  %v104_v47 = vld [vmem:[%s6195_s4] sm:$0xff] }
  0x27   :  { %3552 = vmatpush1.bf16.msra.mxu0 %v5077_v55  ;;  %v103_v38 = vld [vmem:[#allocation5 + $0x1f8] sm:$0xff]  ;;  %v5117_v40 = vpack.c.bf16 %v94_v35, %v90_v34  ;;  %v98_v43 = vld [vmem:[#allocation5 + $0x1d0] sm:$0xff]  ;;  %v108_v50 = vld [vmem:[%s6191_s0] sm:$0xff] }
  0x28   :  { %3554 = vmatprep.subr.bf16.mxu0 %v5080_v58  ;;  %v5120_v41 = vpack.c.bf16 %v103_v38, %v99_v36  ;;  %v102_v44 = vld [vmem:[#allocation5 + $0x1f0] sm:$0xff]  ;;  %v109_v51 = vld [vmem:[%s6191_s0 + $0x8] sm:$0xff]  ;;  %v111_v61 = vld [vmem:[%s6191_s0 + $0x18] sm:$0xff] }
  0x29   :  { %3584 = vmatpush1.bf16.msra.mxu1 %v5095_v15  ;;  %v5127_v49 = vpack.c.bf16 %v102_v44, %v98_v43  ;;  %v110_v5 = vld [vmem:[%s6191_s0 + $0x10] sm:$0xff]  ;;  %v106_v23 = vld [vmem:[%s6196_s5] sm:$0xff] }
  0x2a   :  { %3586 = vmatprep.subr.bf16.mxu1 %v5098_v18 }
  0x2b   :  { %3556 = vmatpush1.bf16.msra.mxu0 %v5089_v7 }
  0x2c   :  { %3558 = vmatprep.subr.bf16.mxu0 %v5092_v10 }
  0x2d   :  { %3588 = vmatpush1.bf16.msra.mxu1 %v5107_v31 }
  0x2e   :  { %3590 = vmatprep.subr.bf16.mxu1 %v5110_v32 }
  0x2f   :  { %3560 = vmatpush1.bf16.msra.mxu0 %v5101_v24 }
  0x30   :  { %3562 = vmatprep.subr.bf16.mxu0 %v5104_v27 }
  0x31   :  { %3592 = vmatpush1.bf16.msra.mxu1 %v5117_v40 }
  0x32   :  { %3594 = vmatprep.subr.bf16.mxu1 %v5120_v41 }
  0x33   :  { %3564 = vmatpush1.bf16.msra.mxu0 %v5113_v39 }
  0x34   :  { %3598 = vmatprep.subr.bf16.mxu0 %v5032_v4 }
  0x35   :  { %3596 = vmatpush1.bf16.msra.mxu1 %v5127_v49 }
  0x36   :  { %178 = vmatmul.mubr.f32.vlgmr.msra.gmra.mrb[0].mxu0 %v104_v47  ;;  %3630 = vmatprep.subr.bf16.mxu1 %v5045_v22 }
  0x37   :  { %3600 = vmatpush1.bf16.msra.mxu0 %v5034_v8  ;;  %357 = vmatprep.mubr.f32.mxu0 %v4972_v0 }
  0x38   :  { %3602 = vmatprep.subr.bf16.mxu0 %v5036_v9  ;;  %249 = vmatmul.mubr.f32.vlgmr.msra.gmra.mrb[0].mxu1 %v104_v47 }
  0x39   :  { %3632 = vmatpush1.bf16.msra.mxu1 %v5047_v25  ;;  %428 = vmatprep.mubr.f32.mxu1 %v4972_v0 }
  0x3a   :  { %3634 = vmatprep.subr.bf16.mxu1 %v5057_v33 }
  0x3b   :  { %3604 = vmatpush1.bf16.msra.mxu0 %v5040_v14 }
  0x3c   :  { %3606 = vmatprep.subr.bf16.mxu0 %v5043_v17 }
  0x3d   :  { %3636 = vmatpush1.bf16.msra.mxu1 %v5059_v37 }
  0x3e   :  { %3638 = vmatprep.subr.bf16.mxu1 %v5065_v45 }
  0x3f   :  { %3608 = vmatpush1.bf16.msra.mxu0 %v5050_v26 }
  0x40   :  { %3610 = vmatprep.subr.bf16.mxu0 %v5054_v30 }
  0x41   :  { %3640 = vmatpush1.bf16.msra.mxu1 %v5071_v48 }
  0x42   :  { %3642 = vmatprep.subr.bf16.mxu1 %v5074_v52 }
  0x43   :  { %3612 = vmatpush1.bf16.msra.mxu0 %v5063_v42 }
  0x44   :  { %3614 = vmatprep.subr.bf16.mxu0 %v5068_v46 }
  0x45   :  { %3644 = vmatpush1.bf16.msra.mxu1 %v5083_v62 }
  0x46   :  { %3646 = vmatprep.subr.bf16.mxu1 %v5086_v1 }
  0x47   :  { %3616 = vmatpush1.bf16.msra.mxu0 %v5077_v55 }
  0x48   :  { %3618 = vmatprep.subr.bf16.mxu0 %v5080_v58 }
  0x49   :  { %3648 = vmatpush1.bf16.msra.mxu1 %v5095_v15 }
  0x4a   :  { %3650 = vmatprep.subr.bf16.mxu1 %v5098_v18 }
  0x4b   :  { %3620 = vmatpush1.bf16.msra.mxu0 %v5089_v7 }
  0x4c   :  { %3622 = vmatprep.subr.bf16.mxu0 %v5092_v10 }
  0x4d   :  { %3652 = vmatpush1.bf16.msra.mxu1 %v5107_v31 }
  0x4e   :  { %3654 = vmatprep.subr.bf16.mxu1 %v5110_v32 }
  0x4f   :  { %3624 = vmatpush1.bf16.msra.mxu0 %v5101_v24 }
  0x50   :  { %3626 = vmatprep.subr.bf16.mxu0 %v5104_v27 }
  0x51   :  { %3656 = vmatpush1.bf16.msra.mxu1 %v5117_v40 }
  0x52   :  { %3658 = vmatprep.subr.bf16.mxu1 %v5120_v41 }
  0x53   :  { %3628 = vmatpush1.bf16.msra.mxu0 %v5113_v39 }
  0x54   :  { %3662 = vmatprep.subr.bf16.mxu0 %v5032_v4 }
  0x55   :  { %3660 = vmatpush1.bf16.msra.mxu1 %v5127_v49 }
  0x56   :  { %3694 = vmatprep.subr.bf16.mxu1 %v5045_v22 }
 0x109   :  { %v179_v53 = vpop.f32.mrb[0].mxu0 }
 0x10a   :  { %v255_v54 = vadd.f32 %v179_v53, %v108_v50  ;;  %v181_v56 = vpop.f32.mrb[1].mxu0  ;;  %v3442_v50 = vld [vmem:[%s6191_s0 + $0x20] sm:$0xff] }
 0x10b   :  { %v256_v57 = vadd.f32 %v181_v56, %v109_v51  ;;  %v250_v63 = vpop.f32.mrb[0].mxu1  ;;  %v3443_v51 = vld [vmem:[%s6191_s0 + $0x28] sm:$0xff] }
 0x10c   :  { %v3439_v59 = vmul.f32 -1.442695, %v255_v54  ;;  %v252_v2 = vpop.f32.mrb[1].mxu1  ;;  %v257_v11 = vadd.f32 %v250_v63, %v110_v5  ;;  %v3444_v5 = vld [vmem:[%s6191_s0 + $0x30] sm:$0xff] }
 0x10d   :  { %v3440_v60 = vmul.f32 -1.442695, %v256_v57  ;;  %v258_v3 = vadd.f32 %v252_v2, %v111_v61  ;;  %v3445_v2 = vld [vmem:[%s6191_s0 + $0x38] sm:$0xff] }
 0x10e   :  { %4689 = vpow2.f32 %v3439_v59 }
 0x10f   :  { %4691 = vpow2.f32 %v3440_v60  ;;  %v3441_v6 = vmul.f32 -1.442695, %v258_v3 }
 0x111   :  { %4693 = vpow2.f32 %v3441_v6 }
 0x112   :  { %4695 = vtanh.f32 %v257_v11 }
 0x118   :  { %v4690_v12 = vpop.eup %4689 }
 0x119   :  { %v4692_v13 = vpop.eup %4691  ;;  %v262_v16 = vadd.f32 1.0, %v4690_v12 }
 0x11a   :  { %v268_v19 = vadd.f32 1.0, %v4692_v13 }
 0x11b   :  { %4697 = vrcp.f32 %v262_v16  ;;  %v4694_v20 = vpop.eup %4693 }
 0x11c   :  { %4699 = vrcp.f32 %v268_v19  ;;  %v4696_v21 = vpop.eup %4695  ;;  %v275_v29 = vadd.f32 1.0, %v4694_v20 }
 0x11e   :  { %4701 = vrcp.f32 %v275_v29 }
 0x125   :  { %v4698_v28 = vpop.eup %4697 }
 0x126   :  { %v4700_v34 = vpop.eup %4699  ;;  %v280_v35 = vmul.f32 %v4698_v28, %v4696_v21 }
 0x127   :  { %v279_v36 = vmul.f32 %v4700_v34, %v106_v23 }
 0x128   :  { %v4702_v43 = vpop.eup %4701 }
 0x129   :  { %v5182_v38 = vadd.f32 %v280_v35, %v279_v36 }
 0x12b   :  { %4703 = vtanh.f32 %v5182_v38 }
 0x135   :  { %v4704_v44 = vpop.eup %4703 }
 0x136   :  { %v283_v47 = vmul.f32 %v4704_v44, %v4702_v43 }
 0x138   :  { %286 = vst [vmem:[%s6197_s6] sm:$0xff] %v283_v47  ;;  %358 = vmatmul.mubr.f32.vlgmr.msra.gmra.mrb[2].mxu0 %v283_v47  ;;  %429 = vmatmul.mubr.f32.vlgmr.msra.gmra.mrb[2].mxu1 %v283_v47 }
 0x139   :  { %3664 = vmatpush1.bf16.msra.mxu0 %v5034_v8  ;;  %3696 = vmatpush1.bf16.msra.mxu1 %v5047_v25 }
 0x13a   :  { %3666 = vmatprep.subr.bf16.mxu0 %v5036_v9  ;;  %3698 = vmatprep.subr.bf16.mxu1 %v5057_v33 }
 0x13b   :  { %538 = vmatprep.mubr.f32.mxu0 %v4972_v0  ;;  %609 = vmatprep.mubr.f32.mxu1 %v4972_v0 }
 0x13d   :  { %3668 = vmatpush1.bf16.msra.mxu0 %v5040_v14  ;;  %3700 = vmatpush1.bf16.msra.mxu1 %v5059_v37 }
 0x13e   :  { %3670 = vmatprep.subr.bf16.mxu0 %v5043_v17  ;;  %3702 = vmatprep.subr.bf16.mxu1 %v5065_v45 }
 0x141   :  { %3672 = vmatpush1.bf16.msra.mxu0 %v5050_v26  ;;  %3704 = vmatpush1.bf16.msra.mxu1 %v5071_v48 }
 0x142   :  { %3674 = vmatprep.subr.bf16.mxu0 %v5054_v30  ;;  %3706 = vmatprep.subr.bf16.mxu1 %v5074_v52 }
 0x145   :  { %3676 = vmatpush1.bf16.msra.mxu0 %v5063_v42  ;;  %3708 = vmatpush1.bf16.msra.mxu1 %v5083_v62 }
 0x146   :  { %3678 = vmatprep.subr.bf16.mxu0 %v5068_v46  ;;  %3710 = vmatprep.subr.bf16.mxu1 %v5086_v1 }
 0x149   :  { %3680 = vmatpush1.bf16.msra.mxu0 %v5077_v55  ;;  %3712 = vmatpush1.bf16.msra.mxu1 %v5095_v15 }
 0x14a   :  { %3682 = vmatprep.subr.bf16.mxu0 %v5080_v58  ;;  %3714 = vmatprep.subr.bf16.mxu1 %v5098_v18 }
 0x14d   :  { %3684 = vmatpush1.bf16.msra.mxu0 %v5089_v7  ;;  %3716 = vmatpush1.bf16.msra.mxu1 %v5107_v31 }
 0x14e   :  { %3686 = vmatprep.subr.bf16.mxu0 %v5092_v10  ;;  %3718 = vmatprep.subr.bf16.mxu1 %v5110_v32 }
 0x151   :  { %3688 = vmatpush1.bf16.msra.mxu0 %v5101_v24  ;;  %3720 = vmatpush1.bf16.msra.mxu1 %v5117_v40 }
 0x152   :  { %3690 = vmatprep.subr.bf16.mxu0 %v5104_v27  ;;  %3722 = vmatprep.subr.bf16.mxu1 %v5120_v41 }
 0x155   :  { %3692 = vmatpush1.bf16.msra.mxu0 %v5113_v39  ;;  %3724 = vmatpush1.bf16.msra.mxu1 %v5127_v49 }
 0x156   :  { %3726 = vmatprep.subr.bf16.mxu0 %v5032_v4  ;;  %3758 = vmatprep.subr.bf16.mxu1 %v5045_v22 }
 0x20b   :  { %v359_v53 = vpop.f32.mrb[2].mxu0  ;;  %v430_v54 = vpop.f32.mrb[2].mxu1 }
 0x20c   :  { %v435_v56 = vadd.f32 %v3442_v50, %v359_v53  ;;  %v361_v57 = vpop.f32.mrb[3].mxu0  ;;  %v432_v59 = vpop.f32.mrb[3].mxu1  ;;  %v437_v11 = vadd.f32 %v3444_v5, %v430_v54  ;;  %v3451_v50 = vld [vmem:[%s6191_s0 + $0x48] sm:$0xff] }
 0x20d   :  { %v436_v60 = vadd.f32 %v3443_v51, %v361_v57  ;;  %v438_v3 = vadd.f32 %v3445_v2, %v432_v59 }
 0x20e   :  { %v3446_v61 = vmul.f32 -1.442695, %v435_v56 }
 0x20f   :  { %v3447_v63 = vmul.f32 -1.442695, %v436_v60  ;;  %v3448_v6 = vmul.f32 -1.442695, %v438_v3  ;;  %v3452_v3 = vld [vmem:[%s6191_s0 + $0x50] sm:$0xff] }
 0x210   :  { %4705 = vpow2.f32 %v3446_v61 }
 0x211   :  { %4707 = vpow2.f32 %v3447_v63  ;;  %v3453_v63 = vld [vmem:[%s6191_s0 + $0x58] sm:$0xff] }
 0x212   :  { %4709 = vpow2.f32 %v3448_v6 }
 0x213   :  { %4711 = vtanh.f32 %v437_v11 }
 0x21a   :  { %v4706_v12 = vpop.eup %4705 }
 0x21b   :  { %v4708_v13 = vpop.eup %4707  ;;  %v442_v16 = vadd.f32 1.0, %v4706_v12 }
 0x21c   :  { %v448_v19 = vadd.f32 1.0, %v4708_v13  ;;  %v4710_v20 = vpop.eup %4709 }
 0x21d   :  { %4713 = vrcp.f32 %v442_v16  ;;  %v4712_v21 = vpop.eup %4711  ;;  %v455_v34 = vadd.f32 1.0, %v4710_v20 }
 0x21e   :  { %4715 = vrcp.f32 %v448_v19 }
 0x21f   :  { %4717 = vrcp.f32 %v455_v34 }
 0x227   :  { %v4714_v23 = vpop.eup %4713 }
 0x228   :  { %v4716_v28 = vpop.eup %4715  ;;  %v460_v29 = vmul.f32 %v4714_v23, %v4712_v21 }
 0x229   :  { %v459_v35 = vmul.f32 %v4716_v28, %v5182_v38  ;;  %v4718_v43 = vpop.eup %4717  ;;  %v3450_v38 = vld [vmem:[%s6191_s0 + $0x40] sm:$0xff] }
 0x22b   :  { %v5235_v36 = vadd.f32 %v460_v29, %v459_v35 }
 0x22d   :  { %4719 = vtanh.f32 %v5235_v36 }
 0x237   :  { %v4720_v44 = vpop.eup %4719 }
 0x238   :  { %v5238_v47 = vmul.f32 %v4720_v44, %v4718_v43 }
 0x23a   :  { %539 = vmatmul.mubr.f32.vlgmr.msra.gmra.mrb[4].mxu0 %v5238_v47  ;;  %610 = vmatmul.mubr.f32.vlgmr.msra.gmra.mrb[4].mxu1 %v5238_v47 }
 0x23b   :  { %3728 = vmatpush1.bf16.msra.mxu0 %v5034_v8  ;;  %3760 = vmatpush1.bf16.msra.mxu1 %v5047_v25 }
 0x23c   :  { %3730 = vmatprep.subr.bf16.mxu0 %v5036_v9  ;;  %3762 = vmatprep.subr.bf16.mxu1 %v5057_v33 }
 0x23d   :  { %719 = vmatprep.mubr.f32.mxu0 %v4972_v0  ;;  %790 = vmatprep.mubr.f32.mxu1 %v4972_v0 }
 0x23f   :  { %3732 = vmatpush1.bf16.msra.mxu0 %v5040_v14  ;;  %3764 = vmatpush1.bf16.msra.mxu1 %v5059_v37 }
 0x240   :  { %3734 = vmatprep.subr.bf16.mxu0 %v5043_v17  ;;  %3766 = vmatprep.subr.bf16.mxu1 %v5065_v45 }
 0x243   :  { %3736 = vmatpush1.bf16.msra.mxu0 %v5050_v26  ;;  %3768 = vmatpush1.bf16.msra.mxu1 %v5071_v48 }
 0x244   :  { %3738 = vmatprep.subr.bf16.mxu0 %v5054_v30  ;;  %3770 = vmatprep.subr.bf16.mxu1 %v5074_v52 }
 0x247   :  { %3740 = vmatpush1.bf16.msra.mxu0 %v5063_v42  ;;  %3772 = vmatpush1.bf16.msra.mxu1 %v5083_v62 }
 0x248   :  { %3742 = vmatprep.subr.bf16.mxu0 %v5068_v46  ;;  %3774 = vmatprep.subr.bf16.mxu1 %v5086_v1 }
 0x24b   :  { %3744 = vmatpush1.bf16.msra.mxu0 %v5077_v55  ;;  %3776 = vmatpush1.bf16.msra.mxu1 %v5095_v15 }
 0x24c   :  { %3746 = vmatprep.subr.bf16.mxu0 %v5080_v58  ;;  %3778 = vmatprep.subr.bf16.mxu1 %v5098_v18 }
 0x24f   :  { %3748 = vmatpush1.bf16.msra.mxu0 %v5089_v7  ;;  %3780 = vmatpush1.bf16.msra.mxu1 %v5107_v31 }
 0x250   :  { %3750 = vmatprep.subr.bf16.mxu0 %v5092_v10  ;;  %3782 = vmatprep.subr.bf16.mxu1 %v5110_v32 }
 0x253   :  { %3752 = vmatpush1.bf16.msra.mxu0 %v5101_v24  ;;  %3784 = vmatpush1.bf16.msra.mxu1 %v5117_v40 }
 0x254   :  { %3754 = vmatprep.subr.bf16.mxu0 %v5104_v27  ;;  %3786 = vmatprep.subr.bf16.mxu1 %v5120_v41 }
 0x257   :  { %3756 = vmatpush1.bf16.msra.mxu0 %v5113_v39  ;;  %3788 = vmatpush1.bf16.msra.mxu1 %v5127_v49 }
 0x258   :  { %3790 = vmatprep.subr.bf16.mxu0 %v5032_v4  ;;  %3822 = vmatprep.subr.bf16.mxu1 %v5045_v22 }
 0x30d   :  { %v540_v51 = vpop.f32.mrb[4].mxu0  ;;  %v611_v53 = vpop.f32.mrb[4].mxu1 }
 0x30e   :  { %v616_v54 = vadd.f32 %v3450_v38, %v540_v51  ;;  %v542_v56 = vpop.f32.mrb[5].mxu0  ;;  %v613_v57 = vpop.f32.mrb[5].mxu1  ;;  %v618_v6 = vadd.f32 %v3452_v3, %v611_v53  ;;  %v3460_v3 = vld [vmem:[%s6191_s0 + $0x70] sm:$0xff] }
 0x30f   :  { %v617_v59 = vadd.f32 %v3451_v50, %v542_v56  ;;  %v619_v2 = vadd.f32 %v3453_v63, %v613_v57  ;;  %v3459_v50 = vld [vmem:[%s6191_s0 + $0x68] sm:$0xff]  ;;  %v3461_v63 = vld [vmem:[%s6191_s0 + $0x78] sm:$0xff] }
 0x310   :  { %v3454_v60 = vmul.f32 -1.442695, %v616_v54 }
 0x311   :  { %v3455_v61 = vmul.f32 -1.442695, %v617_v59  ;;  %v3456_v5 = vmul.f32 -1.442695, %v619_v2 }
 0x312   :  { %4721 = vpow2.f32 %v3454_v60 }
 0x313   :  { %4723 = vpow2.f32 %v3455_v61 }
 0x314   :  { %4725 = vpow2.f32 %v3456_v5 }
 0x315   :  { %4727 = vtanh.f32 %v618_v6 }
 0x31c   :  { %v4722_v11 = vpop.eup %4721 }
 0x31d   :  { %v4724_v12 = vpop.eup %4723  ;;  %v623_v13 = vadd.f32 1.0, %v4722_v11 }
 0x31e   :  { %v629_v16 = vadd.f32 1.0, %v4724_v12  ;;  %v4726_v19 = vpop.eup %4725 }
 0x31f   :  { %4729 = vrcp.f32 %v623_v13  ;;  %v4728_v20 = vpop.eup %4727  ;;  %v636_v29 = vadd.f32 1.0, %v4726_v19 }
 0x320   :  { %4731 = vrcp.f32 %v629_v16 }
 0x321   :  { %4733 = vrcp.f32 %v636_v29 }
 0x329   :  { %v4730_v21 = vpop.eup %4729 }
 0x32a   :  { %v4732_v23 = vpop.eup %4731  ;;  %v641_v28 = vmul.f32 %v4730_v21, %v4728_v20 }
 0x32b   :  { %v640_v34 = vmul.f32 %v4732_v23, %v5235_v36  ;;  %v4734_v43 = vpop.eup %4733  ;;  %v3458_v36 = vld [vmem:[%s6191_s0 + $0x60] sm:$0xff] }
 0x32d   :  { %v5289_v35 = vadd.f32 %v641_v28, %v640_v34 }
 0x32f   :  { %4735 = vtanh.f32 %v5289_v35 }
 0x339   :  { %v4736_v44 = vpop.eup %4735 }
 0x33a   :  { %v5292_v38 = vmul.f32 %v4736_v44, %v4734_v43 }
 0x33c   :  { %720 = vmatmul.mubr.f32.vlgmr.msra.gmra.mrb[6].mxu0 %v5292_v38  ;;  %791 = vmatmul.mubr.f32.vlgmr.msra.gmra.mrb[6].mxu1 %v5292_v38 }
 0x33d   :  { %3792 = vmatpush1.bf16.msra.mxu0 %v5034_v8  ;;  %3824 = vmatpush1.bf16.msra.mxu1 %v5047_v25 }
 0x33e   :  { %3794 = vmatprep.subr.bf16.mxu0 %v5036_v9  ;;  %3826 = vmatprep.subr.bf16.mxu1 %v5057_v33 }
 0x33f   :  { %900 = vmatprep.mubr.f32.mxu0 %v4972_v0  ;;  %971 = vmatprep.mubr.f32.mxu1 %v4972_v0 }
 0x341   :  { %3796 = vmatpush1.bf16.msra.mxu0 %v5040_v14  ;;  %3828 = vmatpush1.bf16.msra.mxu1 %v5059_v37 }
 0x342   :  { %3798 = vmatprep.subr.bf16.mxu0 %v5043_v17  ;;  %3830 = vmatprep.subr.bf16.mxu1 %v5065_v45 }
 0x345   :  { %3800 = vmatpush1.bf16.msra.mxu0 %v5050_v26  ;;  %3832 = vmatpush1.bf16.msra.mxu1 %v5071_v48 }
 0x346   :  { %3802 = vmatprep.subr.bf16.mxu0 %v5054_v30  ;;  %3834 = vmatprep.subr.bf16.mxu1 %v5074_v52 }
 0x349   :  { %3804 = vmatpush1.bf16.msra.mxu0 %v5063_v42  ;;  %3836 = vmatpush1.bf16.msra.mxu1 %v5083_v62 }
 0x34a   :  { %3806 = vmatprep.subr.bf16.mxu0 %v5068_v46  ;;  %3838 = vmatprep.subr.bf16.mxu1 %v5086_v1 }
 0x34d   :  { %3808 = vmatpush1.bf16.msra.mxu0 %v5077_v55  ;;  %3840 = vmatpush1.bf16.msra.mxu1 %v5095_v15 }
 0x34e   :  { %3810 = vmatprep.subr.bf16.mxu0 %v5080_v58  ;;  %3842 = vmatprep.subr.bf16.mxu1 %v5098_v18 }
 0x351   :  { %3812 = vmatpush1.bf16.msra.mxu0 %v5089_v7  ;;  %3844 = vmatpush1.bf16.msra.mxu1 %v5107_v31 }
 0x352   :  { %3814 = vmatprep.subr.bf16.mxu0 %v5092_v10  ;;  %3846 = vmatprep.subr.bf16.mxu1 %v5110_v32 }
 0x355   :  { %3816 = vmatpush1.bf16.msra.mxu0 %v5101_v24  ;;  %3848 = vmatpush1.bf16.msra.mxu1 %v5117_v40 }
 0x356   :  { %3818 = vmatprep.subr.bf16.mxu0 %v5104_v27  ;;  %3850 = vmatprep.subr.bf16.mxu1 %v5120_v41 }
 0x359   :  { %3820 = vmatpush1.bf16.msra.mxu0 %v5113_v39  ;;  %3852 = vmatpush1.bf16.msra.mxu1 %v5127_v49 }
 0x35a   :  { %3854 = vmatprep.subr.bf16.mxu0 %v5032_v4  ;;  %3886 = vmatprep.subr.bf16.mxu1 %v5045_v22 }
 0x40f   :  { %v721_v51 = vpop.f32.mrb[6].mxu0  ;;  %v792_v53 = vpop.f32.mrb[6].mxu1 }
 0x410   :  { %v797_v54 = vadd.f32 %v3458_v36, %v721_v51  ;;  %v723_v56 = vpop.f32.mrb[7].mxu0  ;;  %v794_v57 = vpop.f32.mrb[7].mxu1  ;;  %v799_v6 = vadd.f32 %v3460_v3, %v792_v53  ;;  %v3467_v51 = vld [vmem:[%s6191_s0 + $0x88] sm:$0xff] }
 0x411   :  { %v798_v59 = vadd.f32 %v3459_v50, %v723_v56  ;;  %v800_v2 = vadd.f32 %v3461_v63, %v794_v57 }
 0x412   :  { %v3462_v60 = vmul.f32 -1.442695, %v797_v54 }
 0x413   :  { %v3463_v61 = vmul.f32 -1.442695, %v798_v59  ;;  %v3464_v5 = vmul.f32 -1.442695, %v800_v2  ;;  %v3469_v2 = vld [vmem:[%s6191_s0 + $0x98] sm:$0xff] }
 0x414   :  { %4737 = vpow2.f32 %v3462_v60 }
 0x415   :  { %4739 = vpow2.f32 %v3463_v61 }
 0x416   :  { %4741 = vpow2.f32 %v3464_v5  ;;  %v3468_v5 = vld [vmem:[%s6191_s0 + $0x90] sm:$0xff] }
 0x417   :  { %4743 = vtanh.f32 %v799_v6 }
 0x41e   :  { %v4738_v11 = vpop.eup %4737 }
 0x41f   :  { %v4740_v12 = vpop.eup %4739  ;;  %v804_v13 = vadd.f32 1.0, %v4738_v11 }
 0x420   :  { %v810_v16 = vadd.f32 1.0, %v4740_v12  ;;  %v4742_v19 = vpop.eup %4741 }
 0x421   :  { %4745 = vrcp.f32 %v804_v13  ;;  %v4744_v20 = vpop.eup %4743  ;;  %v817_v29 = vadd.f32 1.0, %v4742_v19 }
 0x422   :  { %4747 = vrcp.f32 %v810_v16 }
 0x423   :  { %4749 = vrcp.f32 %v817_v29 }
 0x42b   :  { %v4746_v21 = vpop.eup %4745 }
 0x42c   :  { %v4748_v23 = vpop.eup %4747  ;;  %v822_v28 = vmul.f32 %v4746_v21, %v4744_v20 }
 0x42d   :  { %v821_v34 = vmul.f32 %v4748_v23, %v5289_v35  ;;  %v4750_v44 = vpop.eup %4749  ;;  %v3466_v35 = vld [vmem:[%s6191_s0 + $0x80] sm:$0xff] }
 0x42f   :  { %v5343_v43 = vadd.f32 %v822_v28, %v821_v34 }
 0x431   :  { %4751 = vtanh.f32 %v5343_v43 }
 0x43b   :  { %v4752_v36 = vpop.eup %4751 }
 0x43c   :  { %v5346_v50 = vmul.f32 %v4752_v36, %v4750_v44 }
 0x43e   :  { %901 = vmatmul.mubr.f32.vlgmr.msra.gmra.mrb[8].mxu0 %v5346_v50  ;;  %972 = vmatmul.mubr.f32.vlgmr.msra.gmra.mrb[8].mxu1 %v5346_v50 }
 0x43f   :  { %3856 = vmatpush1.bf16.msra.mxu0 %v5034_v8  ;;  %3888 = vmatpush1.bf16.msra.mxu1 %v5047_v25 }
 0x440   :  { %3858 = vmatprep.subr.bf16.mxu0 %v5036_v9  ;;  %3890 = vmatprep.subr.bf16.mxu1 %v5057_v33 }
 0x441   :  { %1081 = vmatprep.mubr.f32.mxu0 %v4972_v0  ;;  %1152 = vmatprep.mubr.f32.mxu1 %v4972_v0 }
 0x443   :  { %3860 = vmatpush1.bf16.msra.mxu0 %v5040_v14  ;;  %3892 = vmatpush1.bf16.msra.mxu1 %v5059_v37 }
 0x444   :  { %3862 = vmatprep.subr.bf16.mxu0 %v5043_v17  ;;  %3894 = vmatprep.subr.bf16.mxu1 %v5065_v45 }
 0x447   :  { %3864 = vmatpush1.bf16.msra.mxu0 %v5050_v26  ;;  %3896 = vmatpush1.bf16.msra.mxu1 %v5071_v48 }
 0x448   :  { %3866 = vmatprep.subr.bf16.mxu0 %v5054_v30  ;;  %3898 = vmatprep.subr.bf16.mxu1 %v5074_v52 }
 0x44b   :  { %3868 = vmatpush1.bf16.msra.mxu0 %v5063_v42  ;;  %3900 = vmatpush1.bf16.msra.mxu1 %v5083_v62 }
 0x44c   :  { %3870 = vmatprep.subr.bf16.mxu0 %v5068_v46  ;;  %3902 = vmatprep.subr.bf16.mxu1 %v5086_v1 }
 0x44f   :  { %3872 = vmatpush1.bf16.msra.mxu0 %v5077_v55  ;;  %3904 = vmatpush1.bf16.msra.mxu1 %v5095_v15 }
 0x450   :  { %3874 = vmatprep.subr.bf16.mxu0 %v5080_v58  ;;  %3906 = vmatprep.subr.bf16.mxu1 %v5098_v18 }
 0x453   :  { %3876 = vmatpush1.bf16.msra.mxu0 %v5089_v7  ;;  %3908 = vmatpush1.bf16.msra.mxu1 %v5107_v31 }
 0x454   :  { %3878 = vmatprep.subr.bf16.mxu0 %v5092_v10  ;;  %3910 = vmatprep.subr.bf16.mxu1 %v5110_v32 }
 0x457   :  { %3880 = vmatpush1.bf16.msra.mxu0 %v5101_v24  ;;  %3912 = vmatpush1.bf16.msra.mxu1 %v5117_v40 }
 0x458   :  { %3882 = vmatprep.subr.bf16.mxu0 %v5104_v27  ;;  %3914 = vmatprep.subr.bf16.mxu1 %v5120_v41 }
 0x45b   :  { %3884 = vmatpush1.bf16.msra.mxu0 %v5113_v39  ;;  %3916 = vmatpush1.bf16.msra.mxu1 %v5127_v49 }
 0x45c   :  { %3918 = vmatprep.subr.bf16.mxu0 %v5032_v4  ;;  %3950 = vmatprep.subr.bf16.mxu1 %v5045_v22 }
 0x511   :  { %v902_v53 = vpop.f32.mrb[8].mxu0  ;;  %v973_v54 = vpop.f32.mrb[8].mxu1 }
 0x512   :  { %v978_v56 = vadd.f32 %v3466_v35, %v902_v53  ;;  %v904_v57 = vpop.f32.mrb[9].mxu0  ;;  %v975_v59 = vpop.f32.mrb[9].mxu1  ;;  %v980_v11 = vadd.f32 %v3468_v5, %v973_v54  ;;  %v3475_v54 = vld [vmem:[%s6191_s0 + $0xa8] sm:$0xff]  ;;  %v3476_v5 = vld [vmem:[%s6191_s0 + $0xb0] sm:$0xff] }
 0x513   :  { %v979_v60 = vadd.f32 %v3467_v51, %v904_v57  ;;  %v981_v3 = vadd.f32 %v3469_v2, %v975_v59 }
 0x514   :  { %v3470_v61 = vmul.f32 -1.442695, %v978_v56 }
 0x515   :  { %v3471_v63 = vmul.f32 -1.442695, %v979_v60  ;;  %v3472_v6 = vmul.f32 -1.442695, %v981_v3 }
 0x516   :  { %4753 = vpow2.f32 %v3470_v61 }
 0x517   :  { %4755 = vpow2.f32 %v3471_v63 }
 0x518   :  { %4757 = vpow2.f32 %v3472_v6 }
 0x519   :  { %4759 = vtanh.f32 %v980_v11 }
 0x520   :  { %v4754_v12 = vpop.eup %4753 }
 0x521   :  { %v4756_v13 = vpop.eup %4755  ;;  %v985_v16 = vadd.f32 1.0, %v4754_v12 }
 0x522   :  { %v991_v19 = vadd.f32 1.0, %v4756_v13  ;;  %v4758_v20 = vpop.eup %4757 }
 0x523   :  { %4761 = vrcp.f32 %v985_v16  ;;  %v4760_v21 = vpop.eup %4759  ;;  %v998_v34 = vadd.f32 1.0, %v4758_v20 }
 0x524   :  { %4763 = vrcp.f32 %v991_v19 }
 0x525   :  { %4765 = vrcp.f32 %v998_v34 }
 0x52d   :  { %v4762_v23 = vpop.eup %4761 }
 0x52e   :  { %v4764_v28 = vpop.eup %4763  ;;  %v1003_v29 = vmul.f32 %v4762_v23, %v4760_v21 }
 0x52f   :  { %v1002_v44 = vmul.f32 %v4764_v28, %v5343_v43  ;;  %v4766_v35 = vpop.eup %4765  ;;  %v3474_v43 = vld [vmem:[%s6191_s0 + $0xa0] sm:$0xff] }
 0x531   :  { %v5397_v36 = vadd.f32 %v1003_v29, %v1002_v44 }
 0x533   :  { %4767 = vtanh.f32 %v5397_v36 }
 0x53d   :  { %v4768_v51 = vpop.eup %4767 }
 0x53e   :  { %v5400_v53 = vmul.f32 %v4768_v51, %v4766_v35 }
 0x540   :  { %1082 = vmatmul.mubr.f32.vlgmr.msra.gmra.mrb[10].mxu0 %v5400_v53  ;;  %1153 = vmatmul.mubr.f32.vlgmr.msra.gmra.mrb[10].mxu1 %v5400_v53 }
 0x541   :  { %3920 = vmatpush1.bf16.msra.mxu0 %v5034_v8  ;;  %3952 = vmatpush1.bf16.msra.mxu1 %v5047_v25 }
 0x542   :  { %3922 = vmatprep.subr.bf16.mxu0 %v5036_v9  ;;  %3954 = vmatprep.subr.bf16.mxu1 %v5057_v33 }
 0x543   :  { %1262 = vmatprep.mubr.f32.mxu0 %v4972_v0  ;;  %1333 = vmatprep.mubr.f32.mxu1 %v4972_v0 }
 0x545   :  { %3924 = vmatpush1.bf16.msra.mxu0 %v5040_v14  ;;  %3956 = vmatpush1.bf16.msra.mxu1 %v5059_v37 }
 0x546   :  { %3926 = vmatprep.subr.bf16.mxu0 %v5043_v17  ;;  %3958 = vmatprep.subr.bf16.mxu1 %v5065_v45 }
 0x549   :  { %3928 = vmatpush1.bf16.msra.mxu0 %v5050_v26  ;;  %3960 = vmatpush1.bf16.msra.mxu1 %v5071_v48 }
 0x54a   :  { %3930 = vmatprep.subr.bf16.mxu0 %v5054_v30  ;;  %3962 = vmatprep.subr.bf16.mxu1 %v5074_v52 }
 0x54d   :  { %3932 = vmatpush1.bf16.msra.mxu0 %v5063_v42  ;;  %3964 = vmatpush1.bf16.msra.mxu1 %v5083_v62 }
 0x54e   :  { %3934 = vmatprep.subr.bf16.mxu0 %v5068_v46  ;;  %3966 = vmatprep.subr.bf16.mxu1 %v5086_v1 }
 0x551   :  { %3936 = vmatpush1.bf16.msra.mxu0 %v5077_v55  ;;  %3968 = vmatpush1.bf16.msra.mxu1 %v5095_v15 }
 0x552   :  { %3938 = vmatprep.subr.bf16.mxu0 %v5080_v58  ;;  %3970 = vmatprep.subr.bf16.mxu1 %v5098_v18 }
 0x555   :  { %3940 = vmatpush1.bf16.msra.mxu0 %v5089_v7  ;;  %3972 = vmatpush1.bf16.msra.mxu1 %v5107_v31 }
 0x556   :  { %3942 = vmatprep.subr.bf16.mxu0 %v5092_v10  ;;  %3974 = vmatprep.subr.bf16.mxu1 %v5110_v32 }
 0x559   :  { %3944 = vmatpush1.bf16.msra.mxu0 %v5101_v24  ;;  %3976 = vmatpush1.bf16.msra.mxu1 %v5117_v40 }
 0x55a   :  { %3946 = vmatprep.subr.bf16.mxu0 %v5104_v27  ;;  %3978 = vmatprep.subr.bf16.mxu1 %v5120_v41 }
 0x55d   :  { %3948 = vmatpush1.bf16.msra.mxu0 %v5113_v39  ;;  %3980 = vmatpush1.bf16.msra.mxu1 %v5127_v49 }
 0x55e   :  { %3982 = vmatprep.subr.bf16.mxu0 %v5032_v4  ;;  %4014 = vmatprep.subr.bf16.mxu1 %v5045_v22  ;;  %v3477_v4 = vld [vmem:[%s6191_s0 + $0xb8] sm:$0xff] }
 0x613   :  { %v1083_v56 = vpop.f32.mrb[10].mxu0  ;;  %v1154_v57 = vpop.f32.mrb[10].mxu1 }
 0x614   :  { %v1159_v59 = vadd.f32 %v3474_v43, %v1083_v56  ;;  %v1085_v60 = vpop.f32.mrb[11].mxu0  ;;  %v1156_v61 = vpop.f32.mrb[11].mxu1  ;;  %v1161_v11 = vadd.f32 %v3476_v5, %v1154_v57 }
 0x615   :  { %v1160_v63 = vadd.f32 %v3475_v54, %v1085_v60  ;;  %v1162_v22 = vadd.f32 %v3477_v4, %v1156_v61  ;;  %v1570_v60 = vld [vmem:[%s6192_s1 + $0x20] sm:$0xff]  ;;  %v1568_v61 = vld [vmem:[%s6192_s1 + $0x10] sm:$0xff]  ;;  %v1577_v4 = vld [vmem:[%s6192_s1 + $0x58] sm:$0xff] }
 0x616   :  { %v3478_v2 = vmul.f32 -1.442695, %v1159_v59  ;;  %v1566_v59 = vld [vmem:[%s6192_s1] sm:$0xff] }
 0x617   :  { %v3479_v3 = vmul.f32 -1.442695, %v1160_v63  ;;  %v3480_v6 = vmul.f32 -1.442695, %v1162_v22  ;;  %v1572_v63 = vld [vmem:[%s6192_s1 + $0x30] sm:$0xff]  ;;  %v1581_v22 = vld [vmem:[%s6192_s1 + $0x78] sm:$0xff] }
 0x618   :  { %4769 = vpow2.f32 %v3478_v2  ;;  %v1575_v2 = vld [vmem:[%s6192_s1 + $0x48] sm:$0xff] }
 0x619   :  { %4771 = vpow2.f32 %v3479_v3  ;;  %v1579_v3 = vld [vmem:[%s6192_s1 + $0x68] sm:$0xff] }
 0x61a   :  { %4773 = vpow2.f32 %v3480_v6 }
 0x61b   :  { %4775 = vtanh.f32 %v1161_v11  ;;  %v4047_v11 = vpack.c.bf16 %v1570_v60, %v1566_v59  ;;  %v1609_v59 = vld [vmem:[%s6192_s1 + $0x158] sm:$0xff] }
 0x61c   :  { %v1613_v60 = vld [vmem:[%s6192_s1 + $0x178] sm:$0xff] }
 0x622   :  { %v4770_v12 = vpop.eup %4769 }
 0x623   :  { %v4772_v13 = vpop.eup %4771  ;;  %v1166_v16 = vadd.f32 1.0, %v4770_v12  ;;  %v4079_v12 = vpack.c.bf16 %v1572_v63, %v1568_v61 }
 0x624   :  { %v1172_v19 = vadd.f32 1.0, %v4772_v13  ;;  %v4774_v20 = vpop.eup %4773  ;;  %v1574_v13 = vld [vmem:[%s6192_s1 + $0x40] sm:$0xff] }
 0x625   :  { %4777 = vrcp.f32 %v1166_v16  ;;  %v4776_v21 = vpop.eup %4775  ;;  %v1179_v34 = vadd.f32 1.0, %v4774_v20  ;;  %v1578_v16 = vld [vmem:[%s6192_s1 + $0x60] sm:$0xff]  ;;  %v4049_v20 = vpack.c.bf16 %v1579_v3, %v1575_v2 }
 0x626   :  { %4779 = vrcp.f32 %v1172_v19  ;;  %v1606_v2 = vld [vmem:[%s6192_s1 + $0x140] sm:$0xff] }
 0x627   :  { %4781 = vrcp.f32 %v1179_v34  ;;  %v1587_v34 = vld [vmem:[%s6192_s1 + $0xa8] sm:$0xff]  ;;  %v1610_v3 = vld [vmem:[%s6192_s1 + $0x160] sm:$0xff] }
 0x62f   :  { %v4778_v23 = vpop.eup %4777 }
 0x630   :  { %v4780_v28 = vpop.eup %4779  ;;  %v1184_v29 = vmul.f32 %v4778_v23, %v4776_v21  ;;  %v4081_v21 = vpack.c.bf16 %v1581_v22, %v1577_v4  ;;  %v1576_v23 = vld [vmem:[%s6192_s1 + $0x50] sm:$0xff]  ;;  %v4097_v22 = vpack.c.bf16 %v1613_v60, %v1609_v59  ;;  %v1932_v59 = vld [vmem:[#allocation5 + $0x2a8] sm:$0xff]  ;;  %v1930_v60 = vld [vmem:[#allocation5 + $0x298] sm:$0xff] }
 0x631   :  { %v1183_v44 = vmul.f32 %v4780_v28, %v5397_v36  ;;  %v4782_v51 = vpop.eup %4781  ;;  %v1580_v28 = vld [vmem:[%s6192_s1 + $0x70] sm:$0xff] }
 0x633   :  { %v5451_v35 = vadd.f32 %v1184_v29, %v1183_v44  ;;  %v1583_v29 = vld [vmem:[%s6192_s1 + $0x88] sm:$0xff]  ;;  %v1585_v44 = vld [vmem:[%s6192_s1 + $0x98] sm:$0xff] }
 0x635   :  { %4783 = vtanh.f32 %v5451_v35 }
 0x63f   :  { %v4784_v43 = vpop.eup %4783 }
 0x640   :  { %v5454_v54 = vmul.f32 %v4784_v43, %v4782_v51  ;;  %v4051_v51 = vpack.c.bf16 %v1578_v16, %v1574_v13  ;;  %v4083_v43 = vpack.c.bf16 %v1580_v28, %v1576_v23  ;;  %v1617_v13 = vld [vmem:[%s6192_s1 + $0x198] sm:$0xff]  ;;  %v1614_v23 = vld [vmem:[%s6192_s1 + $0x180] sm:$0xff] }
 0x641   :  { %v1621_v16 = vld [vmem:[%s6192_s1 + $0x1b8] sm:$0xff]  ;;  %v1618_v28 = vld [vmem:[%s6192_s1 + $0x1a0] sm:$0xff] }
 0x642   :  { %1263 = vmatmul.mubr.f32.vlgmr.msra.gmra.mrb[12].mxu0 %v5454_v54  ;;  %1334 = vmatmul.mubr.f32.vlgmr.msra.gmra.mrb[12].mxu1 %v5454_v54 }
 0x643   :  { %3984 = vmatpush1.bf16.msra.mxu0 %v5034_v8  ;;  %4016 = vmatpush1.bf16.msra.mxu1 %v5047_v25  ;;  %v1567_v8 = vld [vmem:[%s6192_s1 + $0x8] sm:$0xff]  ;;  %v1573_v25 = vld [vmem:[%s6192_s1 + $0x38] sm:$0xff] }
 0x644   :  { %3986 = vmatprep.subr.bf16.mxu0 %v5036_v9  ;;  %4018 = vmatprep.subr.bf16.mxu1 %v5057_v33  ;;  %v1571_v9 = vld [vmem:[%s6192_s1 + $0x28] sm:$0xff] }
 0x645   :  { %1443 = vmatprep.mubr.f32.mxu0 %v4972_v0  ;;  %1514 = vmatprep.mubr.f32.mxu1 %v4972_v0  ;;  %v3483_v33 = vld [vmem:[%s6191_s0 + $0xc8] sm:$0xff] }
 0x647   :  { %3988 = vmatpush1.bf16.msra.mxu0 %v5040_v14  ;;  %4020 = vmatpush1.bf16.msra.mxu1 %v5059_v37  ;;  %v1569_v14 = vld [vmem:[%s6192_s1 + $0x18] sm:$0xff] }
 0x648   :  { %3990 = vmatprep.subr.bf16.mxu0 %v5043_v17  ;;  %4022 = vmatprep.subr.bf16.mxu1 %v5065_v45  ;;  %v4045_v17 = vpack.c.bf16 %v1571_v9, %v1567_v8  ;;  %v1582_v8 = vld [vmem:[%s6192_s1 + $0x80] sm:$0xff] }
 0x649   :  { %v1586_v9 = vld [vmem:[%s6192_s1 + $0xa0] sm:$0xff] }
 0x64b   :  { %3992 = vmatpush1.bf16.msra.mxu0 %v5050_v26  ;;  %4024 = vmatpush1.bf16.msra.mxu1 %v5071_v48  ;;  %v4077_v26 = vpack.c.bf16 %v1573_v25, %v1569_v14  ;;  %v4053_v14 = vpack.c.bf16 %v1587_v34, %v1583_v29  ;;  %v1584_v25 = vld [vmem:[%s6192_s1 + $0x90] sm:$0xff]  ;;  %v4101_v34 = vpack.c.bf16 %v1621_v16, %v1617_v13  ;;  %v1940_v13 = vld [vmem:[#allocation5 + $0x2e8] sm:$0xff]  ;;  %v1938_v16 = vld [vmem:[#allocation5 + $0x2d8] sm:$0xff] }
 0x64c   :  { %3994 = vmatprep.subr.bf16.mxu0 %v5054_v30  ;;  %4026 = vmatprep.subr.bf16.mxu1 %v5074_v52  ;;  %v3482_v30 = vld [vmem:[%s6191_s0 + $0xc0] sm:$0xff] }
 0x64f   :  { %3996 = vmatpush1.bf16.msra.mxu0 %v5063_v42  ;;  %4028 = vmatpush1.bf16.msra.mxu1 %v5083_v62  ;;  %v3485_v62 = vld [vmem:[%s6191_s0 + $0xd8] sm:$0xff] }
 0x650   :  { %3998 = vmatprep.subr.bf16.mxu0 %v5068_v46  ;;  %4030 = vmatprep.subr.bf16.mxu1 %v5086_v1 }
 0x653   :  { %4000 = vmatpush1.bf16.msra.mxu0 %v5077_v55  ;;  %4032 = vmatpush1.bf16.msra.mxu1 %v5095_v15 }
 0x654   :  { %4002 = vmatprep.subr.bf16.mxu0 %v5080_v58  ;;  %4034 = vmatprep.subr.bf16.mxu1 %v5098_v18 }
 0x657   :  { %4004 = vmatpush1.bf16.msra.mxu0 %v5089_v7  ;;  %4036 = vmatpush1.bf16.msra.mxu1 %v5107_v31  ;;  %v3484_v7 = vld [vmem:[%s6191_s0 + $0xd0] sm:$0xff] }
 0x658   :  { %4006 = vmatprep.subr.bf16.mxu0 %v5092_v10  ;;  %4038 = vmatprep.subr.bf16.mxu1 %v5110_v32 }
 0x65b   :  { %4008 = vmatpush1.bf16.msra.mxu0 %v5101_v24  ;;  %4040 = vmatpush1.bf16.msra.mxu1 %v5117_v40 }
 0x65c   :  { %4010 = vmatprep.subr.bf16.mxu0 %v5104_v27  ;;  %4042 = vmatprep.subr.bf16.mxu1 %v5120_v41 }
 0x65f   :  { %4012 = vmatpush1.bf16.msra.mxu0 %v5113_v39  ;;  %4044 = vmatpush1.bf16.msra.mxu1 %v5127_v49 }
 0x660   :  { %4046 = vmatprep.subr.bf16.mxu0 %v4045_v17  ;;  %4078 = vmatprep.subr.bf16.mxu1 %v4077_v26  ;;  %v1588_v26 = vld [vmem:[%s6192_s1 + $0xb0] sm:$0xff] }
 0x715   :  { %v1264_v37 = vpop.f32.mrb[12].mxu0  ;;  %v1335_v42 = vpop.f32.mrb[12].mxu1 }
 0x716   :  { %v1340_v45 = vadd.f32 %v3482_v30, %v1264_v37  ;;  %v1266_v46 = vpop.f32.mrb[13].mxu0  ;;  %v1337_v48 = vpop.f32.mrb[13].mxu1  ;;  %v1342_v15 = vadd.f32 %v3484_v7, %v1335_v42  ;;  %v1591_v30 = vld [vmem:[%s6192_s1 + $0xc8] sm:$0xff]  ;;  %v1593_v37 = vld [vmem:[%s6192_s1 + $0xd8] sm:$0xff] }
 0x717   :  { %v1341_v52 = vadd.f32 %v3483_v33, %v1266_v46  ;;  %v1343_v1 = vadd.f32 %v3485_v62, %v1337_v48  ;;  %v1595_v33 = vld [vmem:[%s6192_s1 + $0xe8] sm:$0xff]  ;;  %v1597_v42 = vld [vmem:[%s6192_s1 + $0xf8] sm:$0xff]  ;;  %v4087_v46 = vpack.c.bf16 %v1588_v26, %v1584_v25  ;;  %v1590_v48 = vld [vmem:[%s6192_s1 + $0xc0] sm:$0xff] }
 0x718   :  { %v3486_v55 = vmul.f32 -1.442695, %v1340_v45  ;;  %v4055_v45 = vpack.c.bf16 %v1586_v9, %v1582_v8  ;;  %v1592_v62 = vld [vmem:[%s6192_s1 + $0xd0] sm:$0xff]  ;;  %v1599_v7 = vld [vmem:[%s6192_s1 + $0x108] sm:$0xff]  ;;  %v1625_v8 = vld [vmem:[%s6192_s1 + $0x1d8] sm:$0xff] }
 0x719   :  { %v3487_v58 = vmul.f32 -1.442695, %v1341_v52  ;;  %v3488_v10 = vmul.f32 -1.442695, %v1343_v1  ;;  %v1594_v52 = vld [vmem:[%s6192_s1 + $0xe0] sm:$0xff]  ;;  %v1596_v1 = vld [vmem:[%s6192_s1 + $0xf0] sm:$0xff] }
 0x71a   :  { %4785 = vpow2.f32 %v3486_v55  ;;  %v4057_v55 = vpack.c.bf16 %v1595_v33, %v1591_v30  ;;  %v1629_v9 = vld [vmem:[%s6192_s1 + $0x1f8] sm:$0xff]  ;;  %v1622_v25 = vld [vmem:[%s6192_s1 + $0x1c0] sm:$0xff] }
 0x71b   :  { %4787 = vpow2.f32 %v3487_v58  ;;  %v4089_v58 = vpack.c.bf16 %v1597_v42, %v1593_v37  ;;  %v4105_v30 = vpack.c.bf16 %v1629_v9, %v1625_v8  ;;  %v1626_v33 = vld [vmem:[%s6192_s1 + $0x1e0] sm:$0xff]  ;;  %v1624_v37 = vld [vmem:[%s6192_s1 + $0x1d0] sm:$0xff]  ;;  %v1948_v8 = vld [vmem:[#allocation5 + $0x328] sm:$0xff] }
 0x71c   :  { %4789 = vpow2.f32 %v3488_v10  ;;  %v1603_v10 = vld [vmem:[%s6192_s1 + $0x128] sm:$0xff]  ;;  %v1628_v42 = vld [vmem:[%s6192_s1 + $0x1f0] sm:$0xff]  ;;  %v1946_v9 = vld [vmem:[#allocation5 + $0x318] sm:$0xff] }
 0x71d   :  { %4791 = vtanh.f32 %v1342_v15  ;;  %v1601_v15 = vld [vmem:[%s6192_s1 + $0x118] sm:$0xff] }
 0x724   :  { %v4786_v18 = vpop.eup %4785 }
 0x725   :  { %v4788_v24 = vpop.eup %4787  ;;  %v1347_v27 = vadd.f32 1.0, %v4786_v18  ;;  %v1605_v18 = vld [vmem:[%s6192_s1 + $0x138] sm:$0xff] }
 0x726   :  { %v1353_v31 = vadd.f32 1.0, %v4788_v24  ;;  %v4790_v32 = vpop.eup %4789  ;;  %v4059_v24 = vpack.c.bf16 %v1594_v52, %v1590_v48  ;;  %v1558_v48 = vld [vmem:[%s6197_s6] sm:$0xff] }
 0x727   :  { %4793 = vrcp.f32 %v1347_v27  ;;  %v4792_v39 = vpop.eup %4791  ;;  %v1360_v36 = vadd.f32 1.0, %v4790_v32  ;;  %v4091_v27 = vpack.c.bf16 %v1596_v1, %v1592_v62  ;;  %v1602_v32 = vld [vmem:[%s6192_s1 + $0x120] sm:$0xff]  ;;  %v1913_v1 = vld [vmem:[#allocation5 + $0x210] sm:$0xff] }
 0x728   :  { %4795 = vrcp.f32 %v1353_v31  ;;  %v1598_v31 = vld [vmem:[%s6192_s1 + $0x100] sm:$0xff] }
 0x729   :  { %4797 = vrcp.f32 %v1360_v36  ;;  %v1607_v36 = vld [vmem:[%s6192_s1 + $0x148] sm:$0xff]  ;;  %v4063_v61 = vpack.c.bf16 %v1602_v32, %v1598_v31  ;;  %v1911_v52 = vld [vmem:[#allocation5 + $0x200] sm:$0xff]  ;;  %v1926_v32 = vld [vmem:[#allocation5 + $0x278] sm:$0xff] }
 0x72a   :  { %v1923_v31 = vld [vmem:[#allocation5 + $0x260] sm:$0xff] }
 0x731   :  { %v4794_v40 = vpop.eup %4793 }
 0x732   :  { %v4796_v41 = vpop.eup %4795  ;;  %v1365_v49 = vmul.f32 %v4794_v40, %v4792_v39  ;;  %v4061_v39 = vpack.c.bf16 %v1603_v10, %v1599_v7  ;;  %v4093_v40 = vpack.c.bf16 %v1605_v18, %v1601_v15  ;;  %v1917_v7 = vld [vmem:[#allocation5 + $0x230] sm:$0xff]  ;;  %v1920_v10 = vld [vmem:[#allocation5 + $0x248] sm:$0xff]  ;;  %v1922_v18 = vld [vmem:[#allocation5 + $0x258] sm:$0xff] }
 0x733   :  { %v1364_v56 = vmul.f32 %v4796_v41, %v5451_v35  ;;  %v4798_v5 = vpop.eup %4797  ;;  %v1589_v35 = vld [vmem:[%s6192_s1 + $0xb8] sm:$0xff]  ;;  %v1600_v41 = vld [vmem:[%s6192_s1 + $0x110] sm:$0xff]  ;;  %v1924_v15 = vld [vmem:[#allocation5 + $0x268] sm:$0xff] }
 0x734   :  { %v4085_v17 = vpack.c.bf16 %v1589_v35, %v1585_v44  ;;  %v1616_v44 = vld [vmem:[%s6192_s1 + $0x190] sm:$0xff] }
 0x735   :  { %v5515_v57 = vadd.f32 %v1365_v49, %v1364_v56  ;;  %v1604_v49 = vld [vmem:[%s6192_s1 + $0x130] sm:$0xff]  ;;  %v1611_v56 = vld [vmem:[%s6192_s1 + $0x168] sm:$0xff] }
 0x736   :  { %v4095_v63 = vpack.c.bf16 %v1604_v49, %v1600_v41  ;;  %v4065_v4 = vpack.c.bf16 %v1611_v56, %v1607_v36  ;;  %v1620_v35 = vld [vmem:[%s6192_s1 + $0x1b0] sm:$0xff]  ;;  %v1928_v56 = vld [vmem:[#allocation5 + $0x288] sm:$0xff] }
 0x737   :  { %4799 = vtanh.f32 %v5515_v57  ;;  %v1921_v41 = vld [vmem:[#allocation5 + $0x250] sm:$0xff] }
 0x738   :  { %v1925_v49 = vld [vmem:[#allocation5 + $0x270] sm:$0xff] }
 0x739   :  { %v5752_v36 = vpack.c.bf16 %v1925_v49, %v1921_v41  ;;  %v1959_v41 = vld [vmem:[#allocation5 + $0x380] sm:$0xff] }
 0x73a   :  { %v1963_v49 = vld [vmem:[#allocation5 + $0x3a0] sm:$0xff] }
 0x741   :  { %v4800_v6 = vpop.eup %4799 }
 0x742   :  { %v5548_v19 = vmul.f32 %v4800_v6, %v4798_v5  ;;  %v1608_v5 = vld [vmem:[%s6192_s1 + $0x150] sm:$0xff] }
 0x743   :  { %v1612_v6 = vld [vmem:[%s6192_s1 + $0x170] sm:$0xff] }
 0x744   :  { %1444 = vmatmul.mubr.f32.vlgmr.msra.gmra.mrb[14].mxu0 %v5548_v19  ;;  %1515 = vmatmul.mubr.f32.vlgmr.msra.gmra.mrb[14].mxu1 %v5548_v19 }
 0x745   :  { %4048 = vmatpush1.bf16.msra.mxu0 %v4047_v11  ;;  %4080 = vmatpush1.bf16.msra.mxu1 %v4079_v12  ;;  %v1615_v11 = vld [vmem:[%s6192_s1 + $0x188] sm:$0xff] }
 0x746   :  { %4050 = vmatprep.subr.bf16.mxu0 %v4049_v20  ;;  %4082 = vmatprep.subr.bf16.mxu1 %v4081_v21  ;;  %v1619_v12 = vld [vmem:[%s6192_s1 + $0x1a8] sm:$0xff]  ;;  %v4067_v20 = vpack.c.bf16 %v1610_v3, %v1606_v2  ;;  %v4099_v21 = vpack.c.bf16 %v1612_v6, %v1608_v5  ;;  %v1931_v2 = vld [vmem:[#allocation5 + $0x2a0] sm:$0xff]  ;;  %v1934_v3 = vld [vmem:[#allocation5 + $0x2b8] sm:$0xff] }
 0x747   :  { %1716 = vmatprep.mubr.f32.mxu0 %v4972_v0  ;;  %1829 = vmatprep.mubr.f32.mxu1 %v4972_v0  ;;  %v4069_v29 = vpack.c.bf16 %v1619_v12, %v1615_v11  ;;  %v1929_v5 = vld [vmem:[#allocation5 + $0x290] sm:$0xff]  ;;  %v1936_v12 = vld [vmem:[#allocation5 + $0x2c8] sm:$0xff] }
 0x748   :  { %v1933_v6 = vld [vmem:[#allocation5 + $0x2b0] sm:$0xff] }
 0x749   :  { %4052 = vmatpush1.bf16.msra.mxu0 %v4051_v51  ;;  %4084 = vmatpush1.bf16.msra.mxu1 %v4083_v43  ;;  %v1623_v51 = vld [vmem:[%s6192_s1 + $0x1c8] sm:$0xff]  ;;  %v5764_v11 = vpack.c.bf16 %v1933_v6, %v1929_v5 }
 0x74a   :  { %4054 = vmatprep.subr.bf16.mxu0 %v4053_v14  ;;  %4086 = vmatprep.subr.bf16.mxu1 %v4085_v17  ;;  %v1627_v43 = vld [vmem:[%s6192_s1 + $0x1e8] sm:$0xff]  ;;  %v4071_v14 = vpack.c.bf16 %v1618_v28, %v1614_v23  ;;  %v4103_v17 = vpack.c.bf16 %v1620_v35, %v1616_v44  ;;  %v1939_v23 = vld [vmem:[#allocation5 + $0x2e0] sm:$0xff]  ;;  %v1942_v28 = vld [vmem:[#allocation5 + $0x2f8] sm:$0xff] }
 0x74b   :  { %v4073_v26 = vpack.c.bf16 %v1627_v43, %v1623_v51  ;;  %v1937_v44 = vld [vmem:[#allocation5 + $0x2d0] sm:$0xff]  ;;  %v1944_v43 = vld [vmem:[#allocation5 + $0x308] sm:$0xff] }
 0x74c   :  { %v1941_v35 = vld [vmem:[#allocation5 + $0x2f0] sm:$0xff]  ;;  %v1968_v5 = vld [vmem:[#allocation5 + $0x3c8] sm:$0xff] }
 0x74d   :  { %4056 = vmatpush1.bf16.msra.mxu0 %v4055_v45  ;;  %4088 = vmatpush1.bf16.msra.mxu1 %v4087_v46  ;;  %v4075_v45 = vpack.c.bf16 %v1626_v33, %v1622_v25  ;;  %v4107_v46 = vpack.c.bf16 %v1628_v42, %v1624_v37  ;;  %v5776_v51 = vpack.c.bf16 %v1941_v35, %v1937_v44  ;;  %v1947_v25 = vld [vmem:[#allocation5 + $0x320] sm:$0xff]  ;;  %v1945_v37 = vld [vmem:[#allocation5 + $0x310] sm:$0xff]  ;;  %v1972_v6 = vld [vmem:[#allocation5 + $0x3e8] sm:$0xff] }
 0x74e   :  { %4058 = vmatprep.subr.bf16.mxu0 %v4057_v55  ;;  %4090 = vmatprep.subr.bf16.mxu1 %v4089_v58  ;;  %v1915_v55 = vld [vmem:[#allocation5 + $0x220] sm:$0xff]  ;;  %v1949_v42 = vld [vmem:[#allocation5 + $0x330] sm:$0xff] }
 0x74f   :  { %v5735_v58 = vpack.c.bf16 %v1915_v55, %v1911_v52  ;;  %v1955_v52 = vld [vmem:[#allocation5 + $0x360] sm:$0xff]  ;;  %v1958_v55 = vld [vmem:[#allocation5 + $0x378] sm:$0xff]  ;;  %v1969_v35 = vld [vmem:[#allocation5 + $0x3d0] sm:$0xff] }
 0x751   :  { %4060 = vmatpush1.bf16.msra.mxu0 %v4059_v24  ;;  %4092 = vmatpush1.bf16.msra.mxu1 %v4091_v27  ;;  %v5745_v24 = vpack.c.bf16 %v1924_v15, %v1920_v10  ;;  %v1919_v27 = vld [vmem:[#allocation5 + $0x240] sm:$0xff]  ;;  %v1957_v10 = vld [vmem:[#allocation5 + $0x370] sm:$0xff] }
 0x752   :  { %4062 = vmatprep.subr.bf16.mxu0 %v4061_v39  ;;  %4094 = vmatprep.subr.bf16.mxu1 %v4093_v40  ;;  %v5747_v39 = vpack.c.bf16 %v1923_v31, %v1919_v27  ;;  %v5749_v40 = vpack.c.bf16 %v1926_v32, %v1922_v18  ;;  %v1960_v18 = vld [vmem:[#allocation5 + $0x388] sm:$0xff]  ;;  %v1962_v31 = vld [vmem:[#allocation5 + $0x398] sm:$0xff] }
 0x753   :  { %v1964_v27 = vld [vmem:[#allocation5 + $0x3a8] sm:$0xff] }
 0x754   :  { %v5805_v32 = vpack.c.bf16 %v1964_v27, %v1960_v18 }
 0x755   :  { %4064 = vmatpush1.bf16.msra.mxu0 %v4063_v61  ;;  %4096 = vmatpush1.bf16.msra.mxu1 %v4095_v63  ;;  %v5757_v61 = vpack.c.bf16 %v1932_v59, %v1928_v56  ;;  %v1927_v63 = vld [vmem:[#allocation5 + $0x280] sm:$0xff]  ;;  %v1966_v56 = vld [vmem:[#allocation5 + $0x3b8] sm:$0xff]  ;;  %v5807_v59 = vpack.c.bf16 %v1963_v49, %v1959_v41 }
 0x756   :  { %4066 = vmatprep.subr.bf16.mxu0 %v4065_v4  ;;  %4098 = vmatprep.subr.bf16.mxu1 %v4097_v22  ;;  %v5759_v4 = vpack.c.bf16 %v1931_v2, %v1927_v63  ;;  %v5761_v22 = vpack.c.bf16 %v1934_v3, %v1930_v60  ;;  %v5809_v60 = vpack.c.bf16 %v1966_v56, %v1962_v31  ;;  %v1961_v63 = vld [vmem:[#allocation5 + $0x390] sm:$0xff] }
 0x757   :  { %v1965_v2 = vld [vmem:[#allocation5 + $0x3b0] sm:$0xff] }
 0x758   :  { %v5812_v3 = vpack.c.bf16 %v1965_v2, %v1961_v63 }
 0x759   :  { %4068 = vmatpush1.bf16.msra.mxu0 %v4067_v20  ;;  %4100 = vmatpush1.bf16.msra.mxu1 %v4099_v21  ;;  %v5769_v20 = vpack.c.bf16 %v1940_v13, %v1936_v12  ;;  %v1935_v21 = vld [vmem:[#allocation5 + $0x2c0] sm:$0xff]  ;;  %v1970_v12 = vld [vmem:[#allocation5 + $0x3d8] sm:$0xff]  ;;  %v5817_v13 = vpack.c.bf16 %v1972_v6, %v1968_v5 }
 0x75a   :  { %4070 = vmatprep.subr.bf16.mxu0 %v4069_v29  ;;  %4102 = vmatprep.subr.bf16.mxu1 %v4101_v34  ;;  %v5771_v29 = vpack.c.bf16 %v1939_v23, %v1935_v21  ;;  %v5773_v34 = vpack.c.bf16 %v1942_v28, %v1938_v16  ;;  %v1967_v16 = vld [vmem:[#allocation5 + $0x3c0] sm:$0xff]  ;;  %v1974_v23 = vld [vmem:[#allocation5 + $0x3f8] sm:$0xff] }
 0x75b   :  { %v1971_v21 = vld [vmem:[#allocation5 + $0x3e0] sm:$0xff]  ;;  %v5821_v44 = vpack.c.bf16 %v1974_v23, %v1970_v12 }
 0x75c   :  { %v5819_v28 = vpack.c.bf16 %v1971_v21, %v1967_v16 }
 0x75d   :  { %4072 = vmatpush1.bf16.msra.mxu0 %v4071_v14  ;;  %4104 = vmatpush1.bf16.msra.mxu1 %v4103_v17  ;;  %v5781_v14 = vpack.c.bf16 %v1948_v8, %v1944_v43  ;;  %v1943_v17 = vld [vmem:[#allocation5 + $0x300] sm:$0xff]  ;;  %v1973_v43 = vld [vmem:[#allocation5 + $0x3f0] sm:$0xff] }
 0x75e   :  { %4074 = vmatprep.subr.bf16.mxu0 %v4073_v26  ;;  %4106 = vmatprep.subr.bf16.mxu1 %v4105_v30  ;;  %v1950_v26 = vld [vmem:[#allocation5 + $0x338] sm:$0xff]  ;;  %v5783_v30 = vpack.c.bf16 %v1947_v25, %v1943_v17  ;;  %v5824_v8 = vpack.c.bf16 %v1973_v43, %v1969_v35  ;;  %v3491_v17 = vld [vmem:[%s6191_s0 + $0xe8] sm:$0xff] }
 0x75f   :  { %v5785_v33 = vpack.c.bf16 %v1950_v26, %v1946_v9  ;;  %v3490_v9 = vld [vmem:[%s6191_s0 + $0xe0] sm:$0xff] }
 0x761   :  { %4076 = vmatpush1.bf16.msra.mxu0 %v4075_v45  ;;  %4108 = vmatpush1.bf16.msra.mxu1 %v4107_v46  ;;  %v5788_v45 = vpack.c.bf16 %v1949_v42, %v1945_v37  ;;  %v1952_v46 = vld [vmem:[#allocation5 + $0x348] sm:$0xff] }
 0x764   :  { %1717 = vmatmul.mubr.f32.vlgmr.msra.gmra.mrb[16].mxu0 %v1558_v48  ;;  %1830 = vmatmul.mubr.f32.vlgmr.msra.gmra.mrb[16].mxu1 %v1558_v48  ;;  %v1956_v48 = vld [vmem:[#allocation5 + $0x368] sm:$0xff] }
 0x765   :  { %1722 = vmatprep.mubr.f32.mxu0 %v4972_v0  ;;  %1835 = vmatprep.mubr.f32.mxu1 %v4972_v0 }
 0x768   :  { %1723 = vmatmul.mubr.f32.gmra.mrb[18].mxu0 %v5238_v47  ;;  %1836 = vmatmul.mubr.f32.gmra.mrb[18].mxu1 %v5238_v47  ;;  %v1912_v47 = vld [vmem:[#allocation5 + $0x208] sm:$0xff] }
 0x769   :  { %1728 = vmatprep.mubr.f32.mxu0 %v4972_v0  ;;  %1841 = vmatprep.mubr.f32.mxu1 %v4972_v0 }
 0x76c   :  { %1729 = vmatmul.mubr.f32.gmra.mrb[20].mxu0 %v5292_v38  ;;  %1842 = vmatmul.mubr.f32.gmra.mrb[20].mxu1 %v5292_v38  ;;  %v1916_v38 = vld [vmem:[#allocation5 + $0x228] sm:$0xff] }
 0x76d   :  { %1734 = vmatprep.mubr.f32.mxu0 %v4972_v0  ;;  %1847 = vmatprep.mubr.f32.mxu1 %v4972_v0 }
 0x770   :  { %1735 = vmatmul.mubr.f32.gmra.mrb[22].mxu0 %v5346_v50  ;;  %1848 = vmatmul.mubr.f32.gmra.mrb[22].mxu1 %v5346_v50  ;;  %v1914_v50 = vld [vmem:[#allocation5 + $0x218] sm:$0xff] }
 0x771   :  { %1740 = vmatprep.mubr.f32.mxu0 %v4972_v0  ;;  %1853 = vmatprep.mubr.f32.mxu1 %v4972_v0 }
 0x774   :  { %1741 = vmatmul.mubr.f32.gmra.mrb[24].mxu0 %v5400_v53  ;;  %1854 = vmatmul.mubr.f32.gmra.mrb[24].mxu1 %v5400_v53  ;;  %v5733_v53 = vpack.c.bf16 %v1916_v38, %v1912_v47  ;;  %v1954_v47 = vld [vmem:[#allocation5 + $0x358] sm:$0xff]  ;;  %v5793_v38 = vpack.c.bf16 %v1956_v48, %v1952_v46 }
 0x775   :  { %1746 = vmatprep.mubr.f32.mxu0 %v4972_v0  ;;  %1859 = vmatprep.mubr.f32.mxu1 %v4972_v0 }
 0x776   :  { %4110 = vmatprep.subr.bf16.mxu0 %v5733_v53 }
 0x777   :  { %4112 = vmatpush1.bf16.msra.mxu0 %v5735_v58 }
 0x778   :  { %1747 = vmatmul.mubr.f32.gmra.mrb[26].mxu0 %v5454_v54  ;;  %1860 = vmatmul.mubr.f32.gmra.mrb[26].mxu1 %v5454_v54  ;;  %v1918_v54 = vld [vmem:[#allocation5 + $0x238] sm:$0xff] }
 0x779   :  { %1752 = vmatprep.mubr.f32.mxu0 %v4972_v0  ;;  %1865 = vmatprep.mubr.f32.mxu1 %v4972_v0  ;;  %v5737_v62 = vpack.c.bf16 %v1918_v54, %v1914_v50  ;;  %v1951_v50 = vld [vmem:[#allocation5 + $0x340] sm:$0xff] }
 0x77a   :  { %4114 = vmatprep.subr.bf16.mxu0 %v5745_v24  ;;  %v5795_v54 = vpack.c.bf16 %v1955_v52, %v1951_v50  ;;  %v3493_v52 = vld [vmem:[%s6191_s0 + $0xf8] sm:$0xff] }
 0x77b   :  { %4142 = vmatprep.subr.bf16.mxu1 %v5737_v62  ;;  %4116 = vmatpush1.bf16.msra.mxu0 %v5747_v39 }
 0x77c   :  { %1753 = vmatmul.mubr.f32.gmra.mrb[28].mxu0 %v5548_v19  ;;  %1866 = vmatmul.mubr.f32.gmra.mrb[28].mxu1 %v5548_v19  ;;  %v5740_v19 = vpack.c.bf16 %v1917_v7, %v1913_v1  ;;  %v5797_v1 = vpack.c.bf16 %v1958_v55, %v1954_v47  ;;  %v1953_v7 = vld [vmem:[#allocation5 + $0x350] sm:$0xff] }
 0x77d   :  { %1758 = vmatprep.mubr.f32.mxu0 %v4972_v0  ;;  %1871 = vmatprep.mubr.f32.mxu1 %v4972_v0  ;;  %v5800_v15 = vpack.c.bf16 %v1957_v10, %v1953_v7  ;;  %v3492_v7 = vld [vmem:[%s6191_s0 + $0xf0] sm:$0xff] }
 0x77e   :  { %4144 = vmatpush1.bf16.msra.mxu1 %v5740_v19  ;;  %4118 = vmatprep.subr.bf16.mxu0 %v5757_v61 }
 0x77f   :  { %4146 = vmatprep.subr.bf16.mxu1 %v5749_v40  ;;  %4120 = vmatpush1.bf16.msra.mxu0 %v5759_v4 }
 0x780   :  { %4122 = vmatprep.subr.bf16.mxu0 %v5769_v20 }
 0x782   :  { %4148 = vmatpush1.bf16.msra.mxu1 %v5752_v36 }
 0x783   :  { %4150 = vmatprep.subr.bf16.mxu1 %v5761_v22  ;;  %4124 = vmatpush1.bf16.msra.mxu0 %v5771_v29 }
 0x784   :  { %4126 = vmatprep.subr.bf16.mxu0 %v5781_v14 }
 0x786   :  { %4152 = vmatpush1.bf16.msra.mxu1 %v5764_v11 }
 0x787   :  { %4154 = vmatprep.subr.bf16.mxu1 %v5773_v34  ;;  %4128 = vmatpush1.bf16.msra.mxu0 %v5783_v30 }
 0x788   :  { %4130 = vmatprep.subr.bf16.mxu0 %v5793_v38 }
 0x78a   :  { %4156 = vmatpush1.bf16.msra.mxu1 %v5776_v51 }
 0x78b   :  { %4158 = vmatprep.subr.bf16.mxu1 %v5785_v33  ;;  %4132 = vmatpush1.bf16.msra.mxu0 %v5795_v54 }
 0x78c   :  { %4134 = vmatprep.subr.bf16.mxu0 %v5805_v32 }
 0x78e   :  { %4160 = vmatpush1.bf16.msra.mxu1 %v5788_v45 }
 0x78f   :  { %4162 = vmatprep.subr.bf16.mxu1 %v5797_v1  ;;  %4136 = vmatpush1.bf16.msra.mxu0 %v5807_v59 }
 0x790   :  { %4138 = vmatprep.subr.bf16.mxu0 %v5817_v13 }
 0x792   :  { %4164 = vmatpush1.bf16.msra.mxu1 %v5800_v15 }
 0x793   :  { %4166 = vmatprep.subr.bf16.mxu1 %v5809_v60  ;;  %4140 = vmatpush1.bf16.msra.mxu0 %v5819_v28 }
 0x794   :  { %4174 = vmatprep.subr.bf16.mxu0 %v5733_v53 }
 0x796   :  { %4168 = vmatpush1.bf16.msra.mxu1 %v5812_v3 }
 0x797   :  { %4170 = vmatprep.subr.bf16.mxu1 %v5821_v44 }
 0x79a   :  { %4172 = vmatpush1.bf16.msra.mxu1 %v5824_v8 }
 0x79b   :  { %4206 = vmatprep.subr.bf16.mxu1 %v5737_v62 }
 0x817   :  { %v1445_v25 = vpop.f32.mrb[14].mxu0  ;;  %v1516_v26 = vpop.f32.mrb[14].mxu1 }
 0x818   :  { %v1521_v37 = vadd.f32 %v3490_v9, %v1445_v25  ;;  %v1447_v42 = vpop.f32.mrb[15].mxu0  ;;  %v1518_v46 = vpop.f32.mrb[15].mxu1  ;;  %v1523_v18 = vadd.f32 %v3492_v7, %v1516_v26  ;;  %v1632_v9 = vlaneseq  ;;  %v1630_v26 = vld [vmem:[%s6194_s3] sm:$0xf] }
 0x819   :  { %v1522_v48 = vadd.f32 %v3491_v17, %v1447_v42  ;;  %v1524_v55 = vadd.f32 %v3493_v52, %v1518_v46 }
 0x81a   :  { %v3494_v47 = vmul.f32 -1.442695, %v1521_v37  ;;  %v1633_v17 = vshrl.u32 %v1632_v9, 7 }
 0x81b   :  { %v3495_v50 = vmul.f32 -1.442695, %v1522_v48  ;;  %v3496_v10 = vmul.f32 -1.442695, %v1524_v55 }
 0x81c   :  { %4801 = vpow2.f32 %v3494_v47  ;;  %v1634_v25 = vsub.s32 0, %v1633_v17  ;;  %v1638_v37 = vsub.s32 1, %v1633_v17 }
 0x81d   :  { %4803 = vpow2.f32 %v3495_v50  ;;  %v1646_v50 = vsub.s32 3, %v1633_v17 }
 0x81e   :  { %4805 = vpow2.f32 %v3496_v10  ;;  %v5892_v42 = vrot.slane %v1630_v26, %v1634_v25  ;;  %v5894_v46 = vrot.slane %v1630_v26, %v1638_v37 }
 0x81f   :  { %4807 = vtanh.f32 %v1523_v18 }
 0x826   :  { %v4802_v27 = vpop.eup %4801 }
 0x827   :  { %v4804_v31 = vpop.eup %4803  ;;  %v1528_v41 = vadd.f32 1.0, %v4802_v27 }
 0x828   :  { %v1534_v49 = vadd.f32 1.0, %v4804_v31  ;;  %v4806_v56 = vpop.eup %4805  ;;  %v5898_v31 = vrot.slane %v1630_v26, %v1646_v50 }
 0x829   :  { %4809 = vrcp.f32 %v1528_v41  ;;  %v4808_v63 = vpop.eup %4807  ;;  %v1541_v12 = vadd.f32 1.0, %v4806_v56  ;;  %v1642_v41 = vsub.s32 2, %v1633_v17 }
 0x82a   :  { %4811 = vrcp.f32 %v1534_v49 }
 0x82b   :  { %4813 = vrcp.f32 %v1541_v12  ;;  %v5901_v56 = vrot.slane %v1630_v26, %v1642_v41 }
 0x833   :  { %v4810_v2 = vpop.eup %4809 }
 0x834   :  { %v4812_v5 = vpop.eup %4811  ;;  %v1546_v6 = vmul.f32 %v4810_v2, %v4808_v63 }
 0x835   :  { %v1545_v16 = vmul.f32 %v4812_v5, %v5515_v57  ;;  %v4814_v23 = vpop.eup %4813  ;;  %v3498_v57 = vld [vmem:[%s6195_s4 + $0x8] sm:$0xff] }
 0x837   :  { %v1547_v21 = vadd.f32 %v1546_v6, %v1545_v16 }
 0x839   :  { %4815 = vtanh.f32 %v1547_v21  ;;  %1557 = vst [vmem:[%s6199_s8] sm:$0xff] %v1547_v21 }
 0x843   :  { %v4816_v35 = vpop.eup %4815 }
 0x844   :  { %v1549_v43 = vmul.f32 %v4816_v35, %v4814_v23  ;;  %v3499_v35 = vld [vmem:[%s6196_s5 + $0x8] sm:$0xff] }
 0x846   :  { %1555 = vst [vmem:[%s6198_s7] sm:$0xff] %v1549_v43  ;;  %1759 = vmatmul.mubr.f32.gmra.mrb[30].mxu0 %v1549_v43  ;;  %1872 = vmatmul.mubr.f32.gmra.mrb[30].mxu1 %v1549_v43 }
 0x847   :  { %2050 = vmatprep.mubr.f32.mxu0 %v4972_v0  ;;  %2121 = vmatprep.mubr.f32.mxu1 %v4972_v0 }
 0x84a   :  { %2051 = vmatmul.mubr.f32.vlgmr.msra.gmra.mrb[16].mxu0 %v3498_v57  ;;  %2122 = vmatmul.mubr.f32.vlgmr.msra.gmra.mrb[16].mxu1 %v3498_v57 }
 0x84b   :  { %4176 = vmatpush1.bf16.msra.mxu0 %v5735_v58  ;;  %4208 = vmatpush1.bf16.msra.mxu1 %v5740_v19 }
 0x84c   :  { %4178 = vmatprep.subr.bf16.mxu0 %v5745_v24  ;;  %4210 = vmatprep.subr.bf16.mxu1 %v5749_v40 }
 0x84d   :  { %2230 = vmatprep.mubr.f32.mxu0 %v4972_v0  ;;  %2301 = vmatprep.mubr.f32.mxu1 %v4972_v0 }
 0x84f   :  { %4180 = vmatpush1.bf16.msra.mxu0 %v5747_v39  ;;  %4212 = vmatpush1.bf16.msra.mxu1 %v5752_v36 }
 0x850   :  { %4182 = vmatprep.subr.bf16.mxu0 %v5757_v61  ;;  %4214 = vmatprep.subr.bf16.mxu1 %v5761_v22 }
 0x853   :  { %4184 = vmatpush1.bf16.msra.mxu0 %v5759_v4  ;;  %4216 = vmatpush1.bf16.msra.mxu1 %v5764_v11 }
 0x854   :  { %4186 = vmatprep.subr.bf16.mxu0 %v5769_v20  ;;  %4218 = vmatprep.subr.bf16.mxu1 %v5773_v34 }
 0x857   :  { %4188 = vmatpush1.bf16.msra.mxu0 %v5771_v29  ;;  %4220 = vmatpush1.bf16.msra.mxu1 %v5776_v51 }
 0x858   :  { %4190 = vmatprep.subr.bf16.mxu0 %v5781_v14  ;;  %4222 = vmatprep.subr.bf16.mxu1 %v5785_v33 }
 0x85b   :  { %4192 = vmatpush1.bf16.msra.mxu0 %v5783_v30  ;;  %4224 = vmatpush1.bf16.msra.mxu1 %v5788_v45 }
 0x85c   :  { %4194 = vmatprep.subr.bf16.mxu0 %v5793_v38  ;;  %4226 = vmatprep.subr.bf16.mxu1 %v5797_v1 }
 0x85f   :  { %4196 = vmatpush1.bf16.msra.mxu0 %v5795_v54  ;;  %4228 = vmatpush1.bf16.msra.mxu1 %v5800_v15 }
 0x860   :  { %4198 = vmatprep.subr.bf16.mxu0 %v5805_v32  ;;  %4230 = vmatprep.subr.bf16.mxu1 %v5809_v60 }
 0x863   :  { %4200 = vmatpush1.bf16.msra.mxu0 %v5807_v59  ;;  %4232 = vmatpush1.bf16.msra.mxu1 %v5812_v3 }
 0x864   :  { %4202 = vmatprep.subr.bf16.mxu0 %v5817_v13  ;;  %4234 = vmatprep.subr.bf16.mxu1 %v5821_v44 }
 0x867   :  { %4204 = vmatpush1.bf16.msra.mxu0 %v5819_v28  ;;  %4236 = vmatpush1.bf16.msra.mxu1 %v5824_v8 }
 0x868   :  { %4238 = vmatprep.subr.bf16.mxu0 %v5733_v53  ;;  %4270 = vmatprep.subr.bf16.mxu1 %v5737_v62 }
 0x91d   :  { %v2052_v48 = vpop.f32.mrb[16].mxu0  ;;  %v2123_v47 = vpop.f32.mrb[16].mxu1 }
 0x91e   :  { %v4621_v52 = vadd.f32 %v2052_v48, %v5892_v42  ;;  %v2054_v55 = vpop.f32.mrb[17].mxu0  ;;  %v2125_v7 = vpop.f32.mrb[17].mxu1  ;;  %v4637_v2 = vadd.f32 %v2123_v47, %v5901_v56 }
 0x91f   :  { %v4622_v10 = vadd.f32 %v2054_v55, %v5894_v46  ;;  %v4638_v49 = vadd.f32 %v2125_v7, %v5898_v31 }
 0x920   :  { %v3500_v18 = vmul.f32 -1.442695, %v4621_v52 }
 0x921   :  { %v3501_v27 = vmul.f32 -1.442695, %v4622_v10  ;;  %v3502_v63 = vmul.f32 -1.442695, %v4638_v49 }
 0x922   :  { %4817 = vpow2.f32 %v3500_v18 }
 0x923   :  { %4819 = vpow2.f32 %v3501_v27 }
 0x924   :  { %4821 = vpow2.f32 %v3502_v63 }
 0x925   :  { %4823 = vtanh.f32 %v4637_v2 }
 0x92c   :  { %v4818_v5 = vpop.eup %4817 }
 0x92d   :  { %v4820_v6 = vpop.eup %4819  ;;  %v2135_v12 = vadd.f32 1.0, %v4818_v5 }
 0x92e   :  { %v2141_v16 = vadd.f32 1.0, %v4820_v6  ;;  %v4822_v21 = vpop.eup %4821 }
 0x92f   :  { %4825 = vrcp.f32 %v2135_v12  ;;  %v4824_v23 = vpop.eup %4823  ;;  %v2148_v17 = vadd.f32 1.0, %v4822_v21 }
 0x930   :  { %4827 = vrcp.f32 %v2141_v16 }
 0x931   :  { %4829 = vrcp.f32 %v2148_v17 }
 0x939   :  { %v4826_v43 = vpop.eup %4825 }
 0x93a   :  { %v4828_v57 = vpop.eup %4827  ;;  %v2153_v9 = vmul.f32 %v4826_v43, %v4824_v23 }
 0x93b   :  { %v2152_v25 = vmul.f32 %v4828_v57, %v3499_v35  ;;  %v4830_v37 = vpop.eup %4829 }
 0x93d   :  { %v5907_v26 = vadd.f32 %v2153_v9, %v2152_v25 }
 0x93f   :  { %4831 = vtanh.f32 %v5907_v26 }
 0x949   :  { %v4832_v48 = vpop.eup %4831 }
 0x94a   :  { %v2156_v47 = vmul.f32 %v4832_v48, %v4830_v37 }
 0x94c   :  { %2159 = vst [vmem:[%s6197_s6] sm:$0xff] %v2156_v47  ;;  %2231 = vmatmul.mubr.f32.vlgmr.msra.gmra.mrb[18].mxu0 %v2156_v47  ;;  %2302 = vmatmul.mubr.f32.vlgmr.msra.gmra.mrb[18].mxu1 %v2156_v47 }
 0x94d   :  { %4240 = vmatpush1.bf16.msra.mxu0 %v5735_v58  ;;  %4272 = vmatpush1.bf16.msra.mxu1 %v5740_v19 }
 0x94e   :  { %4242 = vmatprep.subr.bf16.mxu0 %v5745_v24  ;;  %4274 = vmatprep.subr.bf16.mxu1 %v5749_v40 }
 0x94f   :  { %2410 = vmatprep.mubr.f32.mxu0 %v4972_v0  ;;  %2481 = vmatprep.mubr.f32.mxu1 %v4972_v0 }
 0x951   :  { %4244 = vmatpush1.bf16.msra.mxu0 %v5747_v39  ;;  %4276 = vmatpush1.bf16.msra.mxu1 %v5752_v36 }
 0x952   :  { %4246 = vmatprep.subr.bf16.mxu0 %v5757_v61  ;;  %4278 = vmatprep.subr.bf16.mxu1 %v5761_v22 }
 0x955   :  { %4248 = vmatpush1.bf16.msra.mxu0 %v5759_v4  ;;  %4280 = vmatpush1.bf16.msra.mxu1 %v5764_v11 }
 0x956   :  { %4250 = vmatprep.subr.bf16.mxu0 %v5769_v20  ;;  %4282 = vmatprep.subr.bf16.mxu1 %v5773_v34 }
 0x959   :  { %4252 = vmatpush1.bf16.msra.mxu0 %v5771_v29  ;;  %4284 = vmatpush1.bf16.msra.mxu1 %v5776_v51 }
 0x95a   :  { %4254 = vmatprep.subr.bf16.mxu0 %v5781_v14  ;;  %4286 = vmatprep.subr.bf16.mxu1 %v5785_v33 }
 0x95d   :  { %4256 = vmatpush1.bf16.msra.mxu0 %v5783_v30  ;;  %4288 = vmatpush1.bf16.msra.mxu1 %v5788_v45 }
 0x95e   :  { %4258 = vmatprep.subr.bf16.mxu0 %v5793_v38  ;;  %4290 = vmatprep.subr.bf16.mxu1 %v5797_v1 }
 0x961   :  { %4260 = vmatpush1.bf16.msra.mxu0 %v5795_v54  ;;  %4292 = vmatpush1.bf16.msra.mxu1 %v5800_v15 }
 0x962   :  { %4262 = vmatprep.subr.bf16.mxu0 %v5805_v32  ;;  %4294 = vmatprep.subr.bf16.mxu1 %v5809_v60 }
 0x965   :  { %4264 = vmatpush1.bf16.msra.mxu0 %v5807_v59  ;;  %4296 = vmatpush1.bf16.msra.mxu1 %v5812_v3 }
 0x966   :  { %4266 = vmatprep.subr.bf16.mxu0 %v5817_v13  ;;  %4298 = vmatprep.subr.bf16.mxu1 %v5821_v44 }
 0x969   :  { %4268 = vmatpush1.bf16.msra.mxu0 %v5819_v28  ;;  %4300 = vmatpush1.bf16.msra.mxu1 %v5824_v8 }
 0x96a   :  { %4302 = vmatprep.subr.bf16.mxu0 %v5733_v53  ;;  %4334 = vmatprep.subr.bf16.mxu1 %v5737_v62 }
 0xa1f   :  { %v2232_v50 = vpop.f32.mrb[18].mxu0  ;;  %v2303_v52 = vpop.f32.mrb[18].mxu1 }
 0xa20   :  { %v4623_v55 = vadd.f32 %v2232_v50, %v5892_v42  ;;  %v2234_v7 = vpop.f32.mrb[19].mxu0  ;;  %v2305_v10 = vpop.f32.mrb[19].mxu1  ;;  %v4639_v2 = vadd.f32 %v2303_v52, %v5901_v56 }
 0xa21   :  { %v4624_v18 = vadd.f32 %v2234_v7, %v5894_v46  ;;  %v4640_v49 = vadd.f32 %v2305_v10, %v5898_v31 }
 0xa22   :  { %v3503_v27 = vmul.f32 -1.442695, %v4623_v55 }
 0xa23   :  { %v3504_v41 = vmul.f32 -1.442695, %v4624_v18  ;;  %v3505_v63 = vmul.f32 -1.442695, %v4640_v49 }
 0xa24   :  { %4833 = vpow2.f32 %v3503_v27 }
 0xa25   :  { %4835 = vpow2.f32 %v3504_v41 }
 0xa26   :  { %4837 = vpow2.f32 %v3505_v63 }
 0xa27   :  { %4839 = vtanh.f32 %v4639_v2 }
 0xa2e   :  { %v4834_v5 = vpop.eup %4833 }
 0xa2f   :  { %v4836_v6 = vpop.eup %4835  ;;  %v2315_v12 = vadd.f32 1.0, %v4834_v5 }
 0xa30   :  { %v2321_v16 = vadd.f32 1.0, %v4836_v6  ;;  %v4838_v21 = vpop.eup %4837 }
 0xa31   :  { %4841 = vrcp.f32 %v2315_v12  ;;  %v4840_v23 = vpop.eup %4839  ;;  %v2328_v9 = vadd.f32 1.0, %v4838_v21 }
 0xa32   :  { %4843 = vrcp.f32 %v2321_v16 }
 0xa33   :  { %4845 = vrcp.f32 %v2328_v9 }
 0xa3b   :  { %v4842_v35 = vpop.eup %4841 }
 0xa3c   :  { %v4844_v43 = vpop.eup %4843  ;;  %v2333_v57 = vmul.f32 %v4842_v35, %v4840_v23 }
 0xa3d   :  { %v2332_v17 = vmul.f32 %v4844_v43, %v5907_v26  ;;  %v4846_v37 = vpop.eup %4845 }
 0xa3f   :  { %v5952_v25 = vadd.f32 %v2333_v57, %v2332_v17 }
 0xa41   :  { %4847 = vtanh.f32 %v5952_v25 }
 0xa4b   :  { %v4848_v48 = vpop.eup %4847 }
 0xa4c   :  { %v2336_v47 = vmul.f32 %v4848_v48, %v4846_v37 }
 0xa4e   :  { %3506 = vst [vmem:[%s6197_s6 + $0x8] sm:$0xff] %v2336_v47  ;;  %2411 = vmatmul.mubr.f32.vlgmr.msra.gmra.mrb[20].mxu0 %v2336_v47  ;;  %2482 = vmatmul.mubr.f32.vlgmr.msra.gmra.mrb[20].mxu1 %v2336_v47 }
 0xa4f   :  { %4304 = vmatpush1.bf16.msra.mxu0 %v5735_v58  ;;  %4336 = vmatpush1.bf16.msra.mxu1 %v5740_v19 }
 0xa50   :  { %4306 = vmatprep.subr.bf16.mxu0 %v5745_v24  ;;  %4338 = vmatprep.subr.bf16.mxu1 %v5749_v40 }
 0xa51   :  { %2590 = vmatprep.mubr.f32.mxu0 %v4972_v0  ;;  %2661 = vmatprep.mubr.f32.mxu1 %v4972_v0 }
 0xa53   :  { %4308 = vmatpush1.bf16.msra.mxu0 %v5747_v39  ;;  %4340 = vmatpush1.bf16.msra.mxu1 %v5752_v36 }
 0xa54   :  { %4310 = vmatprep.subr.bf16.mxu0 %v5757_v61  ;;  %4342 = vmatprep.subr.bf16.mxu1 %v5761_v22 }
 0xa57   :  { %4312 = vmatpush1.bf16.msra.mxu0 %v5759_v4  ;;  %4344 = vmatpush1.bf16.msra.mxu1 %v5764_v11 }
 0xa58   :  { %4314 = vmatprep.subr.bf16.mxu0 %v5769_v20  ;;  %4346 = vmatprep.subr.bf16.mxu1 %v5773_v34 }
 0xa5b   :  { %4316 = vmatpush1.bf16.msra.mxu0 %v5771_v29  ;;  %4348 = vmatpush1.bf16.msra.mxu1 %v5776_v51 }
 0xa5c   :  { %4318 = vmatprep.subr.bf16.mxu0 %v5781_v14  ;;  %4350 = vmatprep.subr.bf16.mxu1 %v5785_v33 }
 0xa5f   :  { %4320 = vmatpush1.bf16.msra.mxu0 %v5783_v30  ;;  %4352 = vmatpush1.bf16.msra.mxu1 %v5788_v45 }
 0xa60   :  { %4322 = vmatprep.subr.bf16.mxu0 %v5793_v38  ;;  %4354 = vmatprep.subr.bf16.mxu1 %v5797_v1 }
 0xa63   :  { %4324 = vmatpush1.bf16.msra.mxu0 %v5795_v54  ;;  %4356 = vmatpush1.bf16.msra.mxu1 %v5800_v15 }
 0xa64   :  { %4326 = vmatprep.subr.bf16.mxu0 %v5805_v32  ;;  %4358 = vmatprep.subr.bf16.mxu1 %v5809_v60 }
 0xa67   :  { %4328 = vmatpush1.bf16.msra.mxu0 %v5807_v59  ;;  %4360 = vmatpush1.bf16.msra.mxu1 %v5812_v3 }
 0xa68   :  { %4330 = vmatprep.subr.bf16.mxu0 %v5817_v13  ;;  %4362 = vmatprep.subr.bf16.mxu1 %v5821_v44 }
 0xa6b   :  { %4332 = vmatpush1.bf16.msra.mxu0 %v5819_v28  ;;  %4364 = vmatpush1.bf16.msra.mxu1 %v5824_v8 }
 0xa6c   :  { %4366 = vmatprep.subr.bf16.mxu0 %v5733_v53  ;;  %4398 = vmatprep.subr.bf16.mxu1 %v5737_v62 }
 0xb21   :  { %v2412_v26 = vpop.f32.mrb[20].mxu0  ;;  %v2483_v50 = vpop.f32.mrb[20].mxu1 }
 0xb22   :  { %v4625_v52 = vadd.f32 %v2412_v26, %v5892_v42  ;;  %v2414_v55 = vpop.f32.mrb[21].mxu0  ;;  %v2485_v7 = vpop.f32.mrb[21].mxu1  ;;  %v4641_v63 = vadd.f32 %v2483_v50, %v5901_v56 }
 0xb23   :  { %v4626_v10 = vadd.f32 %v2414_v55, %v5894_v46  ;;  %v4642_v41 = vadd.f32 %v2485_v7, %v5898_v31 }
 0xb24   :  { %v3507_v18 = vmul.f32 -1.442695, %v4625_v52 }
 0xb25   :  { %v3508_v27 = vmul.f32 -1.442695, %v4626_v10  ;;  %v3509_v49 = vmul.f32 -1.442695, %v4642_v41 }
 0xb26   :  { %4849 = vpow2.f32 %v3507_v18 }
 0xb27   :  { %4851 = vpow2.f32 %v3508_v27 }
 0xb28   :  { %4853 = vpow2.f32 %v3509_v49 }
 0xb29   :  { %4855 = vtanh.f32 %v4641_v63 }
 0xb30   :  { %v4850_v2 = vpop.eup %4849 }
 0xb31   :  { %v4852_v5 = vpop.eup %4851  ;;  %v2495_v6 = vadd.f32 1.0, %v4850_v2 }
 0xb32   :  { %v2501_v12 = vadd.f32 1.0, %v4852_v5  ;;  %v4854_v16 = vpop.eup %4853 }
 0xb33   :  { %4857 = vrcp.f32 %v2495_v6  ;;  %v4856_v21 = vpop.eup %4855  ;;  %v2508_v57 = vadd.f32 1.0, %v4854_v16 }
 0xb34   :  { %4859 = vrcp.f32 %v2501_v12 }
 0xb35   :  { %4861 = vrcp.f32 %v2508_v57 }
 0xb3d   :  { %v4858_v23 = vpop.eup %4857 }
 0xb3e   :  { %v4860_v35 = vpop.eup %4859  ;;  %v2513_v43 = vmul.f32 %v4858_v23, %v4856_v21 }
 0xb3f   :  { %v2512_v9 = vmul.f32 %v4860_v35, %v5952_v25  ;;  %v4862_v37 = vpop.eup %4861 }
 0xb41   :  { %v5997_v17 = vadd.f32 %v2513_v43, %v2512_v9 }
 0xb43   :  { %4863 = vtanh.f32 %v5997_v17 }
 0xb4d   :  { %v4864_v48 = vpop.eup %4863 }
 0xb4e   :  { %v2516_v47 = vmul.f32 %v4864_v48, %v4862_v37 }
 0xb50   :  { %3510 = vst [vmem:[%s6197_s6 + $0x10] sm:$0xff] %v2516_v47  ;;  %2591 = vmatmul.mubr.f32.vlgmr.msra.gmra.mrb[22].mxu0 %v2516_v47  ;;  %2662 = vmatmul.mubr.f32.vlgmr.msra.gmra.mrb[22].mxu1 %v2516_v47 }
 0xb51   :  { %4368 = vmatpush1.bf16.msra.mxu0 %v5735_v58  ;;  %4400 = vmatpush1.bf16.msra.mxu1 %v5740_v19 }
 0xb52   :  { %4370 = vmatprep.subr.bf16.mxu0 %v5745_v24  ;;  %4402 = vmatprep.subr.bf16.mxu1 %v5749_v40 }
 0xb53   :  { %2770 = vmatprep.mubr.f32.mxu0 %v4972_v0  ;;  %2841 = vmatprep.mubr.f32.mxu1 %v4972_v0 }
 0xb55   :  { %4372 = vmatpush1.bf16.msra.mxu0 %v5747_v39  ;;  %4404 = vmatpush1.bf16.msra.mxu1 %v5752_v36 }
 0xb56   :  { %4374 = vmatprep.subr.bf16.mxu0 %v5757_v61  ;;  %4406 = vmatprep.subr.bf16.mxu1 %v5761_v22 }
 0xb59   :  { %4376 = vmatpush1.bf16.msra.mxu0 %v5759_v4  ;;  %4408 = vmatpush1.bf16.msra.mxu1 %v5764_v11 }
 0xb5a   :  { %4378 = vmatprep.subr.bf16.mxu0 %v5769_v20  ;;  %4410 = vmatprep.subr.bf16.mxu1 %v5773_v34 }
 0xb5d   :  { %4380 = vmatpush1.bf16.msra.mxu0 %v5771_v29  ;;  %4412 = vmatpush1.bf16.msra.mxu1 %v5776_v51 }
 0xb5e   :  { %4382 = vmatprep.subr.bf16.mxu0 %v5781_v14  ;;  %4414 = vmatprep.subr.bf16.mxu1 %v5785_v33 }
 0xb61   :  { %4384 = vmatpush1.bf16.msra.mxu0 %v5783_v30  ;;  %4416 = vmatpush1.bf16.msra.mxu1 %v5788_v45 }
 0xb62   :  { %4386 = vmatprep.subr.bf16.mxu0 %v5793_v38  ;;  %4418 = vmatprep.subr.bf16.mxu1 %v5797_v1 }
 0xb65   :  { %4388 = vmatpush1.bf16.msra.mxu0 %v5795_v54  ;;  %4420 = vmatpush1.bf16.msra.mxu1 %v5800_v15 }
 0xb66   :  { %4390 = vmatprep.subr.bf16.mxu0 %v5805_v32  ;;  %4422 = vmatprep.subr.bf16.mxu1 %v5809_v60 }
 0xb69   :  { %4392 = vmatpush1.bf16.msra.mxu0 %v5807_v59  ;;  %4424 = vmatpush1.bf16.msra.mxu1 %v5812_v3 }
 0xb6a   :  { %4394 = vmatprep.subr.bf16.mxu0 %v5817_v13  ;;  %4426 = vmatprep.subr.bf16.mxu1 %v5821_v44 }
 0xb6d   :  { %4396 = vmatpush1.bf16.msra.mxu0 %v5819_v28  ;;  %4428 = vmatpush1.bf16.msra.mxu1 %v5824_v8 }
 0xb6e   :  { %4430 = vmatprep.subr.bf16.mxu0 %v5733_v53  ;;  %4462 = vmatprep.subr.bf16.mxu1 %v5737_v62 }
 0xc23   :  { %v2592_v25 = vpop.f32.mrb[22].mxu0  ;;  %v2663_v26 = vpop.f32.mrb[22].mxu1 }
 0xc24   :  { %v4627_v50 = vadd.f32 %v2592_v25, %v5892_v42  ;;  %v2594_v52 = vpop.f32.mrb[23].mxu0  ;;  %v2665_v55 = vpop.f32.mrb[23].mxu1  ;;  %v4643_v49 = vadd.f32 %v2663_v26, %v5901_v56 }
 0xc25   :  { %v4628_v7 = vadd.f32 %v2594_v52, %v5894_v46  ;;  %v4644_v27 = vadd.f32 %v2665_v55, %v5898_v31 }
 0xc26   :  { %v3511_v10 = vmul.f32 -1.442695, %v4627_v50 }
 0xc27   :  { %v3512_v18 = vmul.f32 -1.442695, %v4628_v7  ;;  %v3513_v41 = vmul.f32 -1.442695, %v4644_v27 }
 0xc28   :  { %4865 = vpow2.f32 %v3511_v10 }
 0xc29   :  { %4867 = vpow2.f32 %v3512_v18 }
 0xc2a   :  { %4869 = vpow2.f32 %v3513_v41 }
 0xc2b   :  { %4871 = vtanh.f32 %v4643_v49 }
 0xc32   :  { %v4866_v63 = vpop.eup %4865 }
 0xc33   :  { %v4868_v2 = vpop.eup %4867  ;;  %v2675_v5 = vadd.f32 1.0, %v4866_v63 }
 0xc34   :  { %v2681_v6 = vadd.f32 1.0, %v4868_v2  ;;  %v4870_v12 = vpop.eup %4869 }
 0xc35   :  { %4873 = vrcp.f32 %v2675_v5  ;;  %v4872_v16 = vpop.eup %4871  ;;  %v2688_v43 = vadd.f32 1.0, %v4870_v12 }
 0xc36   :  { %4875 = vrcp.f32 %v2681_v6 }
 0xc37   :  { %4877 = vrcp.f32 %v2688_v43 }
 0xc3f   :  { %v4874_v21 = vpop.eup %4873 }
 0xc40   :  { %v4876_v23 = vpop.eup %4875  ;;  %v2693_v35 = vmul.f32 %v4874_v21, %v4872_v16 }
 0xc41   :  { %v2692_v57 = vmul.f32 %v4876_v23, %v5997_v17  ;;  %v4878_v37 = vpop.eup %4877 }
 0xc43   :  { %v6042_v9 = vadd.f32 %v2693_v35, %v2692_v57 }
 0xc45   :  { %4879 = vtanh.f32 %v6042_v9 }
 0xc4f   :  { %v4880_v48 = vpop.eup %4879 }
 0xc50   :  { %v2696_v47 = vmul.f32 %v4880_v48, %v4878_v37 }
 0xc52   :  { %3514 = vst [vmem:[%s6197_s6 + $0x18] sm:$0xff] %v2696_v47  ;;  %2771 = vmatmul.mubr.f32.vlgmr.msra.gmra.mrb[24].mxu0 %v2696_v47  ;;  %2842 = vmatmul.mubr.f32.vlgmr.msra.gmra.mrb[24].mxu1 %v2696_v47 }
 0xc53   :  { %4432 = vmatpush1.bf16.msra.mxu0 %v5735_v58  ;;  %4464 = vmatpush1.bf16.msra.mxu1 %v5740_v19 }
 0xc54   :  { %4434 = vmatprep.subr.bf16.mxu0 %v5745_v24  ;;  %4466 = vmatprep.subr.bf16.mxu1 %v5749_v40 }
 0xc55   :  { %2950 = vmatprep.mubr.f32.mxu0 %v4972_v0  ;;  %3021 = vmatprep.mubr.f32.mxu1 %v4972_v0 }
 0xc57   :  { %4436 = vmatpush1.bf16.msra.mxu0 %v5747_v39  ;;  %4468 = vmatpush1.bf16.msra.mxu1 %v5752_v36 }
 0xc58   :  { %4438 = vmatprep.subr.bf16.mxu0 %v5757_v61  ;;  %4470 = vmatprep.subr.bf16.mxu1 %v5761_v22 }
 0xc5b   :  { %4440 = vmatpush1.bf16.msra.mxu0 %v5759_v4  ;;  %4472 = vmatpush1.bf16.msra.mxu1 %v5764_v11 }
 0xc5c   :  { %4442 = vmatprep.subr.bf16.mxu0 %v5769_v20  ;;  %4474 = vmatprep.subr.bf16.mxu1 %v5773_v34 }
 0xc5f   :  { %4444 = vmatpush1.bf16.msra.mxu0 %v5771_v29  ;;  %4476 = vmatpush1.bf16.msra.mxu1 %v5776_v51 }
 0xc60   :  { %4446 = vmatprep.subr.bf16.mxu0 %v5781_v14  ;;  %4478 = vmatprep.subr.bf16.mxu1 %v5785_v33 }
 0xc63   :  { %4448 = vmatpush1.bf16.msra.mxu0 %v5783_v30  ;;  %4480 = vmatpush1.bf16.msra.mxu1 %v5788_v45 }
 0xc64   :  { %4450 = vmatprep.subr.bf16.mxu0 %v5793_v38  ;;  %4482 = vmatprep.subr.bf16.mxu1 %v5797_v1 }
 0xc67   :  { %4452 = vmatpush1.bf16.msra.mxu0 %v5795_v54  ;;  %4484 = vmatpush1.bf16.msra.mxu1 %v5800_v15 }
 0xc68   :  { %4454 = vmatprep.subr.bf16.mxu0 %v5805_v32  ;;  %4486 = vmatprep.subr.bf16.mxu1 %v5809_v60 }
 0xc6b   :  { %4456 = vmatpush1.bf16.msra.mxu0 %v5807_v59  ;;  %4488 = vmatpush1.bf16.msra.mxu1 %v5812_v3 }
 0xc6c   :  { %4458 = vmatprep.subr.bf16.mxu0 %v5817_v13  ;;  %4490 = vmatprep.subr.bf16.mxu1 %v5821_v44 }
 0xc6f   :  { %4460 = vmatpush1.bf16.msra.mxu0 %v5819_v28  ;;  %4492 = vmatpush1.bf16.msra.mxu1 %v5824_v8 }
 0xc70   :  { %4494 = vmatprep.subr.bf16.mxu0 %v5733_v53  ;;  %4526 = vmatprep.subr.bf16.mxu1 %v5737_v62 }
 0xd25   :  { %v2772_v17 = vpop.f32.mrb[24].mxu0  ;;  %v2843_v25 = vpop.f32.mrb[24].mxu1 }
 0xd26   :  { %v4629_v26 = vadd.f32 %v2772_v17, %v5892_v42  ;;  %v2774_v50 = vpop.f32.mrb[25].mxu0  ;;  %v2845_v52 = vpop.f32.mrb[25].mxu1  ;;  %v4645_v41 = vadd.f32 %v2843_v25, %v5901_v56 }
 0xd27   :  { %v4630_v55 = vadd.f32 %v2774_v50, %v5894_v46  ;;  %v4646_v18 = vadd.f32 %v2845_v52, %v5898_v31 }
 0xd28   :  { %v3515_v7 = vmul.f32 -1.442695, %v4629_v26 }
 0xd29   :  { %v3516_v10 = vmul.f32 -1.442695, %v4630_v55  ;;  %v3517_v27 = vmul.f32 -1.442695, %v4646_v18 }
 0xd2a   :  { %4881 = vpow2.f32 %v3515_v7 }
 0xd2b   :  { %4883 = vpow2.f32 %v3516_v10 }
 0xd2c   :  { %4885 = vpow2.f32 %v3517_v27 }
 0xd2d   :  { %4887 = vtanh.f32 %v4645_v41 }
 0xd34   :  { %v4882_v49 = vpop.eup %4881 }
 0xd35   :  { %v4884_v63 = vpop.eup %4883  ;;  %v2855_v2 = vadd.f32 1.0, %v4882_v49 }
 0xd36   :  { %v2861_v5 = vadd.f32 1.0, %v4884_v63  ;;  %v4886_v6 = vpop.eup %4885 }
 0xd37   :  { %4889 = vrcp.f32 %v2855_v2  ;;  %v4888_v12 = vpop.eup %4887  ;;  %v2868_v35 = vadd.f32 1.0, %v4886_v6 }
 0xd38   :  { %4891 = vrcp.f32 %v2861_v5 }
 0xd39   :  { %4893 = vrcp.f32 %v2868_v35 }
 0xd41   :  { %v4890_v16 = vpop.eup %4889 }
 0xd42   :  { %v4892_v21 = vpop.eup %4891  ;;  %v2873_v23 = vmul.f32 %v4890_v16, %v4888_v12 }
 0xd43   :  { %v2872_v43 = vmul.f32 %v4892_v21, %v6042_v9  ;;  %v4894_v37 = vpop.eup %4893 }
 0xd45   :  { %v6087_v57 = vadd.f32 %v2873_v23, %v2872_v43 }
 0xd47   :  { %4895 = vtanh.f32 %v6087_v57 }
 0xd51   :  { %v4896_v48 = vpop.eup %4895 }
 0xd52   :  { %v2876_v47 = vmul.f32 %v4896_v48, %v4894_v37 }
 0xd54   :  { %3518 = vst [vmem:[%s6197_s6 + $0x20] sm:$0xff] %v2876_v47  ;;  %2951 = vmatmul.mubr.f32.vlgmr.msra.gmra.mrb[26].mxu0 %v2876_v47  ;;  %3022 = vmatmul.mubr.f32.vlgmr.msra.gmra.mrb[26].mxu1 %v2876_v47 }
 0xd55   :  { %4496 = vmatpush1.bf16.msra.mxu0 %v5735_v58  ;;  %4528 = vmatpush1.bf16.msra.mxu1 %v5740_v19 }
 0xd56   :  { %4498 = vmatprep.subr.bf16.mxu0 %v5745_v24  ;;  %4530 = vmatprep.subr.bf16.mxu1 %v5749_v40 }
 0xd57   :  { %3130 = vmatprep.mubr.f32.mxu0 %v4972_v0  ;;  %3201 = vmatprep.mubr.f32.mxu1 %v4972_v0 }
 0xd59   :  { %4500 = vmatpush1.bf16.msra.mxu0 %v5747_v39  ;;  %4532 = vmatpush1.bf16.msra.mxu1 %v5752_v36 }
 0xd5a   :  { %4502 = vmatprep.subr.bf16.mxu0 %v5757_v61  ;;  %4534 = vmatprep.subr.bf16.mxu1 %v5761_v22 }
 0xd5d   :  { %4504 = vmatpush1.bf16.msra.mxu0 %v5759_v4  ;;  %4536 = vmatpush1.bf16.msra.mxu1 %v5764_v11 }
 0xd5e   :  { %4506 = vmatprep.subr.bf16.mxu0 %v5769_v20  ;;  %4538 = vmatprep.subr.bf16.mxu1 %v5773_v34 }
 0xd61   :  { %4508 = vmatpush1.bf16.msra.mxu0 %v5771_v29  ;;  %4540 = vmatpush1.bf16.msra.mxu1 %v5776_v51 }
 0xd62   :  { %4510 = vmatprep.subr.bf16.mxu0 %v5781_v14  ;;  %4542 = vmatprep.subr.bf16.mxu1 %v5785_v33 }
 0xd65   :  { %4512 = vmatpush1.bf16.msra.mxu0 %v5783_v30  ;;  %4544 = vmatpush1.bf16.msra.mxu1 %v5788_v45 }
 0xd66   :  { %4514 = vmatprep.subr.bf16.mxu0 %v5793_v38  ;;  %4546 = vmatprep.subr.bf16.mxu1 %v5797_v1 }
 0xd69   :  { %4516 = vmatpush1.bf16.msra.mxu0 %v5795_v54  ;;  %4548 = vmatpush1.bf16.msra.mxu1 %v5800_v15 }
 0xd6a   :  { %4518 = vmatprep.subr.bf16.mxu0 %v5805_v32  ;;  %4550 = vmatprep.subr.bf16.mxu1 %v5809_v60 }
 0xd6d   :  { %4520 = vmatpush1.bf16.msra.mxu0 %v5807_v59  ;;  %4552 = vmatpush1.bf16.msra.mxu1 %v5812_v3 }
 0xd6e   :  { %4522 = vmatprep.subr.bf16.mxu0 %v5817_v13  ;;  %4554 = vmatprep.subr.bf16.mxu1 %v5821_v44 }
 0xd71   :  { %4524 = vmatpush1.bf16.msra.mxu0 %v5819_v28  ;;  %4556 = vmatpush1.bf16.msra.mxu1 %v5824_v8 }
 0xd72   :  { %4558 = vmatprep.subr.bf16.mxu0 %v5733_v53  ;;  %4590 = vmatprep.subr.bf16.mxu1 %v5737_v62 }
 0xe27   :  { %v2952_v9 = vpop.f32.mrb[26].mxu0  ;;  %v3023_v17 = vpop.f32.mrb[26].mxu1 }
 0xe28   :  { %v4631_v25 = vadd.f32 %v2952_v9, %v5892_v42  ;;  %v2954_v26 = vpop.f32.mrb[27].mxu0  ;;  %v3025_v50 = vpop.f32.mrb[27].mxu1  ;;  %v4647_v27 = vadd.f32 %v3023_v17, %v5901_v56 }
 0xe29   :  { %v4632_v52 = vadd.f32 %v2954_v26, %v5894_v46  ;;  %v4648_v10 = vadd.f32 %v3025_v50, %v5898_v31 }
 0xe2a   :  { %v3519_v55 = vmul.f32 -1.442695, %v4631_v25 }
 0xe2b   :  { %v3520_v7 = vmul.f32 -1.442695, %v4632_v52  ;;  %v3521_v18 = vmul.f32 -1.442695, %v4648_v10 }
 0xe2c   :  { %4897 = vpow2.f32 %v3519_v55 }
 0xe2d   :  { %4899 = vpow2.f32 %v3520_v7 }
 0xe2e   :  { %4901 = vpow2.f32 %v3521_v18 }
 0xe2f   :  { %4903 = vtanh.f32 %v4647_v27 }
 0xe36   :  { %v4898_v53 = vpop.eup %4897 }
 0xe37   :  { %v4900_v41 = vpop.eup %4899  ;;  %v3035_v62 = vadd.f32 1.0, %v4898_v53 }
 0xe38   :  { %v3041_v49 = vadd.f32 1.0, %v4900_v41  ;;  %v4902_v63 = vpop.eup %4901 }
 0xe39   :  { %4905 = vrcp.f32 %v3035_v62  ;;  %v4904_v2 = vpop.eup %4903  ;;  %v3048_v16 = vadd.f32 1.0, %v4902_v63 }
 0xe3a   :  { %4907 = vrcp.f32 %v3041_v49 }
 0xe3b   :  { %4909 = vrcp.f32 %v3048_v16 }
 0xe43   :  { %v4906_v5 = vpop.eup %4905 }
 0xe44   :  { %v4908_v6 = vpop.eup %4907  ;;  %v3053_v12 = vmul.f32 %v4906_v5, %v4904_v2 }
 0xe45   :  { %v3052_v21 = vmul.f32 %v4908_v6, %v6087_v57  ;;  %v4910_v35 = vpop.eup %4909 }
 0xe47   :  { %v6132_v23 = vadd.f32 %v3053_v12, %v3052_v21 }
 0xe49   :  { %4911 = vtanh.f32 %v6132_v23 }
 0xe53   :  { %v4912_v43 = vpop.eup %4911 }
 0xe54   :  { %v3056_v37 = vmul.f32 %v4912_v43, %v4910_v35 }
 0xe56   :  { %3522 = vst [vmem:[%s6197_s6 + $0x28] sm:$0xff] %v3056_v37  ;;  %3131 = vmatmul.mubr.f32.vlgmr.msra.gmra.mrb[28].mxu0 %v3056_v37  ;;  %3202 = vmatmul.mubr.f32.vlgmr.msra.gmra.mrb[28].mxu1 %v3056_v37 }
 0xe57   :  { %4560 = vmatpush1.bf16.msra.mxu0 %v5735_v58  ;;  %4592 = vmatpush1.bf16.msra.mxu1 %v5740_v19 }
 0xe58   :  { %4562 = vmatprep.subr.bf16.mxu0 %v5745_v24  ;;  %4594 = vmatprep.subr.bf16.mxu1 %v5749_v40 }
 0xe59   :  { %3310 = vmatprep.mubr.f32.mxu0 %v4972_v0  ;;  %3381 = vmatprep.mubr.f32.mxu1 %v4972_v0 }
 0xe5b   :  { %4564 = vmatpush1.bf16.msra.mxu0 %v5747_v39  ;;  %4596 = vmatpush1.bf16.msra.mxu1 %v5752_v36 }
 0xe5c   :  { %4566 = vmatprep.subr.bf16.mxu0 %v5757_v61  ;;  %4598 = vmatprep.subr.bf16.mxu1 %v5761_v22 }
 0xe5f   :  { %4568 = vmatpush1.bf16.msra.mxu0 %v5759_v4  ;;  %4600 = vmatpush1.bf16.msra.mxu1 %v5764_v11 }
 0xe60   :  { %4570 = vmatprep.subr.bf16.mxu0 %v5769_v20  ;;  %4602 = vmatprep.subr.bf16.mxu1 %v5773_v34 }
 0xe63   :  { %4572 = vmatpush1.bf16.msra.mxu0 %v5771_v29  ;;  %4604 = vmatpush1.bf16.msra.mxu1 %v5776_v51 }
 0xe64   :  { %4574 = vmatprep.subr.bf16.mxu0 %v5781_v14  ;;  %4606 = vmatprep.subr.bf16.mxu1 %v5785_v33 }
 0xe67   :  { %4576 = vmatpush1.bf16.msra.mxu0 %v5783_v30  ;;  %4608 = vmatpush1.bf16.msra.mxu1 %v5788_v45 }
 0xe68   :  { %4578 = vmatprep.subr.bf16.mxu0 %v5793_v38  ;;  %4610 = vmatprep.subr.bf16.mxu1 %v5797_v1 }
 0xe6b   :  { %4580 = vmatpush1.bf16.msra.mxu0 %v5795_v54  ;;  %4612 = vmatpush1.bf16.msra.mxu1 %v5800_v15 }
 0xe6c   :  { %4582 = vmatprep.subr.bf16.mxu0 %v5805_v32  ;;  %4614 = vmatprep.subr.bf16.mxu1 %v5809_v60 }
 0xe6f   :  { %4584 = vmatpush1.bf16.msra.mxu0 %v5807_v59  ;;  %4616 = vmatpush1.bf16.msra.mxu1 %v5812_v3 }
 0xe70   :  { %4586 = vmatprep.subr.bf16.mxu0 %v5817_v13  ;;  %4618 = vmatprep.subr.bf16.mxu1 %v5821_v44 }
 0xe73   :  { %4588 = vmatpush1.bf16.msra.mxu0 %v5819_v28  ;;  %4620 = vmatpush1.bf16.msra.mxu1 %v5824_v8 }
 0xf29   :  { %v3132_v0 = vpop.f32.mrb[28].mxu0  ;;  %v3203_v58 = vpop.f32.mrb[28].mxu1 }
 0xf2a   :  { %v4633_v19 = vadd.f32 %v3132_v0, %v5892_v42  ;;  %v3134_v24 = vpop.f32.mrb[29].mxu0  ;;  %v3205_v39 = vpop.f32.mrb[29].mxu1  ;;  %v4649_v11 = vadd.f32 %v3203_v58, %v5901_v56 }
 0xf2b   :  { %v4634_v40 = vadd.f32 %v3134_v24, %v5894_v46  ;;  %v4650_v4 = vadd.f32 %v3205_v39, %v5898_v31 }
 0xf2c   :  { %v3523_v36 = vmul.f32 -1.442695, %v4633_v19 }
 0xf2d   :  { %v3524_v61 = vmul.f32 -1.442695, %v4634_v40  ;;  %v3525_v22 = vmul.f32 -1.442695, %v4650_v4 }
 0xf2e   :  { %4913 = vpow2.f32 %v3523_v36 }
 0xf2f   :  { %4915 = vpow2.f32 %v3524_v61 }
 0xf30   :  { %4917 = vpow2.f32 %v3525_v22 }
 0xf31   :  { %4919 = vtanh.f32 %v4649_v11 }
 0xf38   :  { %v4914_v20 = vpop.eup %4913 }
 0xf39   :  { %v4916_v29 = vpop.eup %4915  ;;  %v3215_v34 = vadd.f32 1.0, %v4914_v20 }
 0xf3a   :  { %v3221_v51 = vadd.f32 1.0, %v4916_v29  ;;  %v4918_v14 = vpop.eup %4917 }
 0xf3b   :  { %4921 = vrcp.f32 %v3215_v34  ;;  %v4920_v30 = vpop.eup %4919  ;;  %v3228_v54 = vadd.f32 1.0, %v4918_v14 }
 0xf3c   :  { %4923 = vrcp.f32 %v3221_v51 }
 0xf3d   :  { %4925 = vrcp.f32 %v3228_v54 }
 0xf45   :  { %v4922_v33 = vpop.eup %4921 }
 0xf46   :  { %v4924_v45 = vpop.eup %4923  ;;  %v3233_v38 = vmul.f32 %v4922_v33, %v4920_v30 }
 0xf47   :  { %v3232_v1 = vmul.f32 %v4924_v45, %v6132_v23  ;;  %v4926_v32 = vpop.eup %4925 }
 0xf49   :  { %v3234_v15 = vadd.f32 %v3233_v38, %v3232_v1 }
 0xf4b   :  { %4927 = vtanh.f32 %v3234_v15 }
 0xf55   :  { %v4928_v59 = vpop.eup %4927 }
 0xf56   :  { %v3236_v60 = vmul.f32 %v4928_v59, %v4926_v32 }
 0xf58   :  { %3526 = vst [vmem:[%s6197_s6 + $0x30] sm:$0xff] %v3236_v60  ;;  %3311 = vmatmul.mubr.f32.vlgmr.msra.gmra.mrb[30].mxu0 %v3236_v60  ;;  %3382 = vmatmul.mubr.f32.vlgmr.msra.gmra.mrb[30].mxu1 %v3236_v60 }
0x102b   :  { %v3312_v3 = vpop.f32.mrb[30].mxu0  ;;  %v3383_v13 = vpop.f32.mrb[30].mxu1 }
0x102c   :  { %v4635_v28 = vadd.f32 %v3312_v3, %v5892_v42  ;;  %v3314_v44 = vpop.f32.mrb[31].mxu0  ;;  %v3385_v8 = vpop.f32.mrb[31].mxu1  ;;  %v4651_v25 = vadd.f32 %v3383_v13, %v5901_v56 }
0x102d   :  { %v4636_v57 = vadd.f32 %v3314_v44, %v5894_v46  ;;  %v4652_v9 = vadd.f32 %v3385_v8, %v5898_v31 }
0x102e   :  { %v3527_v48 = vmul.f32 -1.442695, %v4635_v28 }
0x102f   :  { %v3528_v47 = vmul.f32 -1.442695, %v4636_v57  ;;  %v3529_v17 = vmul.f32 -1.442695, %v4652_v9 }
0x1030   :  { %4929 = vpow2.f32 %v3527_v48 }
0x1031   :  { %4931 = vpow2.f32 %v3528_v47 }
0x1032   :  { %4933 = vpow2.f32 %v3529_v17 }
0x1033   :  { %4935 = vtanh.f32 %v4651_v25 }
0x103a   :  { %v4930_v26 = vpop.eup %4929 }
0x103b   :  { %v4932_v50 = vpop.eup %4931  ;;  %v3395_v52 = vadd.f32 1.0, %v4930_v26 }
0x103c   :  { %v3401_v55 = vadd.f32 1.0, %v4932_v50  ;;  %v4934_v42 = vpop.eup %4933 }
0x103d   :  { %4937 = vrcp.f32 %v3395_v52  ;;  %v4936_v7 = vpop.eup %4935  ;;  %v3408_v27 = vadd.f32 1.0, %v4934_v42 }
0x103e   :  { %4939 = vrcp.f32 %v3401_v55 }
0x103f   :  { %4941 = vrcp.f32 %v3408_v27 }
0x1047   :  { %v4938_v46 = vpop.eup %4937 }
0x1048   :  { %v4940_v10 = vpop.eup %4939  ;;  %v3413_v18 = vmul.f32 %v4938_v46, %v4936_v7 }
0x1049   :  { %v3412_v53 = vmul.f32 %v4940_v10, %v3234_v15  ;;  %v4942_v31 = vpop.eup %4941 }
0x104b   :  { %v3414_v41 = vadd.f32 %v3413_v18, %v3412_v53 }
0x104d   :  { %4943 = vtanh.f32 %v3414_v41  ;;  %3532 = vst [vmem:[%s6199_s8 + $0x8] sm:$0xff] %v3414_v41 }
0x1057   :  { %v4944_v56 = vpop.eup %4943 }
0x1058   :  { %v3416_v62 = vmul.f32 %v4944_v56, %v4942_v31 }
0x105a   :  { %3530 = vst [vmem:[%s6197_s6 + $0x38] sm:$0xff] %v3416_v62  ;;  %3531 = vst [vmem:[%s6198_s7 + $0x8] sm:$0xff] %v3416_v62 }
0x105b   :  { %3438 = vsyncpa [#allocation6], 1 }

</bundles_post_ra>
